<compile_context>
chip_gen: v5e
topology: v5e:2x2
jax: 0.10.0
libtpu: 0.0.40
codegen_flags: <defaults>
</compile_context>

<pallas_src>
import jax
import jax.numpy as jnp
import numpy as np
from jax import lax
from jax.experimental import pallas as pl
from jax.experimental.pallas import tpu as pltpu

# Rows per image in the kernel's 2-D layout: 28 + 2 conv-pad rows, padded to 32
# so every per-image block is sublane-tile aligned.
_IMG_ROWS = 32
# Images per grid step (matmul M-fill).  Must be a multiple of 8; sweep 8..64.
_TB = 8


# ----------------------------- fused Pallas kernel ---------------------------

def _lenet_kernel(x_ref, m1_ref, m2_ref, wf1_ref, wf2_ref, wf3_ref, b_ref,
                  out_ref, xs_ref, s1_ref, s2_ref):
    """One grid step == TB images.  Row index = img*32 + h everywhere."""
    f32, bf16 = jnp.float32, jnp.bfloat16
    dot = lambda a, w: jnp.dot(a, w, preferred_element_type=f32)
    R = x_ref.shape[0]              # TB*32
    TB = R // _IMG_ROWS
    RH = R // 2                     # TB*16 rows after pooling conv1 along H

    # Stage the input block in a tail-padded scratch so the shifted row-window
    # reads for the merged conv1 taps never leave the allocation.
    xs_ref[pl.ds(0, R), :] = x_ref[...]
    xs_ref[pl.ds(R, 8), :] = jnp.zeros((8, x_ref.shape[1]), f32)

    # --- conv1 (3x3, pad=1): 3 taps merged along K (30 -> 90); W-direction ----
    # --- 2x2 max pooling folded into the [even-w | odd-w] output columns. -----
    xc = jnp.concatenate([xs_ref[pl.ds(d, R), :] for d in range(3)], axis=-1)
    y1 = dot(xc.astype(bf16), m1_ref[...])                   # (R, 168) f32
    y1 = jnp.maximum(y1[:, 0:84], y1[:, 84:168])              # max over W pairs
    y1 = jnp.maximum(y1 + b_ref[0:1, 0:84], 0.0)              # bias + ReLU
    s1_ref[pl.ds(0, R), :] = y1
    s1_ref[pl.ds(R, 8), :] = jnp.zeros((8, 84), f32)

    # --- H-pooling of conv1 fused with the conv2 tap gather: pooled row (h+d) -
    # --- of every image is max(s1[2(h+d)], s1[2(h+d)+1]); stride-2 reads. ------
    taps = []
    for d in range(5):
        ev = s1_ref[pl.ds(2 * d, RH, stride=2), :]
        od = s1_ref[pl.ds(2 * d + 1, RH, stride=2), :]
        taps.append(jnp.maximum(ev, od))                      # (RH, 84)
    p1c = jnp.concatenate(taps, axis=-1)                      # (RH, 420)

    # --- conv2 (5x5): 5 taps merged along K (84 -> 420); W pooling in N. ------
    y2 = dot(p1c.astype(bf16), m2_ref[...])                   # (RH, 160) f32
    y2 = jnp.maximum(y2[:, 0:80], y2[:, 80:160])
    y2 = jnp.maximum(y2 + b_ref[1:2, 0:80], 0.0)
    s2_ref[...] = y2                                          # (RH, 80)

    # --- H-pooling of conv2 fused with torch's view(-1, 400): fc1 block h -----
    # --- consumes pooled row h = max(rows 2h, 2h+1) of every image. -----------
    parts = []
    for h in range(5):
        ev = s2_ref[pl.ds(2 * h, TB, stride=16), :]
        od = s2_ref[pl.ds(2 * h + 1, TB, stride=16), :]
        parts.append(jnp.maximum(ev, od))                     # (TB, 80)
    p2 = jnp.concatenate(parts, axis=-1)                      # (TB, 400)

    # --- fc1 / fc2 / fc3 (fc1 is one K=400 contraction) ------------------------
    z = jnp.maximum(dot(p2.astype(bf16), wf1_ref[...]) + b_ref[2:3, 0:120], 0.0)
    z = jnp.maximum(dot(z.astype(bf16), wf2_ref[...]) + b_ref[3:4, 0:84], 0.0)
    z = dot(z.astype(bf16), wf3_ref[...]) + b_ref[4:5, 0:10]
    out_ref[...] = z                                          # (TB, 10) f32


# ----------------------- host-side operand preparation -----------------------

def _toeplitz_conv_mats(w, w_in):
    """(Cout,Cin,KH,KW) conv weight -> (KH, w_in*Cin, w_out*Cout) banded matrices.

    Input columns are (w, cin) with cin fastest; output columns (w_out, cout)
    with cout fastest.  One matmul per KH tap against a row-shifted activation.
    """
    Cout, Cin, KH, KW = w.shape
    w_out = w_in - KW + 1
    wi = jnp.arange(w_in)
    wo = jnp.arange(w_out)
    dj = wi[:, None] - wo[None, :]                          # (w_in, w_out)
    valid = (dj >= 0) & (dj < KW)
    djc = jnp.clip(dj, 0, KW - 1)
    wt = jnp.transpose(w, (2, 3, 1, 0))                     # (KH, KW, Cin, Cout)
    m = wt[:, djc, :, :]                                    # (KH, w_in, w_out, Cin, Cout)
    m = jnp.where(valid[None, :, :, None, None], m, 0.0)
    m = jnp.transpose(m, (0, 1, 3, 2, 4))                   # (KH, w_in, Cin, w_out, Cout)
    return m.reshape(KH, w_in * Cin, w_out * Cout)


def _pool_cols(w_out, c):
    """Column index sets selecting even/odd w positions in (w, c)-interleaved cols."""
    j = np.arange(0, w_out, 2)
    ch = np.arange(c)
    even = (j[:, None] * c + ch[None, :]).reshape(-1)
    odd = ((j + 1)[:, None] * c + ch[None, :]).reshape(-1)
    return even, odd


def _prep_operands(params):
    f32, bf16 = jnp.float32, jnp.bfloat16
    # conv1: merge the 3 row-taps along K and pack [even-w | odd-w] output cols
    # so a single matmul yields both candidates of the W-direction max pooling.
    m1 = _toeplitz_conv_mats(params["w_conv1"].astype(f32), 30).reshape(90, 168)
    e1, o1 = _pool_cols(28, 6)
    m1p = jnp.concatenate([m1[:, e1], m1[:, o1]], axis=1).astype(bf16)     # (90, 168)
    # conv2: same with 5 taps merged (K = 420).
    m2 = _toeplitz_conv_mats(params["w_conv2"].astype(f32), 14).reshape(420, 160)
    e2, o2 = _pool_cols(10, 16)
    m2p = jnp.concatenate([m2[:, e2], m2[:, o2]], axis=1).astype(bf16)     # (420, 160)
    # fc1 consumes our (h, w, c) flatten; fold torch's (c, h, w) order in.
    wf1 = params["w_fc1"].reshape(120, 16, 5, 5).transpose(2, 3, 1, 0)
    wf1 = wf1.reshape(400, 120).astype(bf16)
    wf2 = params["w_fc2"].T.astype(bf16)                                   # (120, 84)
    wf3 = params["w_fc3"].T.astype(bf16)                                   # (84, 10)
    # All biases packed into one (5, 128) f32 operand (exact f32 adds in-kernel).
    bias = jnp.zeros((5, 128), f32)
    bias = bias.at[0, 0:84].set(jnp.tile(params["b_conv1"], 14))
    bias = bias.at[1, 0:80].set(jnp.tile(params["b_conv2"], 5))
    bias = bias.at[2, 0:120].set(params["b_fc1"])
    bias = bias.at[3, 0:84].set(params["b_fc2"])
    bias = bias.at[4, 0:10].set(params["b_fc3"])
    return m1p, m2p, wf1, wf2, wf3, bias


# ------------------------------- forward pass ---------------------------------

@jax.jit
def lenet_forward(params, x_nchw):
    B = x_nchw.shape[0]
    tb = _TB
    B_pad = ((B + tb - 1) // tb) * tb
    x = x_nchw.reshape(B, 28, 28).astype(jnp.float32)
    if B_pad != B:
        x = jnp.pad(x, ((0, B_pad - B), (0, 0), (0, 0)))
    # conv1 padding=1 on both axes, plus 2 extra zero rows so each image spans
    # exactly 32 sublanes; flatten to the kernel's (B*32, 30) 2-D layout.
    xp = jnp.pad(x, ((0, 0), (1, 3), (1, 1)))               # (B_pad, 32, 30)
    x2d = xp.reshape(B_pad * _IMG_ROWS, 30)
    ops = _prep_operands(params)

    out = pl.pallas_call(
        _lenet_kernel,
        out_shape=jax.ShapeDtypeStruct((B_pad, 10), jnp.float32),
        grid=(B_pad // tb,),
        in_specs=[pl.BlockSpec((tb * _IMG_ROWS, 30), lambda b: (b, 0))]
                 + [pl.BlockSpec(a.shape, lambda b: (0, 0)) for a in ops],
        out_specs=pl.BlockSpec((tb, 10), lambda b: (b, 0)),
        scratch_shapes=[pltpu.VMEM((tb * _IMG_ROWS + 8, 30), jnp.float32),  # staged input
                        pltpu.VMEM((tb * _IMG_ROWS + 8, 84), jnp.float32),  # conv1 act (W-pooled)
                        pltpu.VMEM((tb * _IMG_ROWS // 2, 80), jnp.float32)],  # conv2 act (W-pooled)
        compiler_params=pltpu.CompilerParams(
            dimension_semantics=("parallel",)),
    )(x2d, *ops)
    return out[:B]


# ------------------------------- parameters ----------------------------------

def init_params(key):
    """Deterministic init mirroring the nn.Module shapes (PyTorch-style uniform)."""
    def u(k, shape, fan_in):
        bound = 1.0 / np.sqrt(fan_in)
        return jax.random.uniform(k, shape, jnp.float32, -bound, bound)

    ks = jax.random.split(key, 10)
    return {
        "w_conv1": u(ks[0], (6, 1, 3, 3), 1 * 3 * 3),
        "b_conv1": u(ks[1], (6,), 1 * 3 * 3),
        "w_conv2": u(ks[2], (16, 6, 5, 5), 6 * 5 * 5),
        "b_conv2": u(ks[3], (16,), 6 * 5 * 5),
        "w_fc1": u(ks[4], (120, 400), 400),
        "b_fc1": u(ks[5], (120,), 400),
        "w_fc2": u(ks[6], (84, 120), 120),
        "b_fc2": u(ks[7], (84,), 120),
        "w_fc3": u(ks[8], (10, 84), 84),
        "b_fc3": u(ks[9], (10,), 84),
    }


# -------------------------- pure-JAX reference (check) ------------------------

def lenet_reference(params, x):
    dn1 = lax.conv_dimension_numbers(x.shape, params["w_conv1"].shape,
                                     ("NCHW", "OIHW", "NCHW"))
    y = lax.conv_general_dilated(x, params["w_conv1"], (1, 1), ((1, 1), (1, 1)),
                                 dimension_numbers=dn1)
    y = jax.nn.relu(y + params["b_conv1"][None, :, None, None])
    y = lax.reduce_window(y, -jnp.inf, lax.max, (1, 1, 2, 2), (1, 1, 2, 2), "VALID")
    dn2 = lax.conv_dimension_numbers(y.shape, params["w_conv2"].shape,
                                     ("NCHW", "OIHW", "NCHW"))
    y = lax.conv_general_dilated(y, params["w_conv2"], (1, 1), ((0, 0), (0, 0)),
                                 dimension_numbers=dn2)
    y = jax.nn.relu(y + params["b_conv2"][None, :, None, None])
    y = lax.reduce_window(y, -jnp.inf, lax.max, (1, 1, 2, 2), (1, 1, 2, 2), "VALID")
    y = y.reshape(y.shape[0], 400)
    y = jax.nn.relu(jnp.dot(y, params["w_fc1"].T) + params["b_fc1"])
    y = jax.nn.relu(jnp.dot(y, params["w_fc2"].T) + params["b_fc2"])
    return jnp.dot(y, params["w_fc3"].T) + params["b_fc3"]


# ----------------------------------- main --------------------------------------

if __name__ == "__main__":
    key = jax.random.PRNGKey(0)
    k_params, k_x = jax.random.split(key)
    params = init_params(k_params)
    # LeNet's fc1 expects 400 = 16*5*5 features, which implies 28x28 inputs.
    # B=16 with TB=8 -> grid of 2 steps (keeps both v7x TensorCores busy).
    x = jax.random.normal(k_x, (16, 1, 28, 28), dtype=jnp.float32)

    out = jax.block_until_ready(lenet_forward(params, x))
    assert out.shape == (16, 10), out.shape

    ref = jax.block_until_ready(lenet_reference(params, x))
    np.testing.assert_allclose(np.asarray(out), np.asarray(ref), rtol=2e-2, atol=2e-2)

    print("KERNEL_OK")
</pallas_src>

<mosaic_0001>
module attributes {stable_mosaic.version = 11 : i64} {
  func.func @_lenet_kernel(%arg0: i32, %arg1: memref<256x30xf32, #tpu.memory_space<vmem>>, %arg2: memref<90x168xbf16, #tpu.memory_space<vmem>>, %arg3: memref<420x160xbf16, #tpu.memory_space<vmem>>, %arg4: memref<400x120xbf16, #tpu.memory_space<vmem>>, %arg5: memref<120x84xbf16, #tpu.memory_space<vmem>>, %arg6: memref<84x10xbf16, #tpu.memory_space<vmem>>, %arg7: memref<5x128xf32, #tpu.memory_space<vmem>>, %arg8: memref<8x10xf32, #tpu.memory_space<vmem>>, %arg9: memref<264x30xf32, #tpu.memory_space<vmem>>, %arg10: memref<264x84xf32, #tpu.memory_space<vmem>>, %arg11: memref<128x80xf32, #tpu.memory_space<vmem>>) attributes {dimension_semantics = [#tpu.dimension_semantics<parallel>], iteration_bounds = array<i64: 2>, scalar_prefetch = 0 : i64, scratch_operands = 3 : i64, tpu.core_type = #tpu.core_type<tc>, window_params = [{transform_indices = @transform_0, window_bounds = array<i64: 256, 30>}, {pipeline_mode = #tpu.pipeline_mode<synchronous>, transform_indices = @transform_1, window_bounds = array<i64: 90, 168>}, {pipeline_mode = #tpu.pipeline_mode<synchronous>, transform_indices = @transform_2, window_bounds = array<i64: 420, 160>}, {pipeline_mode = #tpu.pipeline_mode<synchronous>, transform_indices = @transform_3, window_bounds = array<i64: 400, 120>}, {pipeline_mode = #tpu.pipeline_mode<synchronous>, transform_indices = @transform_4, window_bounds = array<i64: 120, 84>}, {pipeline_mode = #tpu.pipeline_mode<synchronous>, transform_indices = @transform_5, window_bounds = array<i64: 84, 10>}, {pipeline_mode = #tpu.pipeline_mode<synchronous>, transform_indices = @transform_6, window_bounds = array<i64: 5, 128>}, {transform_indices = @transform_7, window_bounds = array<i64: 8, 10>}]} {
    %c0 = arith.constant 0 : index
    %c0_0 = arith.constant 0 : index
    %0 = vector.load %arg1[%c0, %c0_0] : memref<256x30xf32, #tpu.memory_space<vmem>>, vector<256x30xf32>
    %c0_1 = arith.constant 0 : index
    %c0_2 = arith.constant 0 : index
    %1 = vector.load %arg9[%c0_1, %c0_2] : memref<264x30xf32, #tpu.memory_space<vmem>>, vector<256x30xf32>
    tpu.vector_store %arg9[%c0_1, %c0_2], %0 {strides = array<i32>} : memref<264x30xf32, #tpu.memory_space<vmem>>, vector<256x30xf32>,
    %cst = arith.constant 0.000000e+00 : f32
    %2 = vector.broadcast %cst : f32 to vector<8x30xf32>
    %c256 = arith.constant 256 : index
    %c0_3 = arith.constant 0 : index
    %3 = vector.load %arg9[%c256, %c0_3] : memref<264x30xf32, #tpu.memory_space<vmem>>, vector<8x30xf32>
    tpu.vector_store %arg9[%c256, %c0_3], %2 {strides = array<i32>} : memref<264x30xf32, #tpu.memory_space<vmem>>, vector<8x30xf32>,
    %c0_4 = arith.constant 0 : index
    %c0_5 = arith.constant 0 : index
    %4 = vector.load %arg9[%c0_4, %c0_5] : memref<264x30xf32, #tpu.memory_space<vmem>>, vector<256x30xf32>
    %c1 = arith.constant 1 : index
    %c0_6 = arith.constant 0 : index
    %5 = vector.load %arg9[%c1, %c0_6] : memref<264x30xf32, #tpu.memory_space<vmem>>, vector<256x30xf32>
    %c2 = arith.constant 2 : index
    %c0_7 = arith.constant 0 : index
    %6 = vector.load %arg9[%c2, %c0_7] : memref<264x30xf32, #tpu.memory_space<vmem>>, vector<256x30xf32>
    %7 = tpu.concatenate %4, %5, %6 in 1 : vector<256x30xf32>, vector<256x30xf32>, vector<256x30xf32> -> vector<256x90xf32>
    %8 = arith.truncf %7 : vector<256x90xf32> to vector<256x90xbf16>
    %c0_8 = arith.constant 0 : index
    %c0_9 = arith.constant 0 : index
    %9 = vector.load %arg2[%c0_8, %c0_9] : memref<90x168xbf16, #tpu.memory_space<vmem>>, vector<90x168xbf16>
    %cst_10 = arith.constant dense<0.000000e+00> : vector<256x168xf32>
    %10 = tpu.matmul %8, %9, %cst_10 {dimension_numbers = #tpu.dot_dimension_numbers<[1], [0], [0], [1], [0, 0, 1, 1], [], []>} : vector<256x90xbf16>, vector<90x168xbf16>, vector<256x168xf32> -> vector<256x168xf32>
    %11 = vector.extract_strided_slice %10 {offsets = [0, 0], sizes = [256, 84], strides = [1, 1]} : vector<256x168xf32> to vector<256x84xf32>
    %12 = vector.extract_strided_slice %10 {offsets = [0, 84], sizes = [256, 84], strides = [1, 1]} : vector<256x168xf32> to vector<256x84xf32>
    %13 = arith.maximumf %11, %12 : vector<256x84xf32>
    %c0_11 = arith.constant 0 : index
    %c0_12 = arith.constant 0 : index
    %14 = vector.load %arg7[%c0_11, %c0_12] : memref<5x128xf32, #tpu.memory_space<vmem>>, vector<1x84xf32>
    %15 = vector.broadcast %14 : vector<1x84xf32> to vector<256x84xf32>
    %16 = arith.addf %13, %15 : vector<256x84xf32>
    %cst_13 = arith.constant 0.000000e+00 : f32
    %17 = vector.broadcast %cst_13 : f32 to vector<256x84xf32>
    %18 = arith.maximumf %16, %17 : vector<256x84xf32>
    %c0_14 = arith.constant 0 : index
    %c0_15 = arith.constant 0 : index
    %19 = vector.load %arg10[%c0_14, %c0_15] : memref<264x84xf32, #tpu.memory_space<vmem>>, vector<256x84xf32>
    tpu.vector_store %arg10[%c0_14, %c0_15], %18 {strides = array<i32>} : memref<264x84xf32, #tpu.memory_space<vmem>>, vector<256x84xf32>,
    %cst_16 = arith.constant 0.000000e+00 : f32
    %20 = vector.broadcast %cst_16 : f32 to vector<8x84xf32>
    %c256_17 = arith.constant 256 : index
    %c0_18 = arith.constant 0 : index
    %21 = vector.load %arg10[%c256_17, %c0_18] : memref<264x84xf32, #tpu.memory_space<vmem>>, vector<8x84xf32>
    tpu.vector_store %arg10[%c256_17, %c0_18], %20 {strides = array<i32>} : memref<264x84xf32, #tpu.memory_space<vmem>>, vector<8x84xf32>,
    %c0_19 = arith.constant 0 : index
    %c0_20 = arith.constant 0 : index
    %22 = tpu.strided_load %arg10[%c0_19, %c0_20] {strides = array<i32: 2, 1>} : memref<264x84xf32, #tpu.memory_space<vmem>>, vector<128x84xf32>
    %c1_21 = arith.constant 1 : index
    %c0_22 = arith.constant 0 : index
    %23 = tpu.strided_load %arg10[%c1_21, %c0_22] {strides = array<i32: 2, 1>} : memref<264x84xf32, #tpu.memory_space<vmem>>, vector<128x84xf32>
    %24 = arith.maximumf %22, %23 : vector<128x84xf32>
    %c2_23 = arith.constant 2 : index
    %c0_24 = arith.constant 0 : index
    %25 = tpu.strided_load %arg10[%c2_23, %c0_24] {strides = array<i32: 2, 1>} : memref<264x84xf32, #tpu.memory_space<vmem>>, vector<128x84xf32>
    %c3 = arith.constant 3 : index
    %c0_25 = arith.constant 0 : index
    %26 = tpu.strided_load %arg10[%c3, %c0_25] {strides = array<i32: 2, 1>} : memref<264x84xf32, #tpu.memory_space<vmem>>, vector<128x84xf32>
    %27 = arith.maximumf %25, %26 : vector<128x84xf32>
    %c4 = arith.constant 4 : index
    %c0_26 = arith.constant 0 : index
    %28 = tpu.strided_load %arg10[%c4, %c0_26] {strides = array<i32: 2, 1>} : memref<264x84xf32, #tpu.memory_space<vmem>>, vector<128x84xf32>
    %c5 = arith.constant 5 : index
    %c0_27 = arith.constant 0 : index
    %29 = tpu.strided_load %arg10[%c5, %c0_27] {strides = array<i32: 2, 1>} : memref<264x84xf32, #tpu.memory_space<vmem>>, vector<128x84xf32>
    %30 = arith.maximumf %28, %29 : vector<128x84xf32>
    %c6 = arith.constant 6 : index
    %c0_28 = arith.constant 0 : index
    %31 = tpu.strided_load %arg10[%c6, %c0_28] {strides = array<i32: 2, 1>} : memref<264x84xf32, #tpu.memory_space<vmem>>, vector<128x84xf32>
    %c7 = arith.constant 7 : index
    %c0_29 = arith.constant 0 : index
    %32 = tpu.strided_load %arg10[%c7, %c0_29] {strides = array<i32: 2, 1>} : memref<264x84xf32, #tpu.memory_space<vmem>>, vector<128x84xf32>
    %33 = arith.maximumf %31, %32 : vector<128x84xf32>
    %c8 = arith.constant 8 : index
    %c0_30 = arith.constant 0 : index
    %34 = tpu.strided_load %arg10[%c8, %c0_30] {strides = array<i32: 2, 1>} : memref<264x84xf32, #tpu.memory_space<vmem>>, vector<128x84xf32>
    %c9 = arith.constant 9 : index
    %c0_31 = arith.constant 0 : index
    %35 = tpu.strided_load %arg10[%c9, %c0_31] {strides = array<i32: 2, 1>} : memref<264x84xf32, #tpu.memory_space<vmem>>, vector<128x84xf32>
    %36 = arith.maximumf %34, %35 : vector<128x84xf32>
    %37 = tpu.concatenate %24, %27, %30, %33, %36 in 1 : vector<128x84xf32>, vector<128x84xf32>, vector<128x84xf32>, vector<128x84xf32>, vector<128x84xf32> -> vector<128x420xf32>
    %38 = arith.truncf %37 : vector<128x420xf32> to vector<128x420xbf16>
    %c0_32 = arith.constant 0 : index
    %c0_33 = arith.constant 0 : index
    %39 = vector.load %arg3[%c0_32, %c0_33] : memref<420x160xbf16, #tpu.memory_space<vmem>>, vector<420x160xbf16>
    %cst_34 = arith.constant dense<0.000000e+00> : vector<128x160xf32>
    %40 = tpu.matmul %38, %39, %cst_34 {dimension_numbers = #tpu.dot_dimension_numbers<[1], [0], [0], [1], [0, 0, 1, 1], [], []>} : vector<128x420xbf16>, vector<420x160xbf16>, vector<128x160xf32> -> vector<128x160xf32>
    %41 = vector.extract_strided_slice %40 {offsets = [0, 0], sizes = [128, 80], strides = [1, 1]} : vector<128x160xf32> to vector<128x80xf32>
    %42 = vector.extract_strided_slice %40 {offsets = [0, 80], sizes = [128, 80], strides = [1, 1]} : vector<128x160xf32> to vector<128x80xf32>
    %43 = arith.maximumf %41, %42 : vector<128x80xf32>
    %c1_35 = arith.constant 1 : index
    %c0_36 = arith.constant 0 : index
    %44 = vector.load %arg7[%c1_35, %c0_36] : memref<5x128xf32, #tpu.memory_space<vmem>>, vector<1x80xf32>
    %45 = vector.broadcast %44 : vector<1x80xf32> to vector<128x80xf32>
    %46 = arith.addf %43, %45 : vector<128x80xf32>
    %cst_37 = arith.constant 0.000000e+00 : f32
    %47 = vector.broadcast %cst_37 : f32 to vector<128x80xf32>
    %48 = arith.maximumf %46, %47 : vector<128x80xf32>
    %c0_38 = arith.constant 0 : index
    %c0_39 = arith.constant 0 : index
    %49 = vector.load %arg11[%c0_38, %c0_39] : memref<128x80xf32, #tpu.memory_space<vmem>>, vector<128x80xf32>
    tpu.vector_store %arg11[%c0_38, %c0_39], %48 {strides = array<i32>} : memref<128x80xf32, #tpu.memory_space<vmem>>, vector<128x80xf32>,
    %c0_40 = arith.constant 0 : index
    %c0_41 = arith.constant 0 : index
    %50 = tpu.strided_load %arg11[%c0_40, %c0_41] {strides = array<i32: 16, 1>} : memref<128x80xf32, #tpu.memory_space<vmem>>, vector<8x80xf32>
    %c1_42 = arith.constant 1 : index
    %c0_43 = arith.constant 0 : index
    %51 = tpu.strided_load %arg11[%c1_42, %c0_43] {strides = array<i32: 16, 1>} : memref<128x80xf32, #tpu.memory_space<vmem>>, vector<8x80xf32>
    %52 = arith.maximumf %50, %51 : vector<8x80xf32>
    %c2_44 = arith.constant 2 : index
    %c0_45 = arith.constant 0 : index
    %53 = tpu.strided_load %arg11[%c2_44, %c0_45] {strides = array<i32: 16, 1>} : memref<128x80xf32, #tpu.memory_space<vmem>>, vector<8x80xf32>
    %c3_46 = arith.constant 3 : index
    %c0_47 = arith.constant 0 : index
    %54 = tpu.strided_load %arg11[%c3_46, %c0_47] {strides = array<i32: 16, 1>} : memref<128x80xf32, #tpu.memory_space<vmem>>, vector<8x80xf32>
    %55 = arith.maximumf %53, %54 : vector<8x80xf32>
    %c4_48 = arith.constant 4 : index
    %c0_49 = arith.constant 0 : index
    %56 = tpu.strided_load %arg11[%c4_48, %c0_49] {strides = array<i32: 16, 1>} : memref<128x80xf32, #tpu.memory_space<vmem>>, vector<8x80xf32>
    %c5_50 = arith.constant 5 : index
    %c0_51 = arith.constant 0 : index
    %57 = tpu.strided_load %arg11[%c5_50, %c0_51] {strides = array<i32: 16, 1>} : memref<128x80xf32, #tpu.memory_space<vmem>>, vector<8x80xf32>
    %58 = arith.maximumf %56, %57 : vector<8x80xf32>
    %c6_52 = arith.constant 6 : index
    %c0_53 = arith.constant 0 : index
    %59 = tpu.strided_load %arg11[%c6_52, %c0_53] {strides = array<i32: 16, 1>} : memref<128x80xf32, #tpu.memory_space<vmem>>, vector<8x80xf32>
    %c7_54 = arith.constant 7 : index
    %c0_55 = arith.constant 0 : index
    %60 = tpu.strided_load %arg11[%c7_54, %c0_55] {strides = array<i32: 16, 1>} : memref<128x80xf32, #tpu.memory_space<vmem>>, vector<8x80xf32>
    %61 = arith.maximumf %59, %60 : vector<8x80xf32>
    %c8_56 = arith.constant 8 : index
    %c0_57 = arith.constant 0 : index
    %62 = tpu.strided_load %arg11[%c8_56, %c0_57] {strides = array<i32: 16, 1>} : memref<128x80xf32, #tpu.memory_space<vmem>>, vector<8x80xf32>
    %c9_58 = arith.constant 9 : index
    %c0_59 = arith.constant 0 : index
    %63 = tpu.strided_load %arg11[%c9_58, %c0_59] {strides = array<i32: 16, 1>} : memref<128x80xf32, #tpu.memory_space<vmem>>, vector<8x80xf32>
    %64 = arith.maximumf %62, %63 : vector<8x80xf32>
    %65 = tpu.concatenate %52, %55, %58, %61, %64 in 1 : vector<8x80xf32>, vector<8x80xf32>, vector<8x80xf32>, vector<8x80xf32>, vector<8x80xf32> -> vector<8x400xf32>
    %66 = arith.truncf %65 : vector<8x400xf32> to vector<8x400xbf16>
    %c0_60 = arith.constant 0 : index
    %c0_61 = arith.constant 0 : index
    %67 = vector.load %arg4[%c0_60, %c0_61] : memref<400x120xbf16, #tpu.memory_space<vmem>>, vector<400x120xbf16>
    %cst_62 = arith.constant dense<0.000000e+00> : vector<8x120xf32>
    %68 = tpu.matmul %66, %67, %cst_62 {dimension_numbers = #tpu.dot_dimension_numbers<[1], [0], [0], [1], [0, 0, 1, 1], [], []>} : vector<8x400xbf16>, vector<400x120xbf16>, vector<8x120xf32> -> vector<8x120xf32>
    %c2_63 = arith.constant 2 : index
    %c0_64 = arith.constant 0 : index
    %69 = vector.load %arg7[%c2_63, %c0_64] : memref<5x128xf32, #tpu.memory_space<vmem>>, vector<1x120xf32>
    %70 = vector.broadcast %69 : vector<1x120xf32> to vector<8x120xf32>
    %71 = arith.addf %68, %70 : vector<8x120xf32>
    %cst_65 = arith.constant 0.000000e+00 : f32
    %72 = vector.broadcast %cst_65 : f32 to vector<8x120xf32>
    %73 = arith.maximumf %71, %72 : vector<8x120xf32>
    %74 = arith.truncf %73 : vector<8x120xf32> to vector<8x120xbf16>
    %c0_66 = arith.constant 0 : index
    %c0_67 = arith.constant 0 : index
    %75 = vector.load %arg5[%c0_66, %c0_67] : memref<120x84xbf16, #tpu.memory_space<vmem>>, vector<120x84xbf16>
    %cst_68 = arith.constant dense<0.000000e+00> : vector<8x84xf32>
    %76 = tpu.matmul %74, %75, %cst_68 {dimension_numbers = #tpu.dot_dimension_numbers<[1], [0], [0], [1], [0, 0, 1, 1], [], []>} : vector<8x120xbf16>, vector<120x84xbf16>, vector<8x84xf32> -> vector<8x84xf32>
    %c3_69 = arith.constant 3 : index
    %c0_70 = arith.constant 0 : index
    %77 = vector.load %arg7[%c3_69, %c0_70] : memref<5x128xf32, #tpu.memory_space<vmem>>, vector<1x84xf32>
    %78 = vector.broadcast %77 : vector<1x84xf32> to vector<8x84xf32>
    %79 = arith.addf %76, %78 : vector<8x84xf32>
    %cst_71 = arith.constant 0.000000e+00 : f32
    %80 = vector.broadcast %cst_71 : f32 to vector<8x84xf32>
    %81 = arith.maximumf %79, %80 : vector<8x84xf32>
    %82 = arith.truncf %81 : vector<8x84xf32> to vector<8x84xbf16>
    %c0_72 = arith.constant 0 : index
    %c0_73 = arith.constant 0 : index
    %83 = vector.load %arg6[%c0_72, %c0_73] : memref<84x10xbf16, #tpu.memory_space<vmem>>, vector<84x10xbf16>
    %cst_74 = arith.constant dense<0.000000e+00> : vector<8x10xf32>
    %84 = tpu.matmul %82, %83, %cst_74 {dimension_numbers = #tpu.dot_dimension_numbers<[1], [0], [0], [1], [0, 0, 1, 1], [], []>} : vector<8x84xbf16>, vector<84x10xbf16>, vector<8x10xf32> -> vector<8x10xf32>
    %c4_75 = arith.constant 4 : index
    %c0_76 = arith.constant 0 : index
    %85 = vector.load %arg7[%c4_75, %c0_76] : memref<5x128xf32, #tpu.memory_space<vmem>>, vector<1x10xf32>
    %86 = vector.broadcast %85 : vector<1x10xf32> to vector<8x10xf32>
    %87 = arith.addf %84, %86 : vector<8x10xf32>
    %c0_77 = arith.constant 0 : index
    %c0_78 = arith.constant 0 : index
    %88 = vector.load %arg8[%c0_77, %c0_78] : memref<8x10xf32, #tpu.memory_space<vmem>>, vector<8x10xf32>
    tpu.vector_store %arg8[%c0_77, %c0_78], %87 {strides = array<i32>} : memref<8x10xf32, #tpu.memory_space<vmem>>, vector<8x10xf32>,
    return
  }
  func.func @transform_0(%arg0: i32) -> (i32, i32) {
    %c0_i32 = arith.constant 0 : i32
    %c0_i32_0 = arith.constant 0 : i32
    return %arg0, %c0_i32 : i32, i32
  }
  func.func @transform_1(%arg0: i32) -> (i32, i32) {
    %c0_i32 = arith.constant 0 : i32
    %c0_i32_0 = arith.constant 0 : i32
    %c0_i32_1 = arith.constant 0 : i32
    return %c0_i32, %c0_i32_0 : i32, i32
  }
  func.func @transform_2(%arg0: i32) -> (i32, i32) {
    %c0_i32 = arith.constant 0 : i32
    %c0_i32_0 = arith.constant 0 : i32
    %c0_i32_1 = arith.constant 0 : i32
    return %c0_i32, %c0_i32_0 : i32, i32
  }
  func.func @transform_3(%arg0: i32) -> (i32, i32) {
    %c0_i32 = arith.constant 0 : i32
    %c0_i32_0 = arith.constant 0 : i32
    %c0_i32_1 = arith.constant 0 : i32
    return %c0_i32, %c0_i32_0 : i32, i32
  }
  func.func @transform_4(%arg0: i32) -> (i32, i32) {
    %c0_i32 = arith.constant 0 : i32
    %c0_i32_0 = arith.constant 0 : i32
    %c0_i32_1 = arith.constant 0 : i32
    return %c0_i32, %c0_i32_0 : i32, i32
  }
  func.func @transform_5(%arg0: i32) -> (i32, i32) {
    %c0_i32 = arith.constant 0 : i32
    %c0_i32_0 = arith.constant 0 : i32
    %c0_i32_1 = arith.constant 0 : i32
    return %c0_i32, %c0_i32_0 : i32, i32
  }
  func.func @transform_6(%arg0: i32) -> (i32, i32) {
    %c0_i32 = arith.constant 0 : i32
    %c0_i32_0 = arith.constant 0 : i32
    %c0_i32_1 = arith.constant 0 : i32
    return %c0_i32, %c0_i32_0 : i32, i32
  }
  func.func @transform_7(%arg0: i32) -> (i32, i32) {
    %c0_i32 = arith.constant 0 : i32
    %c0_i32_0 = arith.constant 0 : i32
    return %arg0, %c0_i32 : i32, i32
  }
}

</mosaic_0001>

<bundles_post_ra>
// kernel: tile.13
= control target key start
LH: loop header
LB: loop body
LE: loop exit
PB: predicated region body
PF: predicated region fallthrough
CT: control target
= control target key end

     0   :  { %s28_s0 = inlined_call_operand.vmem [shape: f32[6], index: 0, kind: input, shape index: {}]   ;;  %s29_s1 = inlined_call_operand.vmem [shape: f32[14,6], index: 1, kind: output, shape index: {}]  }
   0x1   :  { %v4_v0 = vld [vmem:[%s28_s0] ss:$0 sm:$0xff] }
   0x2   :  { %5 = vst [vmem:[%s29_s1] sm:$0xff] %v4_v0 }
   0x3   :  { %8 = vst [vmem:[%s29_s1 + $0x8] sm:$0xff] %v4_v0 }

// kernel: tile.18
= control target key start
LH: loop header
LB: loop body
LE: loop exit
PB: predicated region body
PF: predicated region fallthrough
CT: control target
= control target key end

     0   :  { %s22_s0 = inlined_call_operand.vmem [shape: f32[16], index: 0, kind: input, shape index: {}]   ;;  %s23_s1 = inlined_call_operand.vmem [shape: f32[5,16], index: 1, kind: output, shape index: {}]  }
   0x1   :  { %v4_v0 = vld [vmem:[%s22_s0] ss:$0 sm:$0xff] }
   0x2   :  { %5 = vst [vmem:[%s23_s1] sm:$0xff] %v4_v0 }

// kernel: lenet_forward.1
= control target key start
LH: loop header
LB: loop body
LE: loop exit
PB: predicated region body
PF: predicated region fallthrough
CT: control target
= control target key end

     0   :  { %12 = vsyncpa [#allocation6], 0  ;;  %s6468_s0 = inlined_call_operand.vmem [shape: f32[512,30], index: 0, kind: input, shape index: {}]   ;;  %s6469_s1 = inlined_call_operand.vmem [shape: bf16[90,168], index: 1, kind: input, shape index: {}]   ;;  %s6470_s2 = inlined_call_operand.vmem [shape: bf16[420,160], index: 2, kind: input, shape index: {}]   ;;  %s6471_s3 = inlined_call_operand.vmem [shape: bf16[400,120], index: 3, kind: input, shape index: {}]   ;;  %s6472_s4 = inlined_call_operand.vmem [shape: bf16[120,84], index: 4, kind: input, shape index: {}]   ;;  %s6473_s5 = inlined_call_operand.vmem [shape: bf16[84,10], index: 5, kind: input, shape index: {}]   ;;  %s6474_s6 = inlined_call_operand.vmem [shape: f32[5,128], index: 6, kind: input, shape index: {}]   ;;  %s6475_s7 = inlined_call_operand.hbm [shape: f32[16,10], index: 7, kind: output, shape index: {}]  }
   0x1   :  { %14 = vsyncpa [#allocation6 + $0x1], 0  ;;  %s4821_s24 = smov 0   ;;  %s4823_s25 = smov 0  }
   0x2   :  { %s4825_s26 = smov 0   ;;  %s4827_s27 = smov 0  }
   0x3 LB: > { %s4842_s28 = sadd.s32 4294967295, %s4767_s27   ;;  %s3761_s29 = sadd.s32 4294967294, %s4767_s27   ;;  %s4767_s27 = sphi %s4827_s27, %s6481_s27   ;;  %s4763_s26 = sphi %s4825_s26, %s6480_s26   ;;  %s4759_s25 = sphi %s4823_s25, %s6479_s25   ;;  %s4755_s24 = sphi %s4821_s24, %s6478_s24  }
   0x4   : > { %s4846_s30 = sadd.s32 1, %s4767_s27   ;;  %s179_s8 = sadd.s32 1, %s4763_s26 }
   0x5   : > { %s176_s9 = ssub.s32 %s4767_s27, %s4846_s30  ;;  %p189_p0 = scmp.ne.s32.totalorder %s4763_s26, %s4759_s25 }
   0x6   : > { %p177_p1 = scmp.eq.s32.totalorder %s176_s9, 0  ;;  %p190_p2 = scmp.eq.s32.totalorder %s4842_s28, 1 }
   0x7   : > { %p195_p3 = scmp.ne.s32.totalorder %s4759_s25, %s4755_s24  ;;  %p196_p4 = scmp.eq.s32.totalorder %s3761_s29, 1 }
   0x8   : > { %s4857_s10 = scalar_select %p177_p1, %s4763_s26, %s179_s8  }
   0x9   : > { %p4859_p5 = por %p190_p2, %p189_p0  ;;  %p4863_p6 = por %p196_p4, %p195_p3 }
   0xa   : > { %p3764_p7 = scmp.ge.s32.totalorder %s4767_s27, 1  ;;  %p241_p8 = scmp.lt.s32.totalorder %s4767_s27, 3 }
   0xc   : > { %p242_p9 = pnand %p3764_p7, %p241_p8 }
   0xd   : > { %s3766_s13 = sshll.u32 (!%p242_p9), %s4842_s28, 5  ;;  %s4769_s18 = smov (!%p242_p9), 30  }
   0xe   : > { %245 = sbr.rel (%p242_p9) target bundleno = 1872 (0x750), region = 48  ;;  %p274_p10 = scmp.lt.s32.totalorder (!%p242_p9), %s3766_s13, 63 }
   0xf   : > { %s4770_s23 = smov (!%p242_p9), 60   ;;  %s4773_s22 = smov (!%p242_p9), 124  }
  0x10   : > { %s4774_s29 = smov (!%p242_p9), 40   ;;  %s4775_s8 = smov (!%p242_p9), 84  }
  0x11   : > { %s4777_s15 = smov (!%p242_p9), 48   ;;  %s4780_s9 = smov (!%p242_p9), 64  }
  0x13   : > { %s6483_s13 = smov (!%p274_p10, %s3766_s13), 63  ;;  %vm312_vm0 = vcmask 244736   ;;  %v3810_v26 = vld [vmem:[%s6469_s1 + $0x50] sm:$0xf]  ;;  %v4238_v29 = vld [vmem:[%s6469_s1 + $0x54] sm:$0x10] }
  0x14   : > { %s3767_s14 = sshll.u32 %s6483_s13, 3  ;;  %vm898_vm1 = vcmask 1044480   ;;  %v3811_v31 = vor.u32 %v4238_v29, %v3810_v26  ;;  %v4237_v32 = vld [vmem:[%s6469_s1 + $0x54] sm:$0xf]  ;;  %v3812_v35 = vld [vmem:[%s6469_s1 + $0x58] sm:$0x10] }
  0x15   : > { %s4873_s17 = scalar_lea.vmem %s6468_s0, %s3767_s14  ;;  %v3815_v38 = vor.u32 %v4237_v32, %v3812_v35  ;;  %v3802_v39 = vld [vmem:[%s6469_s1 + $0x40] sm:$0xf]  ;;  %v4236_v40 = vld [vmem:[%s6469_s1 + $0x44] sm:$0xf0]  ;;  %v4235_v42 = vld [vmem:[%s6469_s1 + $0x44] sm:$0xf] }
  0x16   : > { %v280_v0 = vld [vmem:[%s4873_s17] sm:$0xff]  ;;  %v281_v1 = vld [vmem:[%s4873_s17 + $0x8] sm:$0xff]  ;;  %v282_v2 = vld [vmem:[%s4873_s17 + $0x10] sm:$0xff]  ;;  %v900_v37 = vsel %vm898_vm1, %v3811_v31, 0  ;;  %v3803_v41 = vor.u32 %v4236_v40, %v3802_v39  ;;  %vm730_vm2 = vcmask 490496   ;;  %vm849_vm3 = vcmask 736256  }
  0x17   : > { %313 = vst.msk [vmem:[#allocation2] sm:$0xff] %vm312_vm0, %v280_v0  ;;  %v283_v3 = vld [vmem:[%s4873_s17 + $0x18] sm:$0xff]  ;;  %v284_v4 = vld [vmem:[%s4873_s17 + $0x20] sm:$0xff]  ;;  %v285_v5 = vld [vmem:[%s4873_s17 + $0x28] sm:$0xff]  ;;  %907 = vmatpush.bf16.msra.mxu0 %v900_v37  ;;  %v903_v45 = vsel %vm898_vm1, %v3815_v38, 0  ;;  %vm1438_vm4 = vcmask 687104  }
  0x18   : > { %314 = vst.msk [vmem:[#allocation2 + $0x8] sm:$0xff] %vm312_vm0, %v281_v1  ;;  %v286_v6 = vld [vmem:[%s4873_s17 + $0x30] sm:$0xff]  ;;  %v287_v7 = vld [vmem:[%s4873_s17 + $0x38] sm:$0xff]  ;;  %v288_v8 = vld [vmem:[%s4873_s17 + $0x40] sm:$0xff]  ;;  %996 = vmatpush.bf16.msra.mxu1 %v903_v45  ;;  %vm1275_vm5 = vcmask 359424   ;;  %vm2143_vm6 = vcmask 326656  }
  0x19   : > { %315 = vst.msk [vmem:[#allocation2 + $0x10] sm:$0xff] %vm312_vm0, %v282_v2  ;;  %v289_v9 = vld [vmem:[%s4873_s17 + $0x48] sm:$0xff]  ;;  %v290_v10 = vld [vmem:[%s4873_s17 + $0x50] sm:$0xff]  ;;  %v291_v12 = vld [vmem:[%s4873_s17 + $0x58] sm:$0xff]  ;;  %vm2160_vm7 = vcmask 1014784   ;;  %vm2569_vm8 = vcmask 1041408  }
  0x1a   : > { %316 = vst.msk [vmem:[#allocation2 + $0x18] sm:$0xff] %vm312_vm0, %v283_v3  ;;  %v292_v14 = vld [vmem:[%s4873_s17 + $0x60] sm:$0xff]  ;;  %v293_v17 = vld [vmem:[%s4873_s17 + $0x68] sm:$0xff]  ;;  %v294_v19 = vld [vmem:[%s4873_s17 + $0x70] sm:$0xff]  ;;  %vm2177_vm9 = vcmask 654336   ;;  %vm2544_vm10 = vcmask 293888  }
  0x1b   : > { %317 = vst.msk [vmem:[#allocation2 + $0x20] sm:$0xff] %vm312_vm0, %v284_v4  ;;  %v3804_v43 = vld [vmem:[%s6469_s1 + $0x48] sm:$0xf0]  ;;  %v3794_v49 = vld [vmem:[%s6469_s1 + $0x30] sm:$0xf]  ;;  %908 = vmatpush.bf16.msra.mxu0 %v3803_v41  ;;  %v300_v45 = vld [vmem:[%s4873_s17 + $0xa0] sm:$0xff] }
  0x1c   : > { %318 = vst.msk [vmem:[#allocation2 + $0x28] sm:$0xff] %vm312_vm0, %v285_v5  ;;  %v3807_v48 = vor.u32 %v4235_v42, %v3804_v43  ;;  %v4234_v50 = vld [vmem:[%s6469_s1 + $0x34] sm:$0xf0]  ;;  %v4233_v51 = vld [vmem:[%s6469_s1 + $0x34] sm:$0xf]  ;;  %vm3064_vm11 = vcmask 392192  }
  0x1d   : > { %319 = vst.msk [vmem:[#allocation2 + $0x30] sm:$0xff] %vm312_vm0, %v286_v6  ;;  %v3795_v54 = vor.u32 %v4234_v50, %v3794_v49  ;;  %v3796_v55 = vld [vmem:[%s6469_s1 + $0x38] sm:$0xf0]  ;;  %v4228_v31 = vld [vmem:[%s6469_s1 + $0x4] sm:$0xf0]  ;;  %v298_v37 = vld [vmem:[%s4873_s17 + $0x90] sm:$0xff] }
  0x1e   : > { %320 = vst.msk [vmem:[#allocation2 + $0x38] sm:$0xff] %vm312_vm0, %v287_v7  ;;  %997 = vmatpush.bf16.msra.mxu1 %v3807_v48  ;;  %v3799_v59 = vor.u32 %v4233_v51, %v3796_v55  ;;  %v4227_v32 = vld [vmem:[%s6469_s1 + $0x4] sm:$0xf]  ;;  %vm3476_vm12 = vcmask 130048   ;;  %vm3268_vm13 = vcmask 523264   ;;  %vm3264_vm14 = vcmask 261120  }
  0x1f   : > { %v378_v11 = vld [vmem:[#allocation2 + $0x1] sm:$0xff]  ;;  %321 = vst.msk [vmem:[#allocation2 + $0x40] sm:$0xff] %vm312_vm0, %v288_v8  ;;  %909 = vmatpush.bf16.msra.mxu0 %v3795_v54  ;;  %vm3266_vm15 = vcmask 916480   ;;  %vm3596_vm1 = vcmask 982016  }
  0x20   : > { %v379_v13 = vld [vmem:[#allocation2 + $0x9] sm:$0xff]  ;;  %322 = vst.msk [vmem:[#allocation2 + $0x48] sm:$0xff] %vm312_vm0, %v289_v9 }
  0x21   : > { %v4379_v15 = vpack.i.bf16 %v379_v13, %v378_v11  ;;  %v380_v16 = vld [vmem:[#allocation2 + $0x11] sm:$0xff]  ;;  %323 = vst.msk [vmem:[#allocation2 + $0x50] sm:$0xff] %vm312_vm0, %v290_v10  ;;  %v410_v22 = vld [vmem:[#allocation2 + $0x2] sm:$0xff] }
  0x22   : > { %v381_v18 = vld [vmem:[#allocation2 + $0x19] sm:$0xff]  ;;  %324 = vst.msk [vmem:[#allocation2 + $0x58] sm:$0xff] %vm312_vm0, %v291_v12  ;;  %v411_v23 = vld [vmem:[#allocation2 + $0xa] sm:$0xff]  ;;  %998 = vmatpush.bf16.msra.mxu1 %v3799_v59 }
  0x23   : > { %4380 = vrot.lane.b32.xlu0 %v4379_v15, %s4769_s18  ;;  %v4389_v20 = vpack.i.bf16 %v381_v18, %v380_v16  ;;  %v382_v21 = vld [vmem:[#allocation2 + $0x21] sm:$0xff]  ;;  %325 = vst.msk [vmem:[#allocation2 + $0x60] sm:$0xff] %vm312_vm0, %v292_v14  ;;  %v412_v27 = vld [vmem:[#allocation2 + $0x12] sm:$0xff]  ;;  %v4384_v30 = vpack.i.bf16 %v411_v23, %v410_v22 }
  0x24   : > { %v383_v24 = vld [vmem:[#allocation2 + $0x29] sm:$0xff]  ;;  %326 = vst.msk [vmem:[#allocation2 + $0x68] sm:$0xff] %vm312_vm0, %v293_v17  ;;  %v413_v28 = vld [vmem:[#allocation2 + $0x1a] sm:$0xff]  ;;  %v4231_v17 = vld [vmem:[%s6469_s1 + $0x24] sm:$0xf] }
  0x25   : > { %4390 = vrot.lane.b32.xlu1 %v4389_v20, %s4769_s18  ;;  %v4399_v25 = vpack.i.bf16 %v383_v24, %v382_v21  ;;  %327 = vst.msk [vmem:[#allocation2 + $0x70] sm:$0xff] %vm312_vm0, %v294_v19  ;;  %v414_v33 = vld [vmem:[#allocation2 + $0x22] sm:$0xff]  ;;  %v415_v34 = vld [vmem:[#allocation2 + $0x2a] sm:$0xff]  ;;  %v4394_v36 = vpack.i.bf16 %v413_v28, %v412_v27  ;;  %v416_v52 = vld [vmem:[#allocation2 + $0x32] sm:$0xff] }
  0x26   : > { %v4404_v44 = vpack.i.bf16 %v415_v34, %v414_v33  ;;  %v384_v46 = vld [vmem:[#allocation2 + $0x31] sm:$0xff]  ;;  %v385_v47 = vld [vmem:[#allocation2 + $0x39] sm:$0xff]  ;;  %v4232_v16 = vld [vmem:[%s6469_s1 + $0x24] sm:$0xf0]  ;;  %331 = vst.msk [vmem:[#allocation2 + $0x90] sm:$0xff] %vm312_vm0, %v298_v37 }
  0x27   : > { %4400 = vrot.lane.b32.xlu2 %v4399_v25, %s4769_s18  ;;  %v417_v53 = vld [vmem:[#allocation2 + $0x3a] sm:$0xff]  ;;  %v4409_v56 = vpack.i.bf16 %v385_v47, %v384_v46  ;;  %v418_v62 = vld [vmem:[#allocation2 + $0x42] sm:$0xff]  ;;  %v3788_v19 = vld [vmem:[%s6469_s1 + $0x28] sm:$0xf0]  ;;  %333 = vst.msk [vmem:[#allocation2 + $0xa0] sm:$0xff] %vm312_vm0, %v300_v45 }
  0x28   : > { %v386_v57 = vld [vmem:[#allocation2 + $0x41] sm:$0xff]  ;;  %v387_v58 = vld [vmem:[#allocation2 + $0x49] sm:$0xff]  ;;  %v4414_v60 = vpack.i.bf16 %v417_v53, %v416_v52  ;;  %v295_v13 = vld [vmem:[%s4873_s17 + $0x78] sm:$0xff]  ;;  %v3791_v22 = vor.u32 %v4231_v17, %v3788_v19 }
  0x29   : > { %v4419_v61 = vpack.i.bf16 %v387_v58, %v386_v57  ;;  %v419_v63 = vld [vmem:[#allocation2 + $0x4a] sm:$0xff]  ;;  %v420_v3 = vld [vmem:[#allocation2 + $0x52] sm:$0xff]  ;;  %v296_v14 = vld [vmem:[%s4873_s17 + $0x80] sm:$0xff]  ;;  %328 = vst.msk [vmem:[#allocation2 + $0x78] sm:$0xff] %vm312_vm0, %v295_v13 }
  0x2a   : > { %v388_v0 = vld [vmem:[#allocation2 + $0x51] sm:$0xff]  ;;  %v389_v1 = vld [vmem:[#allocation2 + $0x59] sm:$0xff]  ;;  %v4424_v2 = vpack.i.bf16 %v419_v63, %v418_v62  ;;  %329 = vst.msk [vmem:[#allocation2 + $0x80] sm:$0xff] %vm312_vm0, %v296_v14  ;;  %999 = vmatpush.bf16.msra.mxu1 %v3791_v22  ;;  %v3772_v34 = vld [vmem:[%s6469_s1 + $0x8] sm:$0xf0] }
  0x2b   : > { %4385 = vrot.lane.b32.xlu0 %v4384_v30, %s4770_s23  ;;  %v421_v4 = vld [vmem:[#allocation2 + $0x5a] sm:$0xff]  ;;  %v4429_v5 = vpack.i.bf16 %v389_v1, %v388_v0  ;;  %v422_v9 = vld [vmem:[#allocation2 + $0x62] sm:$0xff]  ;;  %v3778_v20 = vld [vmem:[%s6469_s1 + $0x10] sm:$0xf]  ;;  %v3775_v35 = vor.u32 %v4227_v32, %v3772_v34 }
  0x2c   : > { %v4434_v6 = vpack.i.bf16 %v421_v4, %v420_v3  ;;  %v390_v7 = vld [vmem:[#allocation2 + $0x61] sm:$0xff]  ;;  %v391_v8 = vld [vmem:[#allocation2 + $0x69] sm:$0xff]  ;;  %v4230_v21 = vld [vmem:[%s6469_s1 + $0x14] sm:$0xf0] }
  0x2d   : > { %4395 = vrot.lane.b32.xlu1 %v4394_v36, %s4770_s23  ;;  %v423_v10 = vld [vmem:[#allocation2 + $0x6a] sm:$0xff]  ;;  %v4439_v11 = vpack.i.bf16 %v391_v8, %v390_v7  ;;  %v3786_v15 = vld [vmem:[%s6469_s1 + $0x20] sm:$0xf]  ;;  %v4229_v23 = vld [vmem:[%s6469_s1 + $0x14] sm:$0xf]  ;;  %v3779_v26 = vor.u32 %v4230_v21, %v3778_v20 }
  0x2e   : > { %v4444_v12 = vpack.i.bf16 %v423_v10, %v422_v9  ;;  %v3787_v18 = vor.u32 %v4232_v16, %v3786_v15  ;;  %v3780_v24 = vld [vmem:[%s6469_s1 + $0x18] sm:$0xf0]  ;;  %v3770_v30 = vld [vmem:[%s6469_s1] sm:$0xf]  ;;  %v297_v36 = vld [vmem:[%s4873_s17 + $0x88] sm:$0xff] }
  0x2f   : > { %4405 = vrot.lane.b32.xlu2 %v4404_v44, %s4770_s23  ;;  %v3783_v28 = vor.u32 %v4229_v23, %v3780_v24  ;;  %v3771_v33 = vor.u32 %v4228_v31, %v3770_v30  ;;  %330 = vst.msk [vmem:[#allocation2 + $0x88] sm:$0xff] %vm312_vm0, %v297_v36  ;;  %v299_v44 = vld [vmem:[%s4873_s17 + $0x98] sm:$0xff]  ;;  %v346_v58 = vld [vmem:[#allocation2] sm:$0xff]  ;;  %v347_v59 = vld [vmem:[#allocation2 + $0x8] sm:$0xff] }
  0x30   : > { %910 = vmatpush.bf16.msra.mxu0 %v3787_v18  ;;  %v424_v25 = vld [vmem:[#allocation2 + $0x72] sm:$0xff]  ;;  %332 = vst.msk [vmem:[#allocation2 + $0x98] sm:$0xff] %vm312_vm0, %v299_v44  ;;  %v301_v4 = vld [vmem:[%s4873_s17 + $0xa8] sm:$0xff]  ;;  %v304_v23 = vld [vmem:[%s4873_s17 + $0xc0] sm:$0xff] }
  0x31   : > { %v425_v27 = vld [vmem:[#allocation2 + $0x7a] sm:$0xff]  ;;  %1000 = vmatpush.bf16.msra.mxu1 %v3783_v28  ;;  %v392_v38 = vld [vmem:[#allocation2 + $0x71] sm:$0xff]  ;;  %334 = vst.msk [vmem:[#allocation2 + $0xa8] sm:$0xff] %vm312_vm0, %v301_v4 }
  0x32   : > { %v4454_v29 = vpack.i.bf16 %v425_v27, %v424_v25  ;;  %v393_v39 = vld [vmem:[#allocation2 + $0x79] sm:$0xff]  ;;  %v348_v10 = vld [vmem:[#allocation2 + $0x10] sm:$0xff]  ;;  %337 = vst.msk [vmem:[#allocation2 + $0xc0] sm:$0xff] %vm312_vm0, %v304_v23 }
  0x33   : > { %4410 = vrot.lane.b32.xlu0 %v4409_v56, %s4769_s18  ;;  %v4449_v40 = vpack.i.bf16 %v393_v39, %v392_v38  ;;  %v303_v22 = vld [vmem:[%s4873_s17 + $0xb8] sm:$0xff]  ;;  %v350_v32 = vld [vmem:[#allocation2 + $0x20] sm:$0xff] }
  0x34   : > { %911 = vmatpush.bf16.msra.mxu0 %v3779_v26  ;;  %336 = vst.msk [vmem:[#allocation2 + $0xb8] sm:$0xff] %vm312_vm0, %v303_v22  ;;  %v308_v4 = vld [vmem:[%s4873_s17 + $0xe0] sm:$0xff]  ;;  %v310_v22 = vld [vmem:[%s4873_s17 + $0xf0] sm:$0xff] }
  0x35   : > { %4415 = vrot.lane.b32.xlu1 %v4414_v60, %s4770_s23  ;;  %1001 = vmatpush.bf16.msra.mxu1 %v3775_v35  ;;  %341 = vst.msk [vmem:[#allocation2 + $0xe0] sm:$0xff] %vm312_vm0, %v308_v4 }
  0x36   : > { %v394_v41 = vld [vmem:[#allocation2 + $0x81] sm:$0xff]  ;;  %v395_v42 = vld [vmem:[#allocation2 + $0x89] sm:$0xff]  ;;  %343 = vst.msk [vmem:[#allocation2 + $0xf0] sm:$0xff] %vm312_vm0, %v310_v22 }
  0x37   : > { %4420 = vrot.lane.b32.xlu2 %v4419_v61, %s4769_s18  ;;  %v4459_v43 = vpack.i.bf16 %v395_v42, %v394_v41  ;;  %v426_v46 = vld [vmem:[#allocation2 + $0x82] sm:$0xff]  ;;  %v427_v47 = vld [vmem:[#allocation2 + $0x8a] sm:$0xff]  ;;  %v428_v51 = vld [vmem:[#allocation2 + $0x92] sm:$0xff] }
  0x38   : > { %912 = vmatpush.bf16.msra.mxu0 %v3771_v33  ;;  %v4464_v48 = vpack.i.bf16 %v427_v47, %v426_v46  ;;  %v396_v50 = vld [vmem:[#allocation2 + $0x91] sm:$0xff]  ;;  %v397_v52 = vld [vmem:[#allocation2 + $0x99] sm:$0xff]  ;;  %v398_v25 = vld [vmem:[#allocation2 + $0xa1] sm:$0xff] }
  0x39   : > { %v429_v53 = vld [vmem:[#allocation2 + $0x9a] sm:$0xff]  ;;  %v4469_v54 = vpack.i.bf16 %v397_v52, %v396_v50  ;;  %v351_v33 = vld [vmem:[#allocation2 + $0x28] sm:$0xff]  ;;  %v352_v52 = vld [vmem:[#allocation2 + $0x30] sm:$0xff] }
  0x3a   : > { %v4474_v55 = vpack.i.bf16 %v429_v53, %v428_v51  ;;  %v305_v42 = vld [vmem:[%s4873_s17 + $0xc8] sm:$0xff]  ;;  %v353_v53 = vld [vmem:[#allocation2 + $0x38] sm:$0xff] }
  0x3b   : > { %4425 = vrot.lane.b32.xlu0 %v4424_v2, %s4770_s23  ;;  %v401_v34 = vld [vmem:[#allocation2 + $0xb9] sm:$0xff]  ;;  %338 = vst.msk [vmem:[#allocation2 + $0xc8] sm:$0xff] %vm312_vm0, %v305_v42 }
  0x3c   : > { %v433_v47 = vld [vmem:[#allocation2 + $0xba] sm:$0xff] }
  0x3d   : > { %4430 = vrot.lane.b32.xlu1 %v4429_v5, %s4769_s18  ;;  %v302_v5 = vld [vmem:[%s4873_s17 + $0xb0] sm:$0xff] }
  0x3e   : > { %335 = vst.msk [vmem:[#allocation2 + $0xb0] sm:$0xff] %vm312_vm0, %v302_v5 }
  0x3f   : > { %4435 = vrot.lane.b32.xlu2 %v4434_v6, %s4770_s23 }
  0x43   : > { %4440 = vrot.lane.b32.xlu0 %v4439_v11, %s4769_s18  ;;  %v349_v11 = vld [vmem:[#allocation2 + $0x18] sm:$0xff] }
  0x45   : > { %4445 = vrot.lane.b32.xlu1 %v4444_v12, %s4770_s23  ;;  %v430_v12 = vld [vmem:[#allocation2 + $0xa2] sm:$0xff]  ;;  %v431_v13 = vld [vmem:[#allocation2 + $0xaa] sm:$0xff]  ;;  %v432_v46 = vld [vmem:[#allocation2 + $0xb2] sm:$0xff] }
  0x46   : > { %v4484_v16 = vpack.i.bf16 %v431_v13, %v430_v12  ;;  %v399_v26 = vld [vmem:[#allocation2 + $0xa9] sm:$0xff]  ;;  %v400_v31 = vld [vmem:[#allocation2 + $0xb1] sm:$0xff]  ;;  %v4494_v51 = vpack.i.bf16 %v433_v47, %v432_v46 }
  0x47   : > { %4450 = vrot.lane.b32.xlu2 %v4449_v40, %s4769_s18  ;;  %v4479_v27 = vpack.i.bf16 %v399_v26, %v398_v25  ;;  %v4489_v35 = vpack.i.bf16 %v401_v34, %v400_v31  ;;  %v357_v31 = vld [vmem:[#allocation2 + $0x58] sm:$0xff] }
  0x4b   : > { %4455 = vrot.lane.b32.xlu0 %v4454_v29, %s4770_s23 }
  0x4d   : > { %4460 = vrot.lane.b32.xlu1 %v4459_v43, %s4769_s18  ;;  %v306_v43 = vld [vmem:[%s4873_s17 + $0xd0] sm:$0xff] }
  0x4e   : > { %339 = vst.msk [vmem:[#allocation2 + $0xd0] sm:$0xff] %vm312_vm0, %v306_v43  ;;  %v4771_v43 = vmov 0.0  }
  0x4f   : > { %4465 = vrot.lane.b32.xlu2 %v4464_v48, %s4770_s23  ;;  %345 = vst.msk [vmem:[#allocation2 + $0x100] sm:$0xff] %vm312_vm0, %v4771_v43 }
  0x50   : > { %1471 = vst.msk [vmem:[#allocation3 + $0x100] sm:$0xff] %vm1438_vm4, %v4771_v43 }
  0x53   : > { %4470 = vrot.lane.b32.xlu0 %v4469_v54, %s4769_s18  ;;  %v402_v54 = vld [vmem:[#allocation2 + $0xc1] sm:$0xff] }
  0x55   : > { %4475 = vrot.lane.b32.xlu1 %v4474_v55, %s4770_s23  ;;  %v434_v55 = vld [vmem:[#allocation2 + $0xc2] sm:$0xff] }
  0x57   : > { %4480 = vrot.lane.b32.xlu2 %v4479_v27, %s4769_s18 }
  0x5b   : > { %4485 = vrot.lane.b32.xlu0 %v4484_v16, %s4770_s23 }
  0x5d   : > { %4490 = vrot.lane.b32.xlu1 %v4489_v35, %s4769_s18 }
  0x5f   : > { %4495 = vrot.lane.b32.xlu2 %v4494_v51, %s4770_s23  ;;  %v358_v51 = vld [vmem:[#allocation2 + $0x60] sm:$0xff] }
  0x81   : > { %v4401_v19 = vpop.permute.xlu2 %4400 }
  0x82   : > { %v4403_v28 = vunpack.i.h.bf16 %v4401_v19  ;;  %v4402_v29 = vunpack.i.l.bf16 %v4401_v19 }
  0x84   : > { %v702_v38 = vsel %vm312_vm0, %v350_v32, %v4402_v29  ;;  %v703_v39 = vsel %vm312_vm0, %v351_v33, %v4403_v28 }
  0x89   : > { %v4406_v30 = vpop.permute.xlu2 %4405 }
  0x8a   : > { %v4408_v36 = vunpack.i.h.bf16 %v4406_v30  ;;  %v4407_v37 = vunpack.i.l.bf16 %v4406_v30  ;;  %v356_v30 = vld [vmem:[#allocation2 + $0x50] sm:$0xff] }
  0x8c   : > { %v735_v40 = vsel %vm730_vm2, %v702_v38, %v4407_v37  ;;  %v736_v41 = vsel %vm730_vm2, %v703_v39, %v4408_v36 }
  0x8d   : > { %v765_v44 = vpack.c.bf16 %v736_v41, %v735_v40  ;;  %v311_v41 = vld [vmem:[%s4873_s17 + $0xf8] sm:$0xff] }
  0x8e   : > { %344 = vst.msk [vmem:[#allocation2 + $0xf8] sm:$0xff] %vm312_vm0, %v311_v41 }
  0x91   : > { %v4421_v5 = vpop.permute.xlu2 %4420 }
  0x95   : > { %v4381_v49 = vpop.permute.xlu0 %4380 }
  0x96   : > { %v4383_v56 = vunpack.i.h.bf16 %v4381_v49  ;;  %v4382_v57 = vunpack.i.l.bf16 %v4381_v49 }
  0x97   : > { %v4391_v61 = vpop.permute.xlu1 %4390 }
  0x98   : > { %v698_v0 = vsel %vm312_vm0, %v346_v58, %v4382_v57  ;;  %v699_v1 = vsel %vm312_vm0, %v347_v59, %v4383_v56  ;;  %v4393_v7 = vunpack.i.h.bf16 %v4391_v61  ;;  %v4392_v8 = vunpack.i.l.bf16 %v4391_v61  ;;  %v403_v58 = vld [vmem:[#allocation2 + $0xc9] sm:$0xff] }
  0x99   : > { %v435_v59 = vld [vmem:[#allocation2 + $0xca] sm:$0xff]  ;;  %v4436_v29 = vpop.permute.xlu2 %4435 }
  0x9a   : > { %v700_v17 = vsel %vm312_vm0, %v348_v10, %v4392_v8  ;;  %v701_v18 = vsel %vm312_vm0, %v349_v11, %v4393_v7  ;;  %v4422_v7 = vunpack.i.l.bf16 %v4421_v5  ;;  %v355_v10 = vld [vmem:[#allocation2 + $0x48] sm:$0xff]  ;;  %v4438_v33 = vunpack.i.h.bf16 %v4436_v29 }
  0x9b   : > { %v4437_v34 = vunpack.i.l.bf16 %v4436_v29 }
  0x9d   : > { %v4386_v60 = vpop.permute.xlu0 %4385 }
  0x9e   : > { %v4388_v62 = vunpack.i.h.bf16 %v4386_v60  ;;  %v4387_v63 = vunpack.i.l.bf16 %v4386_v60 }
  0x9f   : > { %v4396_v9 = vpop.permute.xlu1 %4395 }
  0xa0   : > { %v731_v2 = vsel %vm730_vm2, %v698_v0, %v4387_v63  ;;  %v732_v3 = vsel %vm730_vm2, %v699_v1, %v4388_v62  ;;  %v4398_v14 = vunpack.i.h.bf16 %v4396_v9  ;;  %v4397_v15 = vunpack.i.l.bf16 %v4396_v9  ;;  %v354_v9 = vld [vmem:[#allocation2 + $0x40] sm:$0xff] }
  0xa1   : > { %v763_v6 = vpack.c.bf16 %v732_v3, %v731_v2  ;;  %v4499_v62 = vpack.i.bf16 %v403_v58, %v402_v54  ;;  %v4504_v63 = vpack.i.bf16 %v435_v59, %v434_v55  ;;  %v307_v3 = vld [vmem:[%s4873_s17 + $0xd8] sm:$0xff] }
  0xa2   : > { %v733_v20 = vsel %vm730_vm2, %v700_v17, %v4397_v15  ;;  %v734_v21 = vsel %vm730_vm2, %v701_v18, %v4398_v14  ;;  %340 = vst.msk [vmem:[#allocation2 + $0xd8] sm:$0xff] %vm312_vm0, %v307_v3  ;;  %v706_v14 = vsel %vm312_vm0, %v354_v9, %v4422_v7  ;;  %v409_v54 = vld [vmem:[#allocation2 + $0xf9] sm:$0xff] }
  0xa3   : > { %3816 = vmatmul.msk.bf16.vlgmr.msra.gmra.mxu0 %vm849_vm3, %v763_v6  ;;  %3832 = vmatmul.msk.bf16.vlgmr.msra.gmra.mxu1 %vm849_vm3, %v763_v6  ;;  %v764_v24 = vpack.c.bf16 %v734_v21, %v733_v20  ;;  %v4423_v6 = vunpack.i.h.bf16 %v4421_v5  ;;  %v309_v21 = vld [vmem:[%s4873_s17 + $0xe8] sm:$0xff]  ;;  %v361_v7 = vld [vmem:[#allocation2 + $0x78] sm:$0xff]  ;;  %s4772_s17 = smov 44  }
  0xa4   : > { %4500 = vrot.lane.b32.xlu0 %v4499_v62, %s4769_s18  ;;  %4505 = vrot.lane.b32.xlu1 %v4504_v63, %s4770_s23  ;;  %342 = vst.msk [vmem:[#allocation2 + $0xe8] sm:$0xff] %vm312_vm0, %v309_v21  ;;  %v440_v62 = vld [vmem:[#allocation2 + $0xf2] sm:$0xff]  ;;  %v441_v63 = vld [vmem:[#allocation2 + $0xfa] sm:$0xff] }
  0xa5   : > { %v4411_v45 = vpop.permute.xlu0 %4410  ;;  %v707_v15 = vsel %vm312_vm0, %v355_v10, %v4423_v6  ;;  %v360_v6 = vld [vmem:[#allocation2 + $0x70] sm:$0xff] }
  0xa6   : > { %v4413_v48 = vunpack.i.h.bf16 %v4411_v45  ;;  %v4412_v49 = vunpack.i.l.bf16 %v4411_v45 }
  0xa7   : > { %v4416_v50 = vpop.permute.xlu1 %4415 }
  0xa8   : > { %v4418_v56 = vunpack.i.h.bf16 %v4416_v50  ;;  %v4417_v57 = vunpack.i.l.bf16 %v4416_v50  ;;  %v704_v60 = vsel %vm312_vm0, %v352_v52, %v4412_v49  ;;  %v705_v61 = vsel %vm312_vm0, %v353_v53, %v4413_v48  ;;  %v359_v52 = vld [vmem:[#allocation2 + $0x68] sm:$0xff]  ;;  %v408_v53 = vld [vmem:[#allocation2 + $0xf1] sm:$0xff] }
  0xa9   : > { %v436_v13 = vld [vmem:[#allocation2 + $0xd2] sm:$0xff]  ;;  %v437_v16 = vld [vmem:[#allocation2 + $0xda] sm:$0xff] }
  0xaa   : > { %v737_v0 = vsel %vm730_vm2, %v704_v60, %v4417_v57  ;;  %v738_v1 = vsel %vm730_vm2, %v705_v61, %v4418_v56  ;;  %v4514_v17 = vpack.i.bf16 %v437_v16, %v436_v13  ;;  %v405_v25 = vld [vmem:[#allocation2 + $0xd9] sm:$0xff]  ;;  %v4529_v57 = vpack.i.bf16 %v409_v54, %v408_v53  ;;  %v367_v53 = vld [vmem:[#allocation2 + $0xa8] sm:$0xff] }
  0xab   : > { %v766_v2 = vpack.c.bf16 %v738_v1, %v737_v0  ;;  %v406_v32 = vld [vmem:[#allocation2 + $0xe1] sm:$0xff]  ;;  %v407_v35 = vld [vmem:[#allocation2 + $0xe9] sm:$0xff]  ;;  %v4534_v1 = vpack.i.bf16 %v441_v63, %v440_v62 }
  0xac   : > { %4515 = vrot.lane.b32.xlu0 %v4514_v17, %s4770_s23  ;;  %v4519_v38 = vpack.i.bf16 %v407_v35, %v406_v32  ;;  %v438_v45 = vld [vmem:[#allocation2 + $0xe2] sm:$0xff]  ;;  %v439_v46 = vld [vmem:[#allocation2 + $0xea] sm:$0xff]  ;;  %v365_v35 = vld [vmem:[#allocation2 + $0x98] sm:$0xff] }
  0xad   : > { %v4426_v8 = vpop.permute.xlu0 %4425  ;;  %v4524_v47 = vpack.i.bf16 %v439_v46, %v438_v45 }
  0xae   : > { %v4428_v11 = vunpack.i.h.bf16 %v4426_v8  ;;  %v4427_v12 = vunpack.i.l.bf16 %v4426_v8  ;;  %4520 = vrot.lane.b32.xlu1 %v4519_v38, %s4769_s18 }
  0xaf   : > { %v4431_v23 = vpop.permute.xlu1 %4430 }
  0xb0   : > { %v739_v18 = vsel %vm730_vm2, %v706_v14, %v4427_v12  ;;  %v740_v19 = vsel %vm730_vm2, %v707_v15, %v4428_v11  ;;  %v4433_v27 = vunpack.i.h.bf16 %v4431_v23  ;;  %v4432_v28 = vunpack.i.l.bf16 %v4431_v23 }
  0xb1   : > { %v767_v20 = vpack.c.bf16 %v740_v19, %v739_v18  ;;  %v362_v19 = vld [vmem:[#allocation2 + $0x80] sm:$0xff] }
  0xb2   : > { %v708_v36 = vsel %vm312_vm0, %v356_v30, %v4432_v28  ;;  %v709_v37 = vsel %vm312_vm0, %v357_v31, %v4433_v27 }
  0xb3   : > { %3817 = vmatmul.msk.bf16.gmra.mxu0 %vm849_vm3, %v764_v24  ;;  %3833 = vmatmul.msk.bf16.gmra.mxu1 %vm849_vm3, %v764_v24  ;;  %v404_v24 = vld [vmem:[#allocation2 + $0xd1] sm:$0xff]  ;;  %v741_v39 = vsel %vm730_vm2, %v708_v36, %v4437_v34  ;;  %v742_v40 = vsel %vm730_vm2, %v709_v37, %v4438_v33 }
  0xb4   : > { %v4509_v26 = vpack.i.bf16 %v405_v25, %v404_v24  ;;  %v768_v42 = vpack.c.bf16 %v742_v40, %v741_v39  ;;  %4530 = vrot.lane.b32.xlu0 %v4529_v57, %s4769_s18  ;;  %v364_v34 = vld [vmem:[#allocation2 + $0x90] sm:$0xff] }
  0xb6   : > { %4510 = vrot.lane.b32.xlu2 %v4509_v26, %s4769_s18  ;;  %4535 = vrot.lane.b32.xlu1 %v4534_v1, %s4770_s23  ;;  %s4779_s18 = smov 32  }
  0xb7   : > { %v4446_v50 = vpop.permute.xlu1 %4445 }
  0xb8   : > { %v4448_v55 = vunpack.i.h.bf16 %v4446_v50  ;;  %v4447_v56 = vunpack.i.l.bf16 %v4446_v50 }
  0xbe   : > { %4525 = vrot.lane.b32.xlu2 %v4524_v47, %s4770_s23  ;;  %s4776_s23 = smov 80  }
  0xbf   : > { %v4461_v15 = vpop.permute.xlu1 %4460 }
  0xc0   : > { %v4463_v16 = vunpack.i.h.bf16 %v4461_v15  ;;  %v4462_v17 = vunpack.i.l.bf16 %v4461_v15 }
  0xc2   : > { %v714_v23 = vsel %vm312_vm0, %v362_v19, %v4462_v17 }
  0xc3   : > { %3818 = vmatmul.msk.bf16.gmra.mxu0 %vm849_vm3, %v765_v44  ;;  %3834 = vmatmul.msk.bf16.gmra.mxu1 %vm849_vm3, %v765_v44  ;;  %v4441_v44 = vpop.permute.xlu0 %4440 }
  0xc4   : > { %v4443_v48 = vunpack.i.h.bf16 %v4441_v44  ;;  %v4442_v49 = vunpack.i.l.bf16 %v4441_v44 }
  0xc6   : > { %v710_v58 = vsel %vm312_vm0, %v358_v51, %v4442_v49  ;;  %v711_v59 = vsel %vm312_vm0, %v359_v52, %v4443_v48  ;;  %v366_v52 = vld [vmem:[#allocation2 + $0xa0] sm:$0xff] }
  0xc7   : > { %v743_v60 = vsel %vm730_vm2, %v710_v58, %v4447_v56  ;;  %v744_v61 = vsel %vm730_vm2, %v711_v59, %v4448_v55  ;;  %v4476_v33 = vpop.permute.xlu1 %4475 }
  0xc8   : > { %v769_v0 = vpack.c.bf16 %v744_v61, %v743_v60  ;;  %v4478_v38 = vunpack.i.h.bf16 %v4476_v33  ;;  %v4477_v39 = vunpack.i.l.bf16 %v4476_v33 }
  0xcb   : > { %v4456_v5 = vpop.permute.xlu0 %4455 }
  0xcc   : > { %v4458_v8 = vunpack.i.h.bf16 %v4456_v5  ;;  %v4457_v9 = vunpack.i.l.bf16 %v4456_v5  ;;  %v368_v5 = vld [vmem:[#allocation2 + $0xb0] sm:$0xff] }
  0xcf   : > { %v4491_v1 = vpop.permute.xlu1 %4490 }
  0xd3   : > { %3819 = vmatmul.msk.bf16.gmra.mxu0 %vm849_vm3, %v766_v2  ;;  %3835 = vmatmul.msk.bf16.gmra.mxu1 %vm849_vm3, %v766_v2  ;;  %v4451_v2 = vpop.permute.xlu2 %4450  ;;  %v4471_v30 = vpop.permute.xlu0 %4470 }
  0xd4   : > { %v4453_v3 = vunpack.i.h.bf16 %v4451_v2  ;;  %v4452_v4 = vunpack.i.l.bf16 %v4451_v2  ;;  %v4473_v31 = vunpack.i.h.bf16 %v4471_v30  ;;  %v4472_v32 = vunpack.i.l.bf16 %v4471_v30 }
  0xd5   : > { %v4493_v2 = vunpack.i.h.bf16 %v4491_v1 }
  0xd6   : > { %v712_v10 = vsel %vm312_vm0, %v360_v6, %v4452_v4  ;;  %v713_v11 = vsel %vm312_vm0, %v361_v7, %v4453_v3  ;;  %v717_v40 = vsel %vm312_vm0, %v365_v35, %v4473_v31  ;;  %v716_v41 = vsel %vm312_vm0, %v364_v34, %v4472_v32  ;;  %v369_v6 = vld [vmem:[#allocation2 + $0xb8] sm:$0xff] }
  0xd7   : > { %v745_v12 = vsel %vm730_vm2, %v712_v10, %v4457_v9  ;;  %v746_v13 = vsel %vm730_vm2, %v713_v11, %v4458_v8  ;;  %v750_v44 = vsel %vm730_vm2, %v717_v40, %v4478_v38  ;;  %v4492_v3 = vunpack.i.l.bf16 %v4491_v1 }
  0xd8   : > { %v770_v14 = vpack.c.bf16 %v746_v13, %v745_v12  ;;  %v721_v11 = vsel %vm312_vm0, %v369_v6, %v4493_v2 }
  0xd9   : > { %v720_v12 = vsel %vm312_vm0, %v368_v5, %v4492_v3 }
  0xdb   : > { %v4466_v18 = vpop.permute.xlu2 %4465  ;;  %v4486_v51 = vpop.permute.xlu0 %4485 }
  0xdc   : > { %v4468_v21 = vunpack.i.h.bf16 %v4466_v18  ;;  %v4467_v22 = vunpack.i.l.bf16 %v4466_v18  ;;  %v4488_v56 = vunpack.i.h.bf16 %v4486_v51  ;;  %v4487_v57 = vunpack.i.l.bf16 %v4486_v51 }
  0xde   : > { %v747_v25 = vsel %vm730_vm2, %v714_v23, %v4467_v22  ;;  %v370_v22 = vld [vmem:[#allocation2 + $0xc0] sm:$0xff]  ;;  %v371_v23 = vld [vmem:[#allocation2 + $0xc8] sm:$0xff] }
  0xe3   : > { %3820 = vmatmul.msk.bf16.gmra.mxu0 %vm849_vm3, %v767_v20  ;;  %3836 = vmatmul.msk.bf16.gmra.mxu1 %vm849_vm3, %v767_v20  ;;  %v363_v20 = vld [vmem:[#allocation2 + $0x88] sm:$0xff]  ;;  %v4481_v48 = vpop.permute.xlu2 %4480 }
  0xe4   : > { %v715_v24 = vsel %vm312_vm0, %v363_v20, %v4463_v16  ;;  %v4483_v49 = vunpack.i.h.bf16 %v4481_v48  ;;  %v4482_v50 = vunpack.i.l.bf16 %v4481_v48 }
  0xe5   : > { %v748_v26 = vsel %vm730_vm2, %v715_v24, %v4468_v21 }
  0xe6   : > { %v771_v27 = vpack.c.bf16 %v748_v26, %v747_v25  ;;  %v719_v58 = vsel %vm312_vm0, %v367_v53, %v4483_v49  ;;  %v718_v59 = vsel %vm312_vm0, %v366_v52, %v4482_v50 }
  0xe7   : > { %v751_v60 = vsel %vm730_vm2, %v718_v59, %v4487_v57  ;;  %v752_v61 = vsel %vm730_vm2, %v719_v58, %v4488_v56 }
  0xe8   : > { %v773_v62 = vpack.c.bf16 %v752_v61, %v751_v60  ;;  %v374_v60 = vld [vmem:[#allocation2 + $0xe0] sm:$0xff]  ;;  %v375_v61 = vld [vmem:[#allocation2 + $0xe8] sm:$0xff] }
  0xeb   : > { %v4496_v4 = vpop.permute.xlu2 %4495 }
  0xec   : > { %v4498_v9 = vunpack.i.h.bf16 %v4496_v4  ;;  %v4497_v10 = vunpack.i.l.bf16 %v4496_v4 }
  0xee   : > { %v753_v13 = vsel %vm730_vm2, %v720_v12, %v4497_v10 }
  0xf3   : > { %3821 = vmatmul.msk.bf16.gmra.mxu0 %vm849_vm3, %v768_v42  ;;  %3837 = vmatmul.msk.bf16.gmra.mxu1 %vm849_vm3, %v768_v42  ;;  %v749_v42 = vsel %vm730_vm2, %v716_v41, %v4477_v39  ;;  %v372_v41 = vld [vmem:[#allocation2 + $0xd0] sm:$0xff] }
  0xf4   : > { %v772_v45 = vpack.c.bf16 %v750_v44, %v749_v42  ;;  %v373_v42 = vld [vmem:[#allocation2 + $0xd8] sm:$0xff] }
 0x103   : > { %3822 = vmatmul.msk.bf16.gmra.mxu0 %vm849_vm3, %v769_v0  ;;  %3838 = vmatmul.msk.bf16.gmra.mxu1 %vm849_vm3, %v769_v0 }
 0x113   : > { %3823 = vmatmul.msk.bf16.gmra.mxu0 %vm849_vm3, %v770_v14  ;;  %3839 = vmatmul.msk.bf16.gmra.mxu1 %vm849_vm3, %v770_v14  ;;  %v754_v14 = vsel %vm730_vm2, %v721_v11, %v4498_v9 }
 0x114   : > { %v774_v15 = vpack.c.bf16 %v754_v14, %v753_v13  ;;  %v376_v14 = vld [vmem:[#allocation2 + $0xf0] sm:$0xff] }
 0x116   : > { %v4501_v18 = vpop.permute.xlu0 %4500  ;;  %v4506_v21 = vpop.permute.xlu1 %4505 }
 0x117   : > { %v4503_v19 = vunpack.i.h.bf16 %v4501_v18  ;;  %v4502_v20 = vunpack.i.l.bf16 %v4501_v18  ;;  %v4508_v26 = vunpack.i.h.bf16 %v4506_v21 }
 0x119   : > { %v722_v30 = vsel %vm312_vm0, %v370_v22, %v4502_v20 }
 0x11e   : > { %v4516_v40 = vpop.permute.xlu0 %4515 }
 0x11f   : > { %v4517_v48 = vunpack.i.l.bf16 %v4516_v40 }
 0x120   : > { %v5099_v28 = vpop.f32.mrf.mxu0  ;;  %v1003_v29 = vpop.f32.mrf.mxu1 }
 0x121   : > { %1149 = vrot.lane.b32.xlu0 %v1003_v29, %s4772_s17  ;;  %1147 = vrot.lane.b32.xlu2 %v5099_v28, %s4772_s17  ;;  %v723_v29 = vsel %vm312_vm0, %v371_v23, %v4503_v19  ;;  %v4521_v57 = vpop.permute.xlu1 %4520 }
 0x122   : > { %v756_v32 = vsel %vm730_vm2, %v723_v29, %v4508_v26  ;;  %v4523_v58 = vunpack.i.h.bf16 %v4521_v57  ;;  %v4522_v59 = vunpack.i.l.bf16 %v4521_v57 }
 0x123   : > { %3824 = vmatmul.msk.bf16.gmra.mxu0 %vm849_vm3, %v771_v27  ;;  %3840 = vmatmul.msk.bf16.gmra.mxu1 %vm849_vm3, %v771_v27  ;;  %v4507_v27 = vunpack.i.l.bf16 %v4506_v21 }
 0x124   : > { %v727_v43 = vsel %vm312_vm0, %v375_v61, %v4523_v58  ;;  %v726_v4 = vsel %vm312_vm0, %v374_v60, %v4522_v59 }
 0x125   : > { %v755_v31 = vsel %vm730_vm2, %v722_v30, %v4507_v27 }
 0x126   : > { %v775_v33 = vpack.c.bf16 %v756_v32, %v755_v31  ;;  %v4531_v11 = vpop.permute.xlu0 %4530  ;;  %v5221_v32 = vld [vmem:[%s6474_s6] ss:$0 sm:$0xff] }
 0x127   : > { %v4533_v12 = vunpack.i.h.bf16 %v4531_v11  ;;  %v4532_v13 = vunpack.i.l.bf16 %v4531_v11 }
 0x128   : > { %v5106_v36 = vpop.f32.mrf.mxu0  ;;  %v1005_v37 = vpop.f32.mrf.mxu1 }
 0x129   : > { %1153 = vrot.lane.b32.xlu2 %v1005_v37, %s4772_s17  ;;  %1151 = vrot.lane.b32.xlu1 %v5106_v36, %s4772_s17  ;;  %v4511_v37 = vpop.permute.xlu2 %4510  ;;  %v728_v23 = vsel %vm312_vm0, %v376_v14, %v4532_v13 }
 0x12a   : > { %v4513_v38 = vunpack.i.h.bf16 %v4511_v37  ;;  %v4512_v39 = vunpack.i.l.bf16 %v4511_v37 }
 0x12c   : > { %v725_v49 = vsel %vm312_vm0, %v373_v42, %v4513_v38  ;;  %v724_v50 = vsel %vm312_vm0, %v372_v41, %v4512_v39 }
 0x12d   : > { %v757_v52 = vsel %vm730_vm2, %v724_v50, %v4517_v48 }
 0x130   : > { %v5115_v46 = vpop.f32.mrf.mxu0  ;;  %v1008_v47 = vpop.f32.mrf.mxu1 }
 0x131   : > { %1157 = vrot.lane.b32.xlu1 %v1008_v47, %s4772_s17  ;;  %1155 = vrot.lane.b32.xlu0 %v5115_v46, %s4772_s17  ;;  %v4518_v47 = vunpack.i.h.bf16 %v4516_v40 }
 0x133   : > { %3825 = vmatmul.msk.bf16.gmra.mxu0 %vm849_vm3, %v772_v45  ;;  %3841 = vmatmul.msk.bf16.gmra.mxu1 %vm849_vm3, %v772_v45  ;;  %v758_v51 = vsel %vm730_vm2, %v725_v49, %v4518_v47 }
 0x134   : > { %v776_v53 = vpack.c.bf16 %v758_v51, %v757_v52 }
 0x138   : > { %v5122_v54 = vpop.f32.mrf.mxu0  ;;  %v1010_v55 = vpop.f32.mrf.mxu1 }
 0x139   : > { %1161 = vrot.lane.b32.xlu0 %v1010_v55, %s4772_s17  ;;  %1159 = vrot.lane.b32.xlu2 %v5122_v54, %s4772_s17 }
 0x140   : > { %v5131_v63 = vpop.f32.mrf.mxu0  ;;  %v1013_v0 = vpop.f32.mrf.mxu1 }
 0x141   : > { %1165 = vrot.lane.b32.xlu2 %v1013_v0, %s4772_s17  ;;  %1163 = vrot.lane.b32.xlu1 %v5131_v63, %s4772_s17 }
 0x143   : > { %3826 = vmatmul.msk.bf16.gmra.mxu0 %vm849_vm3, %v773_v62  ;;  %3842 = vmatmul.msk.bf16.gmra.mxu1 %vm849_vm3, %v773_v62  ;;  %v4526_v62 = vpop.permute.xlu2 %4525 }
 0x144   : > { %v4528_v0 = vunpack.i.h.bf16 %v4526_v62  ;;  %v4527_v1 = vunpack.i.l.bf16 %v4526_v62 }
 0x146   : > { %v759_v5 = vsel %vm730_vm2, %v726_v4, %v4527_v1  ;;  %v760_v6 = vsel %vm730_vm2, %v727_v43, %v4528_v0 }
 0x148   : > { %v5138_v7 = vpop.f32.mrf.mxu0  ;;  %v1015_v8 = vpop.f32.mrf.mxu1 }
 0x149   : > { %1169 = vrot.lane.b32.xlu1 %v1015_v8, %s4772_s17  ;;  %1167 = vrot.lane.b32.xlu0 %v5138_v7, %s4772_s17  ;;  %v777_v8 = vpack.c.bf16 %v760_v6, %v759_v5 }
 0x150   : > { %v5147_v16 = vpop.f32.mrf.mxu0  ;;  %v1018_v17 = vpop.f32.mrf.mxu1 }
 0x151   : > { %1173 = vrot.lane.b32.xlu0 %v1018_v17, %s4772_s17  ;;  %1171 = vrot.lane.b32.xlu2 %v5147_v16, %s4772_s17  ;;  %v4536_v17 = vpop.permute.xlu1 %4535 }
 0x152   : > { %v4538_v20 = vunpack.i.h.bf16 %v4536_v17  ;;  %v4537_v21 = vunpack.i.l.bf16 %v4536_v17 }
 0x153   : > { %3827 = vmatmul.msk.bf16.gmra.mxu0 %vm849_vm3, %v774_v15  ;;  %3843 = vmatmul.msk.bf16.gmra.mxu1 %vm849_vm3, %v774_v15  ;;  %v377_v15 = vld [vmem:[#allocation2 + $0xf8] sm:$0xff] }
 0x154   : > { %v729_v22 = vsel %vm312_vm0, %v377_v15, %v4533_v12  ;;  %vm3600_vm0 = vcmask 1043456  }
 0x155   : > { %v762_v26 = vsel %vm730_vm2, %v729_v22, %v4538_v20 }
 0x158   : > { %v5154_v24 = vpop.f32.mrf.mxu0  ;;  %v1020_v25 = vpop.f32.mrf.mxu1 }
 0x159   : > { %1177 = vrot.lane.b32.xlu2 %v1020_v25, %s4772_s17  ;;  %1175 = vrot.lane.b32.xlu1 %v5154_v24, %s4772_s17  ;;  %v761_v25 = vsel %vm730_vm2, %v728_v23, %v4537_v21  ;;  %vm3684_vm2 = vcmask 80896  }
 0x15a   : > { %v778_v27 = vpack.c.bf16 %v762_v26, %v761_v25 }
 0x160   : > { %v5163_v34 = vpop.f32.mrf.mxu0  ;;  %v1023_v35 = vpop.f32.mrf.mxu1 }
 0x161   : > { %1181 = vrot.lane.b32.xlu1 %v1023_v35, %s4772_s17  ;;  %1179 = vrot.lane.b32.xlu0 %v5163_v34, %s4772_s17 }
 0x163   : > { %3828 = vmatmul.msk.bf16.gmra.mxu0 %vm849_vm3, %v775_v33  ;;  %3844 = vmatmul.msk.bf16.gmra.mxu1 %vm849_vm3, %v775_v33 }
 0x168   : > { %v5170_v44 = vpop.f32.mrf.mxu0  ;;  %v1025_v45 = vpop.f32.mrf.mxu1 }
 0x169   : > { %1185 = vrot.lane.b32.xlu0 %v1025_v45, %s4772_s17  ;;  %1183 = vrot.lane.b32.xlu2 %v5170_v44, %s4772_s17 }
 0x170   : > { %v5179_v55 = vpop.f32.mrf.mxu0  ;;  %v1028_v56 = vpop.f32.mrf.mxu1 }
 0x171   : > { %1189 = vrot.lane.b32.xlu2 %v1028_v56, %s4772_s17  ;;  %1187 = vrot.lane.b32.xlu1 %v5179_v55, %s4772_s17 }
 0x173   : > { %3829 = vmatmul.msk.bf16.gmra.mxu0 %vm849_vm3, %v776_v53  ;;  %3845 = vmatmul.msk.bf16.gmra.mxu1 %vm849_vm3, %v776_v53 }
 0x178   : > { %v5188_v2 = vpop.f32.mrf.mxu0  ;;  %v1030_v3 = vpop.f32.mrf.mxu1 }
 0x179   : > { %1193 = vrot.lane.b32.xlu1 %v1030_v3, %s4772_s17  ;;  %1191 = vrot.lane.b32.xlu0 %v5188_v2, %s4772_s17 }
 0x17b   : > { %v1148_v31 = vpop.permute.xlu2 %1147 }
 0x180   : > { %v5197_v9 = vpop.f32.mrf.mxu0  ;;  %v1033_v10 = vpop.f32.mrf.mxu1 }
 0x181   : > { %1197 = vrot.lane.b32.xlu0 %v1033_v10, %s4772_s17  ;;  %1195 = vrot.lane.b32.xlu2 %v5197_v9, %s4772_s17 }
 0x183   : > { %3846 = vmatmul.msk.bf16.gmra.mxu1 %vm849_vm3, %v777_v8  ;;  %3830 = vmatmul.msk.bf16.gmra.mxu0 %vm849_vm3, %v777_v8  ;;  %v1154_v42 = vpop.permute.xlu2 %1153 }
 0x188   : > { %v5204_v18 = vpop.f32.mrf.mxu0  ;;  %v1035_v19 = vpop.f32.mrf.mxu1 }
 0x189   : > { %1201 = vrot.lane.b32.xlu2 %v1035_v19, %s4772_s17  ;;  %1199 = vrot.lane.b32.xlu1 %v5204_v18, %s4772_s17 }
 0x190   : > { %v5213_v29 = vpop.f32.mrf.mxu0  ;;  %v1038_v30 = vpop.f32.mrf.mxu1 }
 0x191   : > { %1205 = vrot.lane.b32.xlu1 %v1038_v30, %s4772_s17  ;;  %1203 = vrot.lane.b32.xlu0 %v5213_v29, %s4772_s17 }
 0x193   : > { %v1150_v33 = vpop.permute.xlu0 %1149  ;;  %3831 = vmatmul.msk.bf16.gmra.mxu0 %vm849_vm3, %v778_v27  ;;  %3847 = vmatmul.msk.bf16.gmra.mxu1 %vm849_vm3, %v778_v27  ;;  %v1160_v60 = vpop.permute.xlu2 %1159 }
 0x194   : > { %v1276_v35 = vsel %vm1275_vm5, %v1148_v31, %v1150_v33 }
 0x195   : > { %v1340_v37 = vmax.f32 %v5099_v28, %v1276_v35 }
 0x197   : > { %v1374_v38 = vadd.f32 %v5221_v32, %v1340_v37 }
 0x198   : > { %v5228_v39 = vpop.f32.mrf.mxu0  ;;  %v1040_v40 = vpop.f32.mrf.mxu1 }
 0x199   : > { %v1406_v41 = vmax.f32 %v1374_v38, 0.0  ;;  %1209 = vrot.lane.b32.xlu0 %v1040_v40, %s4772_s17  ;;  %1207 = vrot.lane.b32.xlu2 %v5228_v39, %s4772_s17 }
 0x19b   : > { %1439 = vst.msk [vmem:[#allocation3] sm:$0xff] %vm1438_vm4, %v1406_v41  ;;  %v1152_v45 = vpop.permute.xlu1 %1151  ;;  %v1166_v5 = vpop.permute.xlu2 %1165 }
 0x19c   : > { %v1277_v47 = vsel %vm1275_vm5, %v1152_v45, %v1154_v42 }
 0x19d   : > { %v1341_v48 = vmax.f32 %v5106_v36, %v1277_v47 }
 0x19f   : > { %v1375_v28 = vadd.f32 %v5221_v32, %v1341_v48 }
 0x1a0   : > { %v5237_v49 = vpop.f32.mrf.mxu0  ;;  %v1043_v50 = vpop.f32.mrf.mxu1 }
 0x1a1   : > { %v1407_v51 = vmax.f32 %v1375_v28, 0.0  ;;  %1213 = vrot.lane.b32.xlu2 %v1043_v50, %s4772_s17  ;;  %1211 = vrot.lane.b32.xlu1 %v5237_v49, %s4772_s17 }
 0x1a3   : > { %1440 = vst.msk [vmem:[#allocation3 + $0x8] sm:$0xff] %vm1438_vm4, %v1407_v51  ;;  %v1158_v52 = vpop.permute.xlu1 %1157  ;;  %v1156_v53 = vpop.permute.xlu0 %1155 }
 0x1a4   : > { %v1278_v56 = vsel %vm1275_vm5, %v1156_v53, %v1158_v52 }
 0x1a5   : > { %v1342_v57 = vmax.f32 %v5115_v46, %v1278_v56 }
 0x1a7   : > { %v1376_v36 = vadd.f32 %v5221_v32, %v1342_v57 }
 0x1a8   : > { %v5246_v58 = vpop.f32.mrf.mxu0  ;;  %v1045_v59 = vpop.f32.mrf.mxu1 }
 0x1a9   : > { %v1408_v61 = vmax.f32 %v1376_v36, 0.0  ;;  %1217 = vrot.lane.b32.xlu1 %v1045_v59, %s4772_s17  ;;  %1215 = vrot.lane.b32.xlu0 %v5246_v58, %s4772_s17 }
 0x1ab   : > { %1441 = vst.msk [vmem:[#allocation3 + $0x10] sm:$0xff] %vm1438_vm4, %v1408_v61  ;;  %v1162_v62 = vpop.permute.xlu0 %1161  ;;  %v1172_v27 = vpop.permute.xlu2 %1171 }
 0x1ac   : > { %v1279_v0 = vsel %vm1275_vm5, %v1160_v60, %v1162_v62 }
 0x1ad   : > { %v1343_v1 = vmax.f32 %v5122_v54, %v1279_v0 }
 0x1af   : > { %v1377_v46 = vadd.f32 %v5221_v32, %v1343_v1 }
 0x1b0   : > { %v5255_v3 = vpop.f32.mrf.mxu0  ;;  %v1048_v43 = vpop.f32.mrf.mxu1 }
 0x1b1   : > { %v1409_v4 = vmax.f32 %v1377_v46, 0.0  ;;  %1221 = vrot.lane.b32.xlu0 %v1048_v43, %s4772_s17  ;;  %1219 = vrot.lane.b32.xlu2 %v5255_v3, %s4772_s17 }
 0x1b2   : > { %v1712_v20 = vld [vmem:[#allocation3 + $0x6] ss:$2 sm:$0xff]  ;;  %v1744_v23 = vld [vmem:[#allocation3 + $0x7] ss:$2 sm:$0xff] }
 0x1b3   : > { %1442 = vst.msk [vmem:[#allocation3 + $0x18] sm:$0xff] %vm1438_vm4, %v1409_v4  ;;  %v1164_v6 = vpop.permute.xlu1 %1163  ;;  %v1632_v25 = vld [vmem:[#allocation3 + $0x4] ss:$2 sm:$0xff]  ;;  %v1664_v26 = vld [vmem:[#allocation3 + $0x5] ss:$2 sm:$0xff]  ;;  %v1775_v40 = vmax.f32 %v1712_v20, %v1744_v23 }
 0x1b4   : > { %v1280_v8 = vsel %vm1275_vm5, %v1164_v6, %v1166_v5  ;;  %v1552_v31 = vld [vmem:[#allocation3 + $0x2] ss:$2 sm:$0xff]  ;;  %v1584_v33 = vld [vmem:[#allocation3 + $0x3] ss:$2 sm:$0xff]  ;;  %v1695_v48 = vmax.f32 %v1632_v25, %v1664_v26 }
 0x1b5   : > { %v1344_v10 = vmax.f32 %v5131_v63, %v1280_v8  ;;  %v1615_v53 = vmax.f32 %v1552_v31, %v1584_v33 }
 0x1b7   : > { %v1378_v54 = vadd.f32 %v5221_v32, %v1344_v10 }
 0x1b8   : > { %v5264_v11 = vpop.f32.mrf.mxu0  ;;  %v1050_v12 = vpop.f32.mrf.mxu1 }
 0x1b9   : > { %v1410_v13 = vmax.f32 %v1378_v54, 0.0  ;;  %1223 = vrot.lane.b32.xlu1 %v5264_v11, %s4772_s17  ;;  %1225 = vrot.lane.b32.xlu2 %v1050_v12, %s4772_s17 }
 0x1bb   : > { %1443 = vst.msk [vmem:[#allocation3 + $0x20] sm:$0xff] %vm1438_vm4, %v1410_v13  ;;  %v1170_v14 = vpop.permute.xlu1 %1169  ;;  %v1168_v15 = vpop.permute.xlu0 %1167 }
 0x1bc   : > { %v1281_v17 = vsel %vm1275_vm5, %v1168_v15, %v1170_v14 }
 0x1bd   : > { %v1345_v19 = vmax.f32 %v5138_v7, %v1281_v17 }
 0x1bf   : > { %v1379_v63 = vadd.f32 %v5221_v32, %v1345_v19 }
 0x1c0   : > { %v5273_v21 = vpop.f32.mrf.mxu0  ;;  %v1053_v22 = vpop.f32.mrf.mxu1 }
 0x1c1   : > { %v1411_v30 = vmax.f32 %v1379_v63, 0.0  ;;  %1229 = vrot.lane.b32.xlu1 %v1053_v22, %s4772_s17  ;;  %1227 = vrot.lane.b32.xlu0 %v5273_v21, %s4772_s17 }
 0x1c2   : > { %v1714_v35 = vld [vmem:[#allocation3 + $0x16] ss:$2 sm:$0xff]  ;;  %v1746_v7 = vld [vmem:[#allocation3 + $0x17] ss:$2 sm:$0xff] }
 0x1c3   : > { %v1634_v37 = vld [vmem:[#allocation3 + $0x14] ss:$2 sm:$0xff]  ;;  %1444 = vst.msk [vmem:[#allocation3 + $0x28] sm:$0xff] %vm1438_vm4, %v1411_v30  ;;  %v1174_v38 = vpop.permute.xlu0 %1173  ;;  %v1776_v41 = vmax.f32 %v1714_v35, %v1746_v7  ;;  %v1666_v42 = vld [vmem:[#allocation3 + $0x15] ss:$2 sm:$0xff] }
 0x1c4   : > { %v1554_v45 = vld [vmem:[#allocation3 + $0x12] ss:$2 sm:$0xff]  ;;  %v1282_v47 = vsel %vm1275_vm5, %v1172_v27, %v1174_v38  ;;  %v1696_v28 = vmax.f32 %v1634_v37, %v1666_v42  ;;  %v1586_v50 = vld [vmem:[#allocation3 + $0x13] ss:$2 sm:$0xff] }
 0x1c5   : > { %v1346_v51 = vmax.f32 %v5147_v16, %v1282_v47  ;;  %v4549_v52 = vpack.i.bf16 %v1776_v41, %v1775_v40  ;;  %v1616_v56 = vmax.f32 %v1554_v45, %v1586_v50  ;;  %v1178_v16 = vpop.permute.xlu2 %1177 }
 0x1c6   : > { %v4544_v36 = vpack.i.bf16 %v1696_v28, %v1695_v48 }
 0x1c7   : > { %v1380_v57 = vadd.f32 %v5221_v32, %v1346_v51  ;;  %4550 = vrot.lane.b32.xlu2 %v4549_v52, %s4773_s22  ;;  %v4539_v59 = vpack.i.bf16 %v1616_v56, %v1615_v53 }
 0x1c8   : > { %v5283_v60 = vpop.f32.mrf.mxu0  ;;  %v1055_v61 = vpop.f32.mrf.mxu1 }
 0x1c9   : > { %v1412_v62 = vmax.f32 %v1380_v57, 0.0  ;;  %4545 = vrot.lane.b32.xlu1 %v4544_v36, %s4774_s29  ;;  %4540 = vrot.lane.b32.xlu0 %v4539_v59, %s4775_s8 }
 0x1cb   : > { %1445 = vst.msk [vmem:[#allocation3 + $0x30] sm:$0xff] %vm1438_vm4, %v1412_v62  ;;  %v1176_v0 = vpop.permute.xlu1 %1175 }
 0x1cc   : > { %v1283_v1 = vsel %vm1275_vm5, %v1176_v0, %v1178_v16 }
 0x1cd   : > { %v1347_v46 = vmax.f32 %v5154_v24, %v1283_v1  ;;  %v1184_v12 = vpop.permute.xlu2 %1183 }
 0x1cf   : > { %v1381_v43 = vadd.f32 %v5221_v32, %v1347_v46  ;;  %1231 = vrot.lane.b32.xlu2 %v5283_v60, %s4772_s17 }
 0x1d0   : > { %v5293_v4 = vpop.f32.mrf.mxu0  ;;  %v1058_v5 = vpop.f32.mrf.mxu1 }
 0x1d1   : > { %v1413_v6 = vmax.f32 %v1381_v43, 0.0  ;;  %1233 = vrot.lane.b32.xlu0 %v1055_v61, %s4772_s17  ;;  %1235 = vrot.lane.b32.xlu1 %v5293_v4, %s4772_s17 }
 0x1d2   : > { %v1716_v22 = vld [vmem:[#allocation3 + $0x26] ss:$2 sm:$0xff]  ;;  %v1748_v26 = vld [vmem:[#allocation3 + $0x27] ss:$2 sm:$0xff] }
 0x1d3   : > { %1446 = vst.msk [vmem:[#allocation3 + $0x38] sm:$0xff] %vm1438_vm4, %v1413_v6  ;;  %v1182_v8 = vpop.permute.xlu1 %1181  ;;  %v1180_v10 = vpop.permute.xlu0 %1179  ;;  %v1636_v27 = vld [vmem:[#allocation3 + $0x24] ss:$2 sm:$0xff]  ;;  %v1668_v30 = vld [vmem:[#allocation3 + $0x25] ss:$2 sm:$0xff]  ;;  %v1777_v41 = vmax.f32 %v1716_v22, %v1748_v26 }
 0x1d4   : > { %v1284_v24 = vsel %vm1275_vm5, %v1180_v10, %v1182_v8  ;;  %v1556_v35 = vld [vmem:[#allocation3 + $0x22] ss:$2 sm:$0xff]  ;;  %v1588_v7 = vld [vmem:[#allocation3 + $0x23] ss:$2 sm:$0xff]  ;;  %v1697_v28 = vmax.f32 %v1636_v27, %v1668_v30 }
 0x1d5   : > { %v1348_v54 = vmax.f32 %v5163_v34, %v1284_v24  ;;  %v1190_v31 = vpop.permute.xlu2 %1189  ;;  %v1617_v56 = vmax.f32 %v1556_v35, %v1588_v7 }
 0x1d7   : > { %v1382_v13 = vadd.f32 %v5221_v32, %v1348_v54  ;;  %1237 = vrot.lane.b32.xlu2 %v1058_v5, %s4772_s17 }
 0x1d8   : > { %v5303_v14 = vpop.f32.mrf.mxu0  ;;  %v1060_v15 = vpop.f32.mrf.mxu1 }
 0x1d9   : > { %v1414_v17 = vmax.f32 %v1382_v13, 0.0  ;;  %1241 = vrot.lane.b32.xlu1 %v1060_v15, %s4772_s17  ;;  %1239 = vrot.lane.b32.xlu0 %v5303_v14, %s4772_s17 }
 0x1db   : > { %1447 = vst.msk [vmem:[#allocation3 + $0x40] sm:$0xff] %vm1438_vm4, %v1414_v17  ;;  %v1186_v19 = vpop.permute.xlu0 %1185 }
 0x1dc   : > { %v1285_v63 = vsel %vm1275_vm5, %v1184_v12, %v1186_v19 }
 0x1dd   : > { %v1349_v34 = vmax.f32 %v5170_v44, %v1285_v63  ;;  %v1196_v0 = vpop.permute.xlu2 %1195 }
 0x1df   : > { %v1383_v20 = vadd.f32 %v5221_v32, %v1349_v34 }
 0x1e0   : > { %v5312_v23 = vpop.f32.mrf.mxu0  ;;  %v1063_v25 = vpop.f32.mrf.mxu1 }
 0x1e1   : > { %v1415_v33 = vmax.f32 %v1383_v20, 0.0  ;;  %1245 = vrot.lane.b32.xlu0 %v1063_v25, %s4772_s17  ;;  %1243 = vrot.lane.b32.xlu2 %v5312_v23, %s4772_s17 }
 0x1e2   : > { %v1718_v37 = vld [vmem:[#allocation3 + $0x36] ss:$2 sm:$0xff]  ;;  %v1750_v44 = vld [vmem:[#allocation3 + $0x37] ss:$2 sm:$0xff] }
 0x1e3   : > { %v1638_v38 = vld [vmem:[#allocation3 + $0x34] ss:$2 sm:$0xff]  ;;  %1448 = vst.msk [vmem:[#allocation3 + $0x48] sm:$0xff] %vm1438_vm4, %v1415_v33  ;;  %v1188_v40 = vpop.permute.xlu1 %1187  ;;  %v1778_v42 = vmax.f32 %v1718_v37, %v1750_v44  ;;  %v1670_v45 = vld [vmem:[#allocation3 + $0x35] ss:$2 sm:$0xff] }
 0x1e4   : > { %v1558_v47 = vld [vmem:[#allocation3 + $0x32] ss:$2 sm:$0xff]  ;;  %v1286_v48 = vsel %vm1275_vm5, %v1188_v40, %v1190_v31  ;;  %v1698_v50 = vmax.f32 %v1638_v38, %v1670_v45  ;;  %v1590_v51 = vld [vmem:[#allocation3 + $0x33] ss:$2 sm:$0xff] }
 0x1e5   : > { %v1350_v52 = vmax.f32 %v5179_v55, %v1286_v48  ;;  %v4564_v53 = vpack.i.bf16 %v1778_v42, %v1777_v41  ;;  %v1618_v57 = vmax.f32 %v1558_v47, %v1590_v51  ;;  %v1202_v54 = vpop.permute.xlu2 %1201  ;;  %v4254_v38 = vld [vmem:[%s6470_s2 + $0x74] sm:$0xf0] }
 0x1e6   : > { %v4559_v59 = vpack.i.bf16 %v1698_v50, %v1697_v28 }
 0x1e7   : > { %v1384_v36 = vadd.f32 %v5221_v32, %v1350_v52  ;;  %4565 = vrot.lane.b32.xlu1 %v4564_v53, %s4773_s22  ;;  %v4554_v61 = vpack.i.bf16 %v1618_v57, %v1617_v56 }
 0x1e8   : > { %v5322_v62 = vpop.f32.mrf.mxu0  ;;  %v1065_v16 = vpop.f32.mrf.mxu1 }
 0x1e9   : > { %v1416_v1 = vmax.f32 %v1384_v36, 0.0  ;;  %4560 = vrot.lane.b32.xlu0 %v4559_v59, %s4774_s29  ;;  %4555 = vrot.lane.b32.xlu2 %v4554_v61, %s4775_s8  ;;  %v4253_v61 = vld [vmem:[%s6470_s2 + $0x74] sm:$0xf] }
 0x1eb   : > { %1449 = vst.msk [vmem:[#allocation3 + $0x50] sm:$0xff] %vm1438_vm4, %v1416_v1  ;;  %v1194_v55 = vpop.permute.xlu1 %1193  ;;  %v1192_v46 = vpop.permute.xlu0 %1191 }
 0x1ec   : > { %v1287_v43 = vsel %vm1275_vm5, %v1192_v46, %v1194_v55 }
 0x1ed   : > { %v1351_v5 = vmax.f32 %v5188_v2, %v1287_v43 }
 0x1ef   : > { %v1385_v6 = vadd.f32 %v5221_v32, %v1351_v5  ;;  %1247 = vrot.lane.b32.xlu1 %v5322_v62, %s4772_s17  ;;  %v3970_v5 = vld [vmem:[%s6470_s2 + $0xf0] sm:$0xf] }
 0x1f0   : > { %v5332_v8 = vpop.f32.mrf.mxu0  ;;  %v1068_v10 = vpop.f32.mrf.mxu1 }
 0x1f1   : > { %v1417_v24 = vmax.f32 %v1385_v6, 0.0  ;;  %1249 = vrot.lane.b32.xlu2 %v1065_v16, %s4772_s17  ;;  %1251 = vrot.lane.b32.xlu0 %v5332_v8, %s4772_s17  ;;  %v3908_v16 = vld [vmem:[%s6470_s2 + $0x78] sm:$0xf0]  ;;  %v4270_v6 = vld [vmem:[%s6470_s2 + $0xf4] sm:$0xf0] }
 0x1f2   : > { %v1720_v26 = vld [vmem:[#allocation3 + $0x46] ss:$2 sm:$0xff]  ;;  %v1752_v27 = vld [vmem:[#allocation3 + $0x47] ss:$2 sm:$0xff]  ;;  %v3911_v43 = vor.u32 %v4253_v61, %v3908_v16  ;;  %v3946_v16 = vld [vmem:[%s6470_s2 + $0xc0] sm:$0xf] }
 0x1f3   : > { %1450 = vst.msk [vmem:[#allocation3 + $0x58] sm:$0xff] %vm1438_vm4, %v1417_v24  ;;  %v1198_v12 = vpop.permute.xlu0 %1197  ;;  %v5348_v34 = vpop.permute.xlu2 %1207  ;;  %v1640_v30 = vld [vmem:[#allocation3 + $0x44] ss:$2 sm:$0xff]  ;;  %v1672_v35 = vld [vmem:[#allocation3 + $0x45] ss:$2 sm:$0xff]  ;;  %v1779_v28 = vmax.f32 %v1720_v26, %v1752_v27 }
 0x1f4   : > { %v1288_v2 = vsel %vm1275_vm5, %v1196_v0, %v1198_v12  ;;  %v1560_v7 = vld [vmem:[#allocation3 + $0x42] ss:$2 sm:$0xff]  ;;  %v1592_v37 = vld [vmem:[#allocation3 + $0x43] ss:$2 sm:$0xff]  ;;  %v1699_v56 = vmax.f32 %v1640_v30, %v1672_v35  ;;  %v3898_v12 = vld [vmem:[%s6470_s2 + $0x60] sm:$0xf]  ;;  %2772 = vmatpush.bf16.msrb.mxu0 %v3911_v43 }
 0x1f5   : > { %v1352_v13 = vmax.f32 %v5197_v9, %v1288_v2  ;;  %v1619_v59 = vmax.f32 %v1560_v7, %v1592_v37  ;;  %v4252_v2 = vld [vmem:[%s6470_s2 + $0x64] sm:$0xf0]  ;;  %v4267_v30 = vld [vmem:[%s6470_s2 + $0xe4] sm:$0xf]  ;;  %v3890_v37 = vld [vmem:[%s6470_s2 + $0x50] sm:$0xf] }
 0x1f6   : > { %v4268_v27 = vld [vmem:[%s6470_s2 + $0xe4] sm:$0xf0]  ;;  %v4263_v43 = vld [vmem:[%s6470_s2 + $0xc4] sm:$0xf] }
 0x1f7   : > { %v1386_v15 = vadd.f32 %v5221_v32, %v1352_v13  ;;  %1253 = vrot.lane.b32.xlu1 %v1068_v10, %s4772_s17  ;;  %v4269_v10 = vld [vmem:[%s6470_s2 + $0xf4] sm:$0xf] }
 0x1f8   : > { %v5342_v17 = vpop.f32.mrf.mxu0  ;;  %v1070_v19 = vpop.f32.mrf.mxu1 }
 0x1f9   : > { %v1418_v63 = vmax.f32 %v1386_v15, 0.0  ;;  %1257 = vrot.lane.b32.xlu0 %v1070_v19, %s4772_s17  ;;  %1255 = vrot.lane.b32.xlu2 %v5342_v17, %s4772_s17 }
 0x1fb   : > { %1451 = vst.msk [vmem:[#allocation3 + $0x60] sm:$0xff] %vm1438_vm4, %v1418_v63  ;;  %v1200_v20 = vpop.permute.xlu1 %1199  ;;  %v5372_v0 = vpop.permute.xlu2 %1213  ;;  %v4251_v63 = vld [vmem:[%s6470_s2 + $0x64] sm:$0xf] }
 0x1fc   : > { %v1289_v9 = vsel %vm1275_vm5, %v1200_v20, %v1202_v54  ;;  %v3971_v54 = vor.u32 %v4270_v6, %v3970_v5  ;;  %v3900_v20 = vld [vmem:[%s6470_s2 + $0x68] sm:$0xf0] }
 0x1fd   : > { %v1353_v22 = vmax.f32 %v5204_v18, %v1289_v9  ;;  %v3906_v18 = vld [vmem:[%s6470_s2 + $0x70] sm:$0xf]  ;;  %v3962_v9 = vld [vmem:[%s6470_s2 + $0xe0] sm:$0xf]  ;;  %v3903_v26 = vor.u32 %v4251_v63, %v3900_v20  ;;  %v3948_v5 = vld [vmem:[%s6470_s2 + $0xc8] sm:$0xf0] }
 0x1fe   : > { %v3907_v45 = vor.u32 %v4254_v38, %v3906_v18  ;;  %2625 = vmatpush.bf16.msra.mxu3 %v3971_v54  ;;  %v3963_v7 = vor.u32 %v4268_v27, %v3962_v9  ;;  %v4245_v63 = vld [vmem:[%s6470_s2 + $0x34] sm:$0xf]  ;;  %v3876_v20 = vld [vmem:[%s6470_s2 + $0x38] sm:$0xf0] }
 0x1ff   : > { %v1387_v25 = vadd.f32 %v5221_v32, %v1353_v22  ;;  %2773 = vmatpush.bf16.msrb.mxu0 %v3903_v26  ;;  %v3938_v26 = vld [vmem:[%s6470_s2 + $0xb0] sm:$0xf]  ;;  %v4261_v27 = vld [vmem:[%s6470_s2 + $0xb4] sm:$0xf] }
 0x200   : > { %v5353_v31 = vpop.f32.mrf.mxu0  ;;  %v1073_v33 = vpop.f32.mrf.mxu1  ;;  %2576 = vmatpush.bf16.msra.mxu2 %v3907_v45 }
 0x201   : > { %v1419_v44 = vmax.f32 %v1387_v25, 0.0  ;;  %1261 = vrot.lane.b32.xlu2 %v1073_v33, %s4772_s17  ;;  %1259 = vrot.lane.b32.xlu1 %v5353_v31, %s4772_s17  ;;  %v3899_v25 = vor.u32 %v4252_v2, %v3898_v12  ;;  %v3964_v33 = vld [vmem:[%s6470_s2 + $0xe8] sm:$0xf0]  ;;  %v4246_v12 = vld [vmem:[%s6470_s2 + $0x34] sm:$0xf0]  ;;  %v3951_v2 = vor.u32 %v4263_v43, %v3948_v5 }
 0x202   : > { %v1722_v40 = vld [vmem:[#allocation3 + $0x56] ss:$2 sm:$0xff]  ;;  %v1754_v41 = vld [vmem:[#allocation3 + $0x57] ss:$2 sm:$0xff]  ;;  %v3967_v18 = vor.u32 %v4267_v30, %v3964_v33  ;;  %2626 = vmatpush.bf16.msra.mxu3 %v3963_v7 }
 0x203   : > { %v1642_v42 = vld [vmem:[#allocation3 + $0x54] ss:$2 sm:$0xff]  ;;  %1452 = vst.msk [vmem:[#allocation3 + $0x68] sm:$0xff] %vm1438_vm4, %v1419_v44  ;;  %v1206_v47 = vpop.permute.xlu1 %1205  ;;  %v1204_v48 = vpop.permute.xlu0 %1203  ;;  %v1780_v50 = vmax.f32 %v1722_v40, %v1754_v41  ;;  %v1674_v51 = vld [vmem:[#allocation3 + $0x55] ss:$2 sm:$0xff] }
 0x204   : > { %v1562_v52 = vld [vmem:[#allocation3 + $0x52] ss:$2 sm:$0xff]  ;;  %v1290_v53 = vsel %vm1275_vm5, %v1204_v48, %v1206_v47  ;;  %v1700_v57 = vmax.f32 %v1642_v42, %v1674_v51  ;;  %v1594_v36 = vld [vmem:[#allocation3 + $0x53] ss:$2 sm:$0xff]  ;;  %2577 = vmatpush.bf16.msra.mxu2 %v3899_v25  ;;  %v4249_v40 = vld [vmem:[%s6470_s2 + $0x54] sm:$0xf]  ;;  %v3879_v25 = vor.u32 %v4245_v63, %v3876_v20 }
 0x205   : > { %v1354_v1 = vmax.f32 %v5213_v29, %v1290_v53  ;;  %v4579_v55 = vpack.i.bf16 %v1780_v50, %v1779_v28  ;;  %v1620_v46 = vmax.f32 %v1562_v52, %v1594_v36  ;;  %v3972_v29 = vld [vmem:[%s6470_s2 + $0xf8] sm:$0xf0]  ;;  %v4250_v44 = vld [vmem:[%s6470_s2 + $0x54] sm:$0xf0]  ;;  %v3954_v42 = vld [vmem:[%s6470_s2 + $0xd0] sm:$0xf] }
 0x206   : > { %v4574_v24 = vpack.i.bf16 %v1700_v57, %v1699_v56  ;;  %v3975_v19 = vor.u32 %v4269_v10, %v3972_v29  ;;  %v3891_v38 = vor.u32 %v4250_v44, %v3890_v37  ;;  %v3892_v41 = vld [vmem:[%s6470_s2 + $0x58] sm:$0xf0]  ;;  %v4266_v48 = vld [vmem:[%s6470_s2 + $0xd4] sm:$0xf0]  ;;  %v4265_v28 = vld [vmem:[%s6470_s2 + $0xd4] sm:$0xf] }
 0x207   : > { %v1388_v13 = vadd.f32 %v5221_v32, %v1354_v1  ;;  %4580 = vrot.lane.b32.xlu0 %v4579_v55, %s4773_s22  ;;  %v4569_v15 = vpack.i.bf16 %v1620_v46, %v1619_v59  ;;  %v3895_v47 = vor.u32 %v4249_v40, %v3892_v41  ;;  %v3955_v51 = vor.u32 %v4266_v48, %v3954_v42  ;;  %v3956_v52 = vld [vmem:[%s6470_s2 + $0xd8] sm:$0xf0]  ;;  %v3882_v57 = vld [vmem:[%s6470_s2 + $0x40] sm:$0xf]  ;;  %v4248_v36 = vld [vmem:[%s6470_s2 + $0x44] sm:$0xf0] }
 0x208   : > { %v5404_v22 = vpop.f32.mrf.mxu0  ;;  %2821 = vmatpush.bf16.msrb.mxu1 %v3975_v19  ;;  %2578 = vmatpush.bf16.msra.mxu2 %v3891_v38  ;;  %v3959_v59 = vor.u32 %v4265_v28, %v3956_v52  ;;  %v3883_v61 = vor.u32 %v4248_v36, %v3882_v57  ;;  %v4264_v1 = vld [vmem:[%s6470_s2 + $0xc4] sm:$0xf0]  ;;  %v1075_v6 = vpop.f32.mrf.mxu1  ;;  %v3874_v29 = vld [vmem:[%s6470_s2 + $0x30] sm:$0xf]  ;;  %v3866_v33 = vld [vmem:[%s6470_s2 + $0x20] sm:$0xf] }
 0x209   : > { %v1420_v35 = vmax.f32 %v1388_v13, 0.0  ;;  %4575 = vrot.lane.b32.xlu2 %v4574_v24, %s4774_s29  ;;  %4570 = vrot.lane.b32.xlu1 %v4569_v15, %s4775_s8  ;;  %v3947_v24 = vor.u32 %v4264_v1, %v3946_v16  ;;  %v3875_v13 = vor.u32 %v4246_v12, %v3874_v29  ;;  %v4243_v38 = vld [vmem:[%s6470_s2 + $0x24] sm:$0xf]  ;;  %v3868_v40 = vld [vmem:[%s6470_s2 + $0x28] sm:$0xf0] }
 0x20a   : > { %2774 = vmatpush.bf16.msrb.mxu0 %v3895_v47  ;;  %2627 = vmatpush.bf16.msra.mxu3 %v3955_v51  ;;  %v3930_v41 = vld [vmem:[%s6470_s2 + $0xa0] sm:$0xf]  ;;  %v3871_v42 = vor.u32 %v4243_v38, %v3868_v40  ;;  %v4259_v47 = vld [vmem:[%s6470_s2 + $0xa4] sm:$0xf]  ;;  %v3932_v48 = vld [vmem:[%s6470_s2 + $0xa8] sm:$0xf0] }
 0x20b   : > { %1453 = vst.msk [vmem:[#allocation3 + $0x70] sm:$0xff] %vm1438_vm4, %v1420_v35  ;;  %v1210_v45 = vpop.permute.xlu0 %1209  ;;  %v5445_v56 = vpop.permute.xlu2 %1219  ;;  %v4244_v35 = vld [vmem:[%s6470_s2 + $0x24] sm:$0xf0]  ;;  %v3858_v51 = vld [vmem:[%s6470_s2 + $0x10] sm:$0xf] }
 0x20c   : > { %v1291_v50 = vsel %vm1275_vm5, %v5348_v34, %v1210_v45  ;;  %v4247_v34 = vld [vmem:[%s6470_s2 + $0x44] sm:$0xf]  ;;  %2822 = vmatpush.bf16.msrb.mxu1 %v3967_v18  ;;  %2579 = vmatpush.bf16.msra.mxu2 %v3883_v61  ;;  %v3867_v18 = vor.u32 %v4244_v35, %v3866_v33  ;;  %v4260_v45 = vld [vmem:[%s6470_s2 + $0xa4] sm:$0xf0]  ;;  %v4242_v52 = vld [vmem:[%s6470_s2 + $0x14] sm:$0xf0] }
 0x20d   : > { %v1355_v53 = vmax.f32 %v5228_v39, %v1291_v50  ;;  %v3884_v39 = vld [vmem:[%s6470_s2 + $0x48] sm:$0xf0]  ;;  %v3931_v50 = vor.u32 %v4260_v45, %v3930_v41  ;;  %v3859_v57 = vor.u32 %v4242_v52, %v3858_v51  ;;  %v4241_v36 = vld [vmem:[%s6470_s2 + $0x14] sm:$0xf]  ;;  %v4258_v1 = vld [vmem:[%s6470_s2 + $0x94] sm:$0xf0] }
 0x20e   : > { %v3887_v46 = vor.u32 %v4247_v34, %v3884_v39  ;;  %2628 = vmatpush.bf16.msra.mxu3 %v3947_v24  ;;  %v3860_v34 = vld [vmem:[%s6470_s2 + $0x18] sm:$0xf0]  ;;  %v4240_v24 = vld [vmem:[%s6470_s2 + $0x4] sm:$0xf0]  ;;  %v4239_v29 = vld [vmem:[%s6470_s2 + $0x4] sm:$0xf] }
 0x20f   : > { %v1389_v55 = vadd.f32 %v5221_v32, %v1355_v53  ;;  %1263 = vrot.lane.b32.xlu0 %v5404_v22, %s4772_s17  ;;  %v3935_v53 = vor.u32 %v4259_v47, %v3932_v48  ;;  %v3863_v16 = vor.u32 %v4241_v36, %v3860_v34  ;;  %v3924_v5 = vld [vmem:[%s6470_s2 + $0x98] sm:$0xf0]  ;;  %v3852_v12 = vld [vmem:[%s6470_s2 + $0x8] sm:$0xf0] }
 0x210   : > { %v5474_v10 = vpop.f32.mrf.mxu0  ;;  %2823 = vmatpush.bf16.msrb.mxu1 %v3959_v59  ;;  %2775 = vmatpush.bf16.msrb.mxu0 %v3887_v46  ;;  %v3922_v59 = vld [vmem:[%s6470_s2 + $0x90] sm:$0xf]  ;;  %v3855_v20 = vor.u32 %v4239_v29, %v3852_v12 }
 0x211   : > { %v1421_v54 = vmax.f32 %v1389_v55, 0.0  ;;  %1265 = vrot.lane.b32.xlu1 %v1075_v6, %s4772_s17  ;;  %1267 = vrot.lane.b32.xlu2 %v5474_v10, %s4772_s17  ;;  %v4257_v55 = vld [vmem:[%s6470_s2 + $0x94] sm:$0xf]  ;;  %v3923_v43 = vor.u32 %v4258_v1, %v3922_v59  ;;  %v3850_v6 = vld [vmem:[%s6470_s2] sm:$0xf]  ;;  %v1078_v59 = vpop.f32.mrf.mxu1 }
 0x212   : > { %2580 = vmatpush.bf16.msra.mxu2 %v3875_v13  ;;  %v3927_v13 = vor.u32 %v4257_v55, %v3924_v5  ;;  %v1644_v63 = vld [vmem:[#allocation3 + $0x64] ss:$2 sm:$0xff] }
 0x213   : > { %1454 = vst.msk [vmem:[#allocation3 + $0x78] sm:$0xff] %vm1438_vm4, %v1421_v54  ;;  %v1212_v15 = vpop.permute.xlu1 %1211  ;;  %v5514_v37 = vpop.permute.xlu2 %1225  ;;  %v1724_v35 = vld [vmem:[#allocation3 + $0x66] ss:$2 sm:$0xff] }
 0x214   : > { %v1292_v19 = vsel %vm1275_vm5, %v1212_v15, %v5372_v0  ;;  %v4262_v0 = vld [vmem:[%s6470_s2 + $0xb4] sm:$0xf0]  ;;  %2824 = vmatpush.bf16.msrb.mxu1 %v3951_v2  ;;  %2776 = vmatpush.bf16.msrb.mxu0 %v3879_v25  ;;  %v3914_v2 = vld [vmem:[%s6470_s2 + $0x80] sm:$0xf]  ;;  %v3851_v15 = vor.u32 %v4240_v24, %v3850_v6  ;;  %v3916_v25 = vld [vmem:[%s6470_s2 + $0x88] sm:$0xf0] }
 0x215   : > { %v1356_v9 = vmax.f32 %v5237_v49, %v1292_v19  ;;  %v3939_v30 = vor.u32 %v4262_v0, %v3938_v26  ;;  %v3940_v49 = vld [vmem:[%s6470_s2 + $0xb8] sm:$0xf0]  ;;  %v1676_v26 = vld [vmem:[#allocation3 + $0x65] ss:$2 sm:$0xff]  ;;  %v1564_v0 = vld [vmem:[#allocation3 + $0x62] ss:$2 sm:$0xff] }
 0x216   : > { %v3943_v44 = vor.u32 %v4261_v27, %v3940_v49  ;;  %2581 = vmatpush.bf16.msra.mxu2 %v3867_v18  ;;  %v1596_v27 = vld [vmem:[#allocation3 + $0x63] ss:$2 sm:$0xff] }
 0x217   : > { %v1390_v7 = vadd.f32 %v5221_v32, %v1356_v9  ;;  %2629 = vmatpush.bf16.msra.mxu3 %v3939_v30  ;;  %v4255_v9 = vld [vmem:[%s6470_s2 + $0x84] sm:$0xf] }
 0x218   : > { %2825 = vmatpush.bf16.msrb.mxu1 %v3943_v44  ;;  %2777 = vmatpush.bf16.msrb.mxu0 %v3871_v42  ;;  %v3919_v40 = vor.u32 %v4255_v9, %v3916_v25  ;;  %v1701_v42 = vmax.f32 %v1644_v63, %v1676_v26 }
 0x219   : > { %v1422_v28 = vmax.f32 %v1390_v7, 0.0  ;;  %v1756_v7 = vld [vmem:[#allocation3 + $0x67] ss:$2 sm:$0xff]  ;;  %v1080_v6 = vpop.f32.mrf.mxu1 }
 0x21a   : > { %2582 = vmatpush.bf16.msra.mxu2 %v3859_v57  ;;  %v1781_v36 = vmax.f32 %v1724_v35, %v1756_v7 }
 0x21b   : > { %1455 = vst.msk [vmem:[#allocation3 + $0x80] sm:$0xff] %vm1438_vm4, %v1422_v28  ;;  %v1218_v61 = vpop.permute.xlu1 %1217  ;;  %v1216_v39 = vpop.permute.xlu0 %1215  ;;  %2630 = vmatpush.bf16.msra.mxu3 %v3931_v50  ;;  %v1621_v50 = vmax.f32 %v1564_v0, %v1596_v27 }
 0x21c   : > { %v1293_v46 = vsel %vm1275_vm5, %v1216_v39, %v1218_v61  ;;  %2826 = vmatpush.bf16.msrb.mxu1 %v3935_v53  ;;  %2778 = vmatpush.bf16.msrb.mxu0 %v3863_v16 }
 0x21d   : > { %v1357_v54 = vmax.f32 %v5246_v58, %v1293_v46  ;;  %v4256_v58 = vld [vmem:[%s6470_s2 + $0x84] sm:$0xf0] }
 0x21e   : > { %v3915_v30 = vor.u32 %v4256_v58, %v3914_v2  ;;  %2583 = vmatpush.bf16.msra.mxu2 %v3851_v15  ;;  %v1474_v15 = vld [vmem:[#allocation3 + $0x10] ss:$2 sm:$0xff]  ;;  %v1504_v58 = vld [vmem:[#allocation3 + $0x1] ss:$2 sm:$0xff] }
 0x21f   : > { %v1391_v19 = vadd.f32 %v5221_v32, %v1357_v54  ;;  %2631 = vmatpush.bf16.msra.mxu3 %v3923_v43  ;;  %v5602_v43 = vpop.f32.mrf.mxu0 }
 0x220   : > { %2827 = vmatpush.bf16.msrb.mxu1 %v3927_v13  ;;  %2779 = vmatpush.bf16.msrb.mxu0 %v3855_v20  ;;  %v1472_v13 = vld [vmem:[#allocation3] ss:$2 sm:$0xff] }
 0x221   : > { %v1423_v49 = vmax.f32 %v1391_v19, 0.0  ;;  %v5586_v33 = vpop.permute.xlu2 %4550  ;;  %v1506_v19 = vld [vmem:[#allocation3 + $0x11] ss:$2 sm:$0xff]  ;;  %v1535_v25 = vmax.f32 %v1472_v13, %v1504_v58 }
 0x222   : > { %v1646_v44 = vld [vmem:[#allocation3 + $0x74] ss:$2 sm:$0xff]  ;;  %v1678_v18 = vld [vmem:[#allocation3 + $0x75] ss:$2 sm:$0xff]  ;;  %v1536_v26 = vmax.f32 %v1474_v15, %v1506_v19  ;;  %v4553_v35 = vunpack.i.h.bf16 %v5586_v33  ;;  %v4552_v7 = vunpack.i.l.bf16 %v5586_v33 }
 0x223   : > { %v1566_v38 = vld [vmem:[#allocation3 + $0x72] ss:$2 sm:$0xff]  ;;  %1456 = vst.msk [vmem:[#allocation3 + $0x88] sm:$0xff] %vm1438_vm4, %v1423_v49  ;;  %v1222_v41 = vpop.permute.xlu0 %1221  ;;  %v1702_v45 = vmax.f32 %v1646_v44, %v1678_v18  ;;  %v1598_v47 = vld [vmem:[#allocation3 + $0x73] ss:$2 sm:$0xff]  ;;  %2632 = vmatpush.bf16.msra.mxu3 %v3915_v30 }
 0x224   : > { %v1726_v48 = vld [vmem:[#allocation3 + $0x76] ss:$2 sm:$0xff]  ;;  %v1294_v28 = vsel %vm1275_vm5, %v5445_v56, %v1222_v41  ;;  %v1622_v51 = vmax.f32 %v1566_v38, %v1598_v47  ;;  %v1758_v52 = vld [vmem:[#allocation3 + $0x77] ss:$2 sm:$0xff]  ;;  %2828 = vmatpush.bf16.msrb.mxu1 %v3919_v40 }
 0x225   : > { %v1358_v53 = vmax.f32 %v5255_v3, %v1294_v28  ;;  %v4589_v57 = vpack.i.bf16 %v1702_v45, %v1701_v42  ;;  %v1782_v34 = vmax.f32 %v1726_v48, %v1758_v52  ;;  %v1476_v19 = vld [vmem:[#allocation3 + $0x20] ss:$2 sm:$0xff] }
 0x226   : > { %v4584_v61 = vpack.i.bf16 %v1622_v51, %v1621_v50 }
 0x227   : > { %v1392_v39 = vadd.f32 %v5221_v32, %v1358_v53  ;;  %4590 = vrot.lane.b32.xlu1 %v4589_v57, %s4774_s29  ;;  %v4594_v16 = vpack.i.bf16 %v1782_v34, %v1781_v36 }
 0x228   : > { %4585 = vrot.lane.b32.xlu0 %v4584_v61, %s4775_s8 }
 0x229   : > { %v1424_v56 = vmax.f32 %v1392_v39, 0.0  ;;  %4595 = vrot.lane.b32.xlu2 %v4594_v16, %s4773_s22  ;;  %v5596_v1 = vpop.permute.xlu2 %1231 }
 0x22b   : > { %1457 = vst.msk [vmem:[#allocation3 + $0x90] sm:$0xff] %vm1438_vm4, %v1424_v56  ;;  %v1224_v3 = vpop.permute.xlu1 %1223 }
 0x22c   : > { %v1295_v55 = vsel %vm1275_vm5, %v1224_v3, %v5514_v37 }
 0x22d   : > { %v1359_v46 = vmax.f32 %v5264_v11, %v1295_v55 }
 0x22f   : > { %v1393_v5 = vadd.f32 %v5221_v32, %v1359_v46  ;;  %1271 = vrot.lane.b32.xlu1 %v5602_v43, %s4772_s17 }
 0x230   : > { %1269 = vrot.lane.b32.xlu0 %v1078_v59, %s4772_s17 }
 0x231   : > { %v1425_v24 = vmax.f32 %v1393_v5, 0.0  ;;  %1273 = vrot.lane.b32.xlu2 %v1080_v6, %s4772_s17  ;;  %v1238_v54 = vpop.permute.xlu2 %1237 }
 0x232   : > { %v1568_v47 = vld [vmem:[#allocation3 + $0x82] ss:$2 sm:$0xff]  ;;  %v1600_v48 = vld [vmem:[#allocation3 + $0x83] ss:$2 sm:$0xff] }
 0x233   : > { %1458 = vst.msk [vmem:[#allocation3 + $0x98] sm:$0xff] %vm1438_vm4, %v1425_v24  ;;  %v1230_v29 = vpop.permute.xlu1 %1229  ;;  %v1228_v37 = vpop.permute.xlu0 %1227  ;;  %v1728_v28 = vld [vmem:[#allocation3 + $0x86] ss:$2 sm:$0xff]  ;;  %v1760_v51 = vld [vmem:[#allocation3 + $0x87] ss:$2 sm:$0xff]  ;;  %v1623_v39 = vmax.f32 %v1568_v47, %v1600_v48 }
 0x234   : > { %v1296_v11 = vsel %vm1275_vm5, %v1228_v37, %v1230_v29  ;;  %v1648_v52 = vld [vmem:[#allocation3 + $0x84] ss:$2 sm:$0xff]  ;;  %v1680_v53 = vld [vmem:[#allocation3 + $0x85] ss:$2 sm:$0xff]  ;;  %v1783_v3 = vmax.f32 %v1728_v28, %v1760_v51 }
 0x235   : > { %v1360_v12 = vmax.f32 %v5273_v21, %v1296_v11  ;;  %v1703_v5 = vmax.f32 %v1648_v52, %v1680_v53 }
 0x237   : > { %v1394_v2 = vadd.f32 %v5221_v32, %v1360_v12 }
 0x239   : > { %v1426_v63 = vmax.f32 %v1394_v2, 0.0 }
 0x23b   : > { %1459 = vst.msk [vmem:[#allocation3 + $0xa0] sm:$0xff] %vm1438_vm4, %v1426_v63  ;;  %v4546_v20 = vpop.permute.xlu1 %4545  ;;  %v4541_v9 = vpop.permute.xlu0 %4540 }
 0x23c   : > { %v4548_v0 = vunpack.i.h.bf16 %v4546_v20  ;;  %v4547_v27 = vunpack.i.l.bf16 %v4546_v20  ;;  %v4543_v30 = vunpack.i.h.bf16 %v4541_v9  ;;  %v4542_v49 = vunpack.i.l.bf16 %v4541_v9  ;;  %v5614_v21 = vpop.permute.xlu2 %1243  ;;  %v1478_v9 = vld [vmem:[#allocation3 + $0x30] ss:$2 sm:$0xff] }
 0x23e   : > { %v2127_v44 = vsel %vm1438_vm4, %v1535_v25, %v4542_v49  ;;  %v2128_v18 = vsel %vm1438_vm4, %v1536_v26, %v4543_v30  ;;  %v2144_v38 = vsel %vm2143_vm6, %v4542_v49, %v4547_v27  ;;  %v2145_v40 = vsel %vm2143_vm6, %v4543_v30, %v4548_v0  ;;  %v1508_v25 = vld [vmem:[#allocation3 + $0x21] ss:$2 sm:$0xff] }
 0x23f   : > { %v2194_v41 = vpack.c.bf16 %v2128_v18, %v2127_v44  ;;  %v2161_v42 = vsel %vm2160_vm7, %v2144_v38, %v4552_v7  ;;  %v2162_v45 = vsel %vm2160_vm7, %v2145_v40, %v4553_v35  ;;  %v1537_v0 = vmax.f32 %v1476_v19, %v1508_v25  ;;  %v5647_v40 = vld [vmem:[%s6474_s6] ss:$0 sm:$0xff] }
 0x240   : > { %v2195_v50 = vpack.c.bf16 %v2162_v45, %v2161_v42 }
 0x241   : > { %2584 = vmatmul.bf16.vlgmr.msra.gmra.mxu2 %v2194_v41  ;;  %2780 = vmatmul.bf16.vlgmr.msrb.gmra.mxu0 %v2194_v41 }
 0x242   : > { %2633 = vmatmul.bf16.vlgmr.msra.gmra.mxu3 %v2195_v50  ;;  %2829 = vmatmul.bf16.vlgmr.msrb.gmra.mxu1 %v2195_v50  ;;  %v1570_v57 = vld [vmem:[#allocation3 + $0x92] ss:$2 sm:$0xff]  ;;  %v1602_v36 = vld [vmem:[#allocation3 + $0x93] ss:$2 sm:$0xff] }
 0x243   : > { %v1730_v34 = vld [vmem:[#allocation3 + $0x96] ss:$2 sm:$0xff]  ;;  %v1234_v59 = vpop.permute.xlu0 %1233  ;;  %v1236_v61 = vpop.permute.xlu1 %1235  ;;  %v1624_v16 = vmax.f32 %v1570_v57, %v1602_v36  ;;  %v1762_v56 = vld [vmem:[#allocation3 + $0x97] ss:$2 sm:$0xff] }
 0x244   : > { %v1650_v55 = vld [vmem:[#allocation3 + $0x94] ss:$2 sm:$0xff]  ;;  %v1682_v46 = vld [vmem:[#allocation3 + $0x95] ss:$2 sm:$0xff]  ;;  %v1297_v6 = vsel %vm1275_vm5, %v5596_v1, %v1234_v59  ;;  %v1298_v24 = vsel %vm1275_vm5, %v1236_v61, %v1238_v54  ;;  %v1784_v29 = vmax.f32 %v1730_v34, %v1762_v56  ;;  %v4556_v2 = vpop.permute.xlu2 %4555 }
 0x245   : > { %v1704_v37 = vmax.f32 %v1650_v55, %v1682_v46  ;;  %v1361_v11 = vmax.f32 %v5283_v60, %v1297_v6  ;;  %v1362_v12 = vmax.f32 %v5293_v4, %v1298_v24  ;;  %v4599_v13 = vpack.i.bf16 %v1624_v16, %v1623_v39  ;;  %v1510_v1 = vld [vmem:[#allocation3 + $0x31] ss:$2 sm:$0xff] }
 0x246   : > { %v4609_v15 = vpack.i.bf16 %v1784_v29, %v1783_v3  ;;  %v4558_v26 = vunpack.i.h.bf16 %v4556_v2  ;;  %v4557_v54 = vunpack.i.l.bf16 %v4556_v2  ;;  %v1538_v27 = vmax.f32 %v1478_v9, %v1510_v1 }
 0x247   : > { %v4604_v58 = vpack.i.bf16 %v1704_v37, %v1703_v5  ;;  %v1395_v63 = vadd.f32 %v5221_v32, %v1361_v11  ;;  %v1396_v20 = vadd.f32 %v5221_v32, %v1362_v12  ;;  %4600 = vrot.lane.b32.xlu0 %v4599_v13, %s4775_s8 }
 0x248   : > { %4610 = vrot.lane.b32.xlu2 %v4609_v15, %s4773_s22  ;;  %v2129_v44 = vsel %vm1438_vm4, %v1537_v0, %v4557_v54  ;;  %v2130_v18 = vsel %vm1438_vm4, %v1538_v27, %v4558_v26 }
 0x249   : > { %v1427_v60 = vmax.f32 %v1395_v63, 0.0  ;;  %v1428_v4 = vmax.f32 %v1396_v20, 0.0  ;;  %4605 = vrot.lane.b32.xlu1 %v4604_v58, %s4774_s29  ;;  %v2198_v42 = vpack.c.bf16 %v2130_v18, %v2129_v44 }
 0x24b   : > { %1460 = vst.msk [vmem:[#allocation3 + $0xa8] sm:$0xff] %vm1438_vm4, %v1427_v60  ;;  %v1242_v30 = vpop.permute.xlu1 %1241  ;;  %v1240_v49 = vpop.permute.xlu0 %1239 }
 0x24c   : > { %1461 = vst.msk [vmem:[#allocation3 + $0xb0] sm:$0xff] %vm1438_vm4, %v1428_v4  ;;  %v1299_v32 = vsel %vm1275_vm5, %v1240_v49, %v1242_v30  ;;  %v1250_v52 = vpop.permute.xlu2 %1249 }
 0x24d   : > { %v1363_v38 = vmax.f32 %v5303_v14, %v1299_v32 }
 0x24f   : > { %v1397_v41 = vadd.f32 %v5647_v40, %v1363_v38 }
 0x251   : > { %v1429_v45 = vmax.f32 %v1397_v41, 0.0  ;;  %2589 = vmatmul.bf16.gmra.mxu2 %v2198_v42  ;;  %2785 = vmatmul.bf16.gmra.mxu0 %v2198_v42 }
 0x253   : > { %1462 = vst.msk [vmem:[#allocation3 + $0xb8] sm:$0xff] %vm1438_vm4, %v1429_v45  ;;  %v1246_v47 = vpop.permute.xlu0 %1245  ;;  %v1572_v56 = vld [vmem:[#allocation3 + $0xa2] ss:$2 sm:$0xff]  ;;  %v1604_v3 = vld [vmem:[#allocation3 + $0xa3] ss:$2 sm:$0xff] }
 0x254   : > { %v1300_v48 = vsel %vm1275_vm5, %v5614_v21, %v1246_v47  ;;  %v1732_v55 = vld [vmem:[#allocation3 + $0xa6] ss:$2 sm:$0xff]  ;;  %v1764_v5 = vld [vmem:[#allocation3 + $0xa7] ss:$2 sm:$0xff]  ;;  %v1625_v15 = vmax.f32 %v1572_v56, %v1604_v3 }
 0x255   : > { %v1364_v28 = vmax.f32 %v5312_v23, %v1300_v48  ;;  %v1652_v6 = vld [vmem:[#allocation3 + $0xa4] ss:$2 sm:$0xff]  ;;  %v1684_v24 = vld [vmem:[#allocation3 + $0xa5] ss:$2 sm:$0xff]  ;;  %v1785_v9 = vmax.f32 %v1732_v55, %v1764_v5 }
 0x256   : > { %v1705_v1 = vmax.f32 %v1652_v6, %v1684_v24 }
 0x257   : > { %v1398_v14 = vadd.f32 %v5647_v40, %v1364_v28 }
 0x259   : > { %v1430_v50 = vmax.f32 %v1398_v14, 0.0  ;;  %v5655_v51 = vpop.permute.xlu1 %4565 }
 0x25a   : > { %v4568_v34 = vunpack.i.h.bf16 %v5655_v51  ;;  %v4567_v59 = vunpack.i.l.bf16 %v5655_v51 }
 0x25b   : > { %1463 = vst.msk [vmem:[#allocation3 + $0xc0] sm:$0xff] %vm1438_vm4, %v1430_v50  ;;  %v4561_v53 = vpop.permute.xlu0 %4560 }
 0x25c   : > { %v4563_v57 = vunpack.i.h.bf16 %v4561_v53  ;;  %v4562_v36 = vunpack.i.l.bf16 %v4561_v53  ;;  %v1482_v53 = vld [vmem:[#allocation3 + $0x50] ss:$2 sm:$0xff] }
 0x25e   : > { %v2146_v61 = vsel %vm2143_vm6, %v4557_v54, %v4562_v36  ;;  %v2147_v21 = vsel %vm2143_vm6, %v4558_v26, %v4563_v57  ;;  %v1256_v54 = vpop.permute.xlu2 %1255  ;;  %v1512_v57 = vld [vmem:[#allocation3 + $0x41] ss:$2 sm:$0xff] }
 0x25f   : > { %v2163_v23 = vsel %vm2160_vm7, %v2146_v61, %v4567_v59  ;;  %v2164_v39 = vsel %vm2160_vm7, %v2147_v21, %v4568_v34 }
 0x260   : > { %v2199_v16 = vpack.c.bf16 %v2164_v39, %v2163_v23 }
 0x261   : > { %v1248_v46 = vpop.permute.xlu1 %1247 }
 0x262   : > { %v1301_v29 = vsel %vm1275_vm5, %v1248_v46, %v1250_v52  ;;  %2638 = vmatmul.bf16.gmra.mxu3 %v2199_v16  ;;  %2834 = vmatmul.bf16.gmra.mxu1 %v2199_v16  ;;  %v1574_v37 = vld [vmem:[#allocation3 + $0xb2] ss:$2 sm:$0xff]  ;;  %v1606_v11 = vld [vmem:[#allocation3 + $0xb3] ss:$2 sm:$0xff] }
 0x263   : > { %v1734_v12 = vld [vmem:[#allocation3 + $0xb6] ss:$2 sm:$0xff]  ;;  %v1365_v2 = vmax.f32 %v5322_v62, %v1301_v29  ;;  %v1252_v13 = vpop.permute.xlu0 %1251  ;;  %v1626_v58 = vmax.f32 %v1574_v37, %v1606_v11  ;;  %v1766_v19 = vld [vmem:[#allocation3 + $0xb7] ss:$2 sm:$0xff] }
 0x264   : > { %v1654_v63 = vld [vmem:[#allocation3 + $0xb4] ss:$2 sm:$0xff]  ;;  %v1686_v20 = vld [vmem:[#allocation3 + $0xb5] ss:$2 sm:$0xff]  ;;  %v1786_v25 = vmax.f32 %v1734_v12, %v1766_v19 }
 0x265   : > { %v1706_v26 = vmax.f32 %v1654_v63, %v1686_v20  ;;  %v1399_v60 = vadd.f32 %v5647_v40, %v1365_v2  ;;  %v4614_v4 = vpack.i.bf16 %v1626_v58, %v1625_v15  ;;  %v1480_v52 = vld [vmem:[#allocation3 + $0x40] ss:$2 sm:$0xff] }
 0x266   : > { %v4624_v0 = vpack.i.bf16 %v1786_v25, %v1785_v9  ;;  %v1262_v42 = vpop.permute.xlu2 %1261  ;;  %v1539_v39 = vmax.f32 %v1480_v52, %v1512_v57  ;;  %v1516_v52 = vld [vmem:[#allocation3 + $0x61] ss:$2 sm:$0xff] }
 0x267   : > { %v4619_v27 = vpack.i.bf16 %v1706_v26, %v1705_v1  ;;  %v1431_v30 = vmax.f32 %v1399_v60, 0.0  ;;  %4615 = vrot.lane.b32.xlu0 %v4614_v4, %s4775_s8 }
 0x268   : > { %4625 = vrot.lane.b32.xlu2 %v4624_v0, %s4773_s22 }
 0x269   : > { %4620 = vrot.lane.b32.xlu1 %v4619_v27, %s4774_s29  ;;  %1464 = vst.msk [vmem:[#allocation3 + $0xc8] sm:$0xff] %vm1438_vm4, %v1431_v30  ;;  %v1254_v62 = vpop.permute.xlu1 %1253 }
 0x26a   : > { %v1302_v49 = vsel %vm1275_vm5, %v1252_v13, %v1254_v62 }
 0x26b   : > { %v1366_v32 = vmax.f32 %v5332_v8, %v1302_v49  ;;  %v1258_v44 = vpop.permute.xlu0 %1257 }
 0x26c   : > { %v1303_v18 = vsel %vm1275_vm5, %v1256_v54, %v1258_v44 }
 0x26d   : > { %v1400_v38 = vadd.f32 %v5647_v40, %v1366_v32  ;;  %v1367_v41 = vmax.f32 %v5342_v17, %v1303_v18  ;;  %v1514_v17 = vld [vmem:[#allocation3 + $0x51] ss:$2 sm:$0xff] }
 0x26e   : > { %v4576_v36 = vpop.permute.xlu2 %4575  ;;  %v1540_v16 = vmax.f32 %v1482_v53, %v1514_v17  ;;  %v1518_v53 = vld [vmem:[#allocation3 + $0x71] ss:$2 sm:$0xff] }
 0x26f   : > { %v1432_v45 = vmax.f32 %v1400_v38, 0.0  ;;  %v1401_v47 = vadd.f32 %v5647_v40, %v1367_v41  ;;  %v4578_v56 = vunpack.i.h.bf16 %v4576_v36  ;;  %v4577_v3 = vunpack.i.l.bf16 %v4576_v36 }
 0x271   : > { %1465 = vst.msk [vmem:[#allocation3 + $0xd0] sm:$0xff] %vm1438_vm4, %v1432_v45  ;;  %v1433_v48 = vmax.f32 %v1401_v47, 0.0 }
 0x273   : > { %1466 = vst.msk [vmem:[#allocation3 + $0xd8] sm:$0xff] %vm1438_vm4, %v1433_v48  ;;  %v1260_v28 = vpop.permute.xlu1 %1259 }
 0x274   : > { %v1304_v14 = vsel %vm1275_vm5, %v1260_v28, %v1262_v42 }
 0x275   : > { %v1368_v8 = vmax.f32 %v5353_v31, %v1304_v14 }
 0x276   : > { %v1268_v14 = vpop.permute.xlu2 %1267 }
 0x277   : > { %v1402_v50 = vadd.f32 %v5647_v40, %v1368_v8 }
 0x278   : > { %v1576_v15 = vld [vmem:[#allocation3 + $0xc2] ss:$2 sm:$0xff]  ;;  %v1608_v58 = vld [vmem:[#allocation3 + $0xc3] ss:$2 sm:$0xff] }
 0x279   : > { %v1434_v61 = vmax.f32 %v1402_v50, 0.0  ;;  %v5686_v21 = vpop.permute.xlu0 %4580  ;;  %v1736_v19 = vld [vmem:[#allocation3 + $0xc6] ss:$2 sm:$0xff]  ;;  %v1768_v63 = vld [vmem:[#allocation3 + $0xc7] ss:$2 sm:$0xff]  ;;  %v1627_v4 = vmax.f32 %v1576_v15, %v1608_v58 }
 0x27a   : > { %v4583_v31 = vunpack.i.h.bf16 %v5686_v21  ;;  %v4582_v5 = vunpack.i.l.bf16 %v5686_v21  ;;  %v1656_v20 = vld [vmem:[#allocation3 + $0xc4] ss:$2 sm:$0xff]  ;;  %v1688_v9 = vld [vmem:[#allocation3 + $0xc5] ss:$2 sm:$0xff]  ;;  %v1787_v32 = vmax.f32 %v1736_v19, %v1768_v63 }
 0x27b   : > { %1467 = vst.msk [vmem:[#allocation3 + $0xe0] sm:$0xff] %vm1438_vm4, %v1434_v61  ;;  %v4571_v23 = vpop.permute.xlu1 %4570  ;;  %v1707_v41 = vmax.f32 %v1656_v20, %v1688_v9  ;;  %v1486_v50 = vld [vmem:[#allocation3 + $0x70] ss:$2 sm:$0xff] }
 0x27c   : > { %v4573_v55 = vunpack.i.h.bf16 %v4571_v23  ;;  %v4572_v46 = vunpack.i.l.bf16 %v4571_v23  ;;  %v5731_v20 = vld [vmem:[%s6470_s2 + $0x1a0] sm:$0x33] }
 0x27e   : > { %v2131_v6 = vsel %vm1438_vm4, %v1539_v39, %v4572_v46  ;;  %v2132_v24 = vsel %vm1438_vm4, %v1540_v16, %v4573_v55  ;;  %v2148_v29 = vsel %vm2143_vm6, %v4572_v46, %v4577_v3  ;;  %v2149_v37 = vsel %vm2143_vm6, %v4573_v55, %v4578_v56  ;;  %v4034_v46 = vld [vmem:[%s6470_s2 + $0x170] sm:$0xf] }
 0x27f   : > { %v2202_v11 = vpack.c.bf16 %v2132_v24, %v2131_v6  ;;  %v2165_v12 = vsel %vm2160_vm7, %v2148_v29, %v4582_v5  ;;  %v2166_v2 = vsel %vm2160_vm7, %v2149_v37, %v4583_v31  ;;  %v1542_v56 = vmax.f32 %v1486_v50, %v1518_v53  ;;  %v4286_v6 = vld [vmem:[%s6470_s2 + $0x174] sm:$0xf0] }
 0x280   : > { %v2203_v13 = vpack.c.bf16 %v2166_v2, %v2165_v12  ;;  %v4035_v15 = vor.u32 %v4286_v6, %v4034_v46  ;;  %v1796_v46 = vld [vmem:[#allocation3 + $0x28] ss:$2 sm:$0xff]  ;;  %v1794_v6 = vld [vmem:[#allocation3 + $0x18] ss:$2 sm:$0xff] }
 0x281   : > { %2594 = vmatmul.bf16.gmra.mxu2 %v2202_v11  ;;  %2790 = vmatmul.bf16.gmra.mxu0 %v2202_v11  ;;  %v1264_v54 = vpop.permute.xlu0 %1263 }
 0x282   : > { %2643 = vmatmul.bf16.gmra.mxu3 %v2203_v13  ;;  %2839 = vmatmul.bf16.gmra.mxu1 %v2203_v13  ;;  %v1578_v25 = vld [vmem:[#allocation3 + $0xd2] ss:$2 sm:$0xff]  ;;  %v1610_v1 = vld [vmem:[#allocation3 + $0xd3] ss:$2 sm:$0xff] }
 0x283   : > { %v1738_v26 = vld [vmem:[#allocation3 + $0xd6] ss:$2 sm:$0xff]  ;;  %v1266_v60 = vpop.permute.xlu1 %1265  ;;  %v1628_v0 = vmax.f32 %v1578_v25, %v1610_v1  ;;  %v1770_v27 = vld [vmem:[#allocation3 + $0xd7] ss:$2 sm:$0xff]  ;;  %v5708_v8 = vpop.permute.xlu2 %4595  ;;  %2674 = vmatpush.bf16.msrb.mxu2 %v4035_v15  ;;  %v2436_v1 = vunpack.c.l.b16 %v5731_v20 }
 0x284   : > { %v1658_v30 = vld [vmem:[#allocation3 + $0xd4] ss:$2 sm:$0xff]  ;;  %v1690_v62 = vld [vmem:[#allocation3 + $0xd5] ss:$2 sm:$0xff]  ;;  %v1305_v49 = vsel %vm1275_vm5, %v1264_v54, %v1266_v60  ;;  %v1788_v44 = vmax.f32 %v1738_v26, %v1770_v27  ;;  %v4598_v3 = vunpack.i.h.bf16 %v5708_v8  ;;  %v4597_v55 = vunpack.i.l.bf16 %v5708_v8 }
 0x285   : > { %v1369_v18 = vmax.f32 %v5404_v22, %v1305_v49  ;;  %v4629_v38 = vpack.i.bf16 %v1628_v0, %v1627_v4  ;;  %v1708_v42 = vmax.f32 %v1658_v30, %v1690_v62  ;;  %v1484_v22 = vld [vmem:[#allocation3 + $0x60] ss:$2 sm:$0xff]  ;;  %v2490_v4 = vpack.c.b16 %v2436_v1, %v2436_v1  ;;  %v1832_v15 = vld [vmem:[#allocation3 + $0x49] ss:$2 sm:$0xff] }
 0x286   : > { %v4639_v45 = vpack.i.bf16 %v1788_v44, %v1787_v32  ;;  %v1541_v16 = vmax.f32 %v1484_v22, %v1516_v52 }
 0x287   : > { %v1403_v47 = vadd.f32 %v5647_v40, %v1369_v18  ;;  %4630 = vrot.lane.b32.xlu0 %v4629_v38, %s4775_s8  ;;  %v4634_v48 = vpack.i.bf16 %v1708_v42, %v1707_v41  ;;  %v2571_v30 = vsel %vm2569_vm8, %v2490_v4, 0 }
 0x288   : > { %4640 = vrot.lane.b32.xlu2 %v4639_v45, %s4773_s22  ;;  %2728 = vmatpush.bf16.msrb.mxu3 %v2571_v30 }
 0x289   : > { %v1435_v28 = vmax.f32 %v1403_v47, 0.0  ;;  %4635 = vrot.lane.b32.xlu1 %v4634_v48, %s4774_s29 }
 0x28b   : > { %1468 = vst.msk [vmem:[#allocation3 + $0xe8] sm:$0xff] %vm1438_vm4, %v1435_v28  ;;  %v1274_v19 = vpop.permute.xlu2 %1273 }
 0x299   : > { %v4591_v57 = vpop.permute.xlu1 %4590 }
 0x29a   : > { %v4593_v17 = vunpack.i.h.bf16 %v4591_v57  ;;  %v4592_v36 = vunpack.i.l.bf16 %v4591_v57  ;;  %v4586_v61 = vpop.permute.xlu0 %4585 }
 0x29b   : > { %v4588_v23 = vunpack.i.h.bf16 %v4586_v61  ;;  %v4587_v39 = vunpack.i.l.bf16 %v4586_v61 }
 0x29d   : > { %v2133_v24 = vsel %vm1438_vm4, %v1541_v16, %v4587_v39  ;;  %v2134_v29 = vsel %vm1438_vm4, %v1542_v56, %v4588_v23  ;;  %v2150_v37 = vsel %vm2143_vm6, %v4587_v39, %v4592_v36  ;;  %v2151_v11 = vsel %vm2143_vm6, %v4588_v23, %v4593_v17  ;;  %v1792_v17 = vld [vmem:[#allocation3 + $0x8] ss:$2 sm:$0xff]  ;;  %v1824_v36 = vld [vmem:[#allocation3 + $0x9] ss:$2 sm:$0xff]  ;;  %v1802_v16 = vld [vmem:[#allocation3 + $0x58] ss:$2 sm:$0xff] }
 0x29e   : > { %v2206_v12 = vpack.c.bf16 %v2134_v29, %v2133_v24  ;;  %v2167_v2 = vsel %vm2160_vm7, %v2150_v37, %v4597_v55  ;;  %v2168_v13 = vsel %vm2160_vm7, %v2151_v11, %v4598_v3  ;;  %v1834_v56 = vld [vmem:[#allocation3 + $0x59] ss:$2 sm:$0xff]  ;;  %v1798_v37 = vld [vmem:[#allocation3 + $0x38] ss:$2 sm:$0xff]  ;;  %v1828_v11 = vld [vmem:[#allocation3 + $0x29] ss:$2 sm:$0xff] }
 0x29f   : > { %v2207_v58 = vpack.c.bf16 %v2168_v13, %v2167_v2  ;;  %v1826_v24 = vld [vmem:[#allocation3 + $0x19] ss:$2 sm:$0xff]  ;;  %v1800_v13 = vld [vmem:[#allocation3 + $0x48] ss:$2 sm:$0xff]  ;;  %v1857_v4 = vmax.f32 %v1796_v46, %v1828_v11  ;;  %v1844_v46 = vld [vmem:[#allocation3 + $0xa9] ss:$2 sm:$0xff] }
 0x2a0   : > { %2599 = vmatmul.bf16.gmra.mxu2 %v2206_v12  ;;  %2795 = vmatmul.bf16.gmra.mxu0 %v2206_v12  ;;  %v1830_v12 = vld [vmem:[#allocation3 + $0x39] ss:$2 sm:$0xff] }
 0x2a1   : > { %2648 = vmatmul.bf16.gmra.mxu3 %v2207_v58  ;;  %2844 = vmatmul.bf16.gmra.mxu1 %v2207_v58  ;;  %v1272_v63 = vpop.permute.xlu1 %1271  ;;  %v1488_v58 = vld [vmem:[#allocation3 + $0x80] ss:$2 sm:$0xff] }
 0x2a2   : > { %v1270_v9 = vpop.permute.xlu0 %1269  ;;  %v1307_v25 = vsel %vm1275_vm5, %v1272_v63, %v1274_v19  ;;  %v1860_v19 = vmax.f32 %v1802_v16, %v1834_v56  ;;  %v1490_v63 = vld [vmem:[#allocation3 + $0x90] ss:$2 sm:$0xff]  ;;  %v5751_v1 = vpop.permute.xlu2 %4610 }
 0x2a3   : > { %v1306_v26 = vsel %vm1275_vm5, %v1268_v14, %v1270_v9  ;;  %v1371_v54 = vmax.f32 %v5602_v43, %v1307_v25  ;;  %v4026_v43 = vld [vmem:[%s6470_s2 + $0x160] sm:$0xf]  ;;  %v1520_v9 = vld [vmem:[#allocation3 + $0x81] ss:$2 sm:$0xff]  ;;  %v1812_v56 = vld [vmem:[#allocation3 + $0xa8] ss:$2 sm:$0xff] }
 0x2a4   : > { %v1370_v60 = vmax.f32 %v5474_v10, %v1306_v26  ;;  %v4284_v10 = vld [vmem:[%s6470_s2 + $0x164] sm:$0xf0]  ;;  %v1522_v25 = vld [vmem:[#allocation3 + $0x91] ss:$2 sm:$0xff]  ;;  %v1855_v26 = vmax.f32 %v1792_v17, %v1824_v36 }
 0x2a5   : > { %v1405_v0 = vadd.f32 %v5647_v40, %v1371_v54  ;;  %v4027_v32 = vor.u32 %v4284_v10, %v4026_v43  ;;  %v1543_v43 = vmax.f32 %v1488_v58, %v1520_v9  ;;  %v1544_v10 = vmax.f32 %v1490_v63, %v1522_v25 }
 0x2a6   : > { %v1404_v27 = vadd.f32 %v5647_v40, %v1370_v60  ;;  %v1859_v60 = vmax.f32 %v1800_v13, %v1832_v15  ;;  %v1865_v13 = vmax.f32 %v1812_v56, %v1844_v46 }
 0x2a7   : > { %v1437_v62 = vmax.f32 %v1405_v0, 0.0  ;;  %2675 = vmatpush.bf16.msrb.mxu2 %v4027_v32  ;;  %v1858_v0 = vmax.f32 %v1798_v37, %v1830_v12  ;;  %v4613_v32 = vunpack.i.h.bf16 %v5751_v1  ;;  %v1840_v37 = vld [vmem:[#allocation3 + $0x89] ss:$2 sm:$0xff]  ;;  %v1804_v12 = vld [vmem:[#allocation3 + $0x68] ss:$2 sm:$0xff] }
 0x2a8   : > { %v1436_v49 = vmax.f32 %v1404_v27, 0.0  ;;  %v1856_v27 = vmax.f32 %v1794_v6, %v1826_v24  ;;  %v1838_v6 = vld [vmem:[#allocation3 + $0x79] ss:$2 sm:$0xff] }
 0x2a9   : > { %1470 = vst.msk [vmem:[#allocation3 + $0xf8] sm:$0xff] %vm1438_vm4, %v1437_v62 }
 0x2aa   : > { %1469 = vst.msk [vmem:[#allocation3 + $0xf0] sm:$0xff] %vm1438_vm4, %v1436_v49 }
 0x2b1   : > { %v1740_v44 = vld [vmem:[#allocation3 + $0xe6] ss:$2 sm:$0xff]  ;;  %v1742_v40 = vld [vmem:[#allocation3 + $0xf6] ss:$2 sm:$0xff]  ;;  %v1772_v18 = vld [vmem:[#allocation3 + $0xe7] ss:$2 sm:$0xff] }
 0x2b2   : > { %v1774_v38 = vld [vmem:[#allocation3 + $0xf7] ss:$2 sm:$0xff]  ;;  %v1789_v41 = vmax.f32 %v1740_v44, %v1772_v18  ;;  %v1660_v42 = vld [vmem:[#allocation3 + $0xe4] ss:$2 sm:$0xff]  ;;  %v1662_v45 = vld [vmem:[#allocation3 + $0xf4] ss:$2 sm:$0xff]  ;;  %v4669_v18 = vpack.i.bf16 %v1860_v19, %v1859_v60 }
 0x2b3   : > { %v1790_v47 = vmax.f32 %v1742_v40, %v1774_v38  ;;  %v1692_v48 = vld [vmem:[#allocation3 + $0xe5] ss:$2 sm:$0xff]  ;;  %v1694_v28 = vld [vmem:[#allocation3 + $0xf5] ss:$2 sm:$0xff]  ;;  %v1580_v14 = vld [vmem:[#allocation3 + $0xe2] ss:$2 sm:$0xff] }
 0x2b4   : > { %v1709_v22 = vmax.f32 %v1660_v42, %v1692_v48  ;;  %v1710_v50 = vmax.f32 %v1662_v45, %v1694_v28  ;;  %v1582_v52 = vld [vmem:[#allocation3 + $0xf2] ss:$2 sm:$0xff]  ;;  %v1612_v53 = vld [vmem:[#allocation3 + $0xe3] ss:$2 sm:$0xff]  ;;  %v1614_v57 = vld [vmem:[#allocation3 + $0xf3] ss:$2 sm:$0xff]  ;;  %v4612_v42 = vunpack.i.l.bf16 %v5751_v1  ;;  %v4664_v28 = vpack.i.bf16 %v1858_v0, %v1857_v4 }
 0x2b5   : > { %v4654_v61 = vpack.i.bf16 %v1790_v47, %v1789_v41  ;;  %v1629_v23 = vmax.f32 %v1580_v14, %v1612_v53  ;;  %v1630_v39 = vmax.f32 %v1582_v52, %v1614_v57  ;;  %v4018_v38 = vld [vmem:[%s6470_s2 + $0x150] sm:$0xf]  ;;  %v4282_v41 = vld [vmem:[%s6470_s2 + $0x154] sm:$0xf0]  ;;  %v1814_v52 = vld [vmem:[#allocation3 + $0xb8] ss:$2 sm:$0xff]  ;;  %v4659_v57 = vpack.i.bf16 %v1856_v27, %v1855_v26 }
 0x2b6   : > { %v4649_v29 = vpack.i.bf16 %v1710_v50, %v1709_v22  ;;  %v4019_v48 = vor.u32 %v4282_v41, %v4018_v38  ;;  %v1846_v53 = vld [vmem:[#allocation3 + $0xb9] ss:$2 sm:$0xff]  ;;  %v1822_v60 = vld [vmem:[#allocation3 + $0xf8] ss:$2 sm:$0xff]  ;;  %v1820_v27 = vld [vmem:[#allocation3 + $0xe8] ss:$2 sm:$0xff] }
 0x2b7   : > { %4655 = vrot.lane.b32.xlu2 %v4654_v61, %s4773_s22  ;;  %v4644_v2 = vpack.i.bf16 %v1630_v39, %v1629_v23  ;;  %v1810_v61 = vld [vmem:[#allocation3 + $0x98] ss:$2 sm:$0xff]  ;;  %v1842_v23 = vld [vmem:[#allocation3 + $0x99] ss:$2 sm:$0xff]  ;;  %v1866_v24 = vmax.f32 %v1814_v52, %v1846_v53  ;;  %v1816_v38 = vld [vmem:[#allocation3 + $0xc8] ss:$2 sm:$0xff] }
 0x2b8   : > { %4650 = vrot.lane.b32.xlu1 %v4649_v29, %s4774_s29  ;;  %v1806_v39 = vld [vmem:[#allocation3 + $0x78] ss:$2 sm:$0xff]  ;;  %2676 = vmatpush.bf16.msrb.mxu2 %v4019_v48  ;;  %v1808_v29 = vld [vmem:[#allocation3 + $0x88] ss:$2 sm:$0xff]  ;;  %v1864_v11 = vmax.f32 %v1810_v61, %v1842_v23  ;;  %v1848_v41 = vld [vmem:[#allocation3 + $0xc9] ss:$2 sm:$0xff] }
 0x2b9   : > { %4645 = vrot.lane.b32.xlu0 %v4644_v2, %s4775_s8  ;;  %v4601_v54 = vpop.permute.xlu0 %4600  ;;  %v1836_v2 = vld [vmem:[#allocation3 + $0x69] ss:$2 sm:$0xff]  ;;  %v1862_v15 = vmax.f32 %v1806_v39, %v1838_v6  ;;  %v1863_v19 = vmax.f32 %v1808_v29, %v1840_v37  ;;  %v4684_v9 = vpack.i.bf16 %v1866_v24, %v1865_v13  ;;  %v1818_v4 = vld [vmem:[#allocation3 + $0xd8] ss:$2 sm:$0xff]  ;;  %s4778_s8 = smov 112   ;;  %s270_s29 = sand.u32 1, %s4759_s25  }
 0x2ba   : > { %v4603_v30 = vunpack.i.h.bf16 %v4601_v54  ;;  %v4602_v62 = vunpack.i.l.bf16 %v4601_v54  ;;  %v1861_v25 = vmax.f32 %v1804_v12, %v1836_v2  ;;  %v1492_v52 = vld [vmem:[#allocation3 + $0xa0] ss:$2 sm:$0xff]  ;;  %v1494_v53 = vld [vmem:[#allocation3 + $0xb0] ss:$2 sm:$0xff] }
 0x2bb   : > { %v4606_v49 = vpop.permute.xlu1 %4605  ;;  %v4679_v54 = vpack.i.bf16 %v1864_v11, %v1863_v19  ;;  %v4002_v13 = vld [vmem:[%s6470_s2 + $0x130] sm:$0xf] }
 0x2bc   : > { %v4608_v44 = vunpack.i.h.bf16 %v4606_v49  ;;  %v4607_v40 = vunpack.i.l.bf16 %v4606_v49  ;;  %v2135_v45 = vsel %vm1438_vm4, %v1543_v43, %v4602_v62  ;;  %v2136_v47 = vsel %vm1438_vm4, %v1544_v10, %v4603_v30  ;;  %v1850_v49 = vld [vmem:[#allocation3 + $0xd9] ss:$2 sm:$0xff]  ;;  %v4050_v43 = vld [vmem:[%s6470_s2 + $0x190] sm:$0xf]  ;;  %v4290_v10 = vld [vmem:[%s6470_s2 + $0x194] sm:$0xf0] }
 0x2bd   : > { %v2210_v14 = vpack.c.bf16 %v2136_v47, %v2135_v45  ;;  %v4674_v0 = vpack.i.bf16 %v1862_v15, %v1861_v25  ;;  %v1868_v45 = vmax.f32 %v1818_v4, %v1850_v49  ;;  %v1867_v47 = vmax.f32 %v1816_v38, %v1848_v41  ;;  %v4278_v15 = vld [vmem:[%s6470_s2 + $0x134] sm:$0xf0]  ;;  %v4276_v49 = vld [vmem:[%s6470_s2 + $0x124] sm:$0xf0] }
 0x2be   : > { %v2152_v22 = vsel %vm2143_vm6, %v4602_v62, %v4607_v40  ;;  %v2153_v50 = vsel %vm2143_vm6, %v4603_v30, %v4608_v44  ;;  %v1852_v30 = vld [vmem:[#allocation3 + $0xe9] ss:$2 sm:$0xff]  ;;  %v1854_v62 = vld [vmem:[#allocation3 + $0xf9] ss:$2 sm:$0xff]  ;;  %v4051_v44 = vor.u32 %v4290_v10, %v4050_v43  ;;  %v4003_v25 = vor.u32 %v4278_v15, %v4002_v13  ;;  %v1498_v38 = vld [vmem:[#allocation3 + $0xd0] ss:$2 sm:$0xff] }
 0x2bf   : > { %4670 = vrot.lane.b32.xlu2 %v4669_v18, %s4776_s23  ;;  %v2169_v17 = vsel %vm2160_vm7, %v2152_v22, %v4612_v42  ;;  %v2170_v36 = vsel %vm2160_vm7, %v2153_v50, %v4613_v32  ;;  %2604 = vmatmul.bf16.gmra.mxu2 %v2210_v14  ;;  %v1869_v40 = vmax.f32 %v1820_v27, %v1852_v30  ;;  %v4042_v10 = vld [vmem:[%s6470_s2 + $0x180] sm:$0xf]  ;;  %v1528_v41 = vld [vmem:[#allocation3 + $0xc1] ss:$2 sm:$0xff] }
 0x2c0   : > { %4665 = vrot.lane.b32.xlu1 %v4664_v28, %s4776_s23  ;;  %v2211_v16 = vpack.c.bf16 %v2170_v36, %v2169_v17  ;;  %2800 = vmatmul.bf16.gmra.mxu0 %v2210_v14  ;;  %v1870_v18 = vmax.f32 %v1822_v60, %v1854_v62  ;;  %v4010_v28 = vld [vmem:[%s6470_s2 + $0x140] sm:$0xf]  ;;  %v4280_v14 = vld [vmem:[%s6470_s2 + $0x144] sm:$0xf0]  ;;  %v4689_v22 = vpack.i.bf16 %v1868_v45, %v1867_v47 }
 0x2c1   : > { %4660 = vrot.lane.b32.xlu0 %v4659_v57, %s4776_s23  ;;  %2729 = vmatpush.bf16.msrb.mxu3 %v4051_v44  ;;  %v4011_v50 = vor.u32 %v4280_v14, %v4010_v28  ;;  %v1524_v57 = vld [vmem:[#allocation3 + $0xa1] ss:$2 sm:$0xff]  ;;  %v1526_v17 = vld [vmem:[#allocation3 + $0xb1] ss:$2 sm:$0xff] }
 0x2c2   : > { %2653 = vmatmul.bf16.gmra.mxu3 %v2211_v16  ;;  %2849 = vmatmul.bf16.gmra.mxu1 %v2211_v16  ;;  %v4694_v48 = vpack.i.bf16 %v1870_v18, %v1869_v40  ;;  %v5794_v36 = vpop.permute.xlu2 %4625  ;;  %v1545_v56 = vmax.f32 %v1492_v52, %v1524_v57  ;;  %v1546_v46 = vmax.f32 %v1494_v53, %v1526_v17  ;;  %v3994_v62 = vld [vmem:[%s6470_s2 + $0x120] sm:$0xf]  ;;  %v4288_v44 = vld [vmem:[%s6470_s2 + $0x184] sm:$0xf0] }
 0x2c3   : > { %2677 = vmatpush.bf16.msrb.mxu2 %v4011_v50  ;;  %v4628_v37 = vunpack.i.h.bf16 %v5794_v36  ;;  %v4627_v11 = vunpack.i.l.bf16 %v5794_v36  ;;  %v3995_v43 = vor.u32 %v4276_v49, %v3994_v62  ;;  %v4043_v40 = vor.u32 %v4288_v44, %v4042_v10  ;;  %v1496_v18 = vld [vmem:[#allocation3 + $0xc0] ss:$2 sm:$0xff]  ;;  %v1530_v45 = vld [vmem:[#allocation3 + $0xd1] ss:$2 sm:$0xff] }
 0x2c4   : > { %v2585_v58 = vpop.f32.mrf.mxu2  ;;  %v1548_v50 = vmax.f32 %v1498_v38, %v1530_v45  ;;  %v2437_v49 = vunpack.c.h.b16 %v5731_v20  ;;  %v4036_v10 = vld [vmem:[%s6470_s2 + $0x178] sm:$0xf0] }
 0x2c5   : > { %v2634_v63 = vpop.f32.mrf.mxu3  ;;  %2730 = vmatpush.bf16.msrb.mxu3 %v4043_v40  ;;  %v1502_v20 = vld [vmem:[#allocation3 + $0xf0] ss:$2 sm:$0xff] }
 0x2c6   : > { %v5775_v26 = vadd.f32 %v2634_v63, %v2585_v58  ;;  %v2491_v40 = vpack.c.b16 %v2437_v49, %v2437_v49 }
 0x2c7   : > { %4685 = vrot.lane.b32.xlu2 %v4684_v9, %s4776_s23  ;;  %2678 = vmatpush.bf16.msrb.mxu2 %v4003_v25 }
 0x2c8   : > { %4680 = vrot.lane.b32.xlu1 %v4679_v54, %s4776_s23 }
 0x2c9   : > { %4675 = vrot.lane.b32.xlu0 %v4674_v0, %s4776_s23 }
 0x2cb   : > { %2679 = vmatpush.bf16.msrb.mxu2 %v3995_v43  ;;  %v4285_v43 = vld [vmem:[%s6470_s2 + $0x174] sm:$0xf] }
 0x2cc   : > { %v5796_v6 = vpop.f32.mrf.mxu2  ;;  %v4039_v44 = vor.u32 %v4285_v43, %v4036_v10 }
 0x2cd   : > { %v5808_v58 = vpop.f32.mrf.mxu3 }
 0x2d0   : > { %4695 = vrot.lane.b32.xlu1 %v4694_v48, %s4776_s23 }
 0x2d1   : > { %4690 = vrot.lane.b32.xlu0 %v4689_v22, %s4776_s23  ;;  %v1547_v22 = vmax.f32 %v1496_v18, %v1528_v41  ;;  %v2574_v41 = vsel %vm2569_vm8, %v2491_v40, 0 }
 0x2d2   : > { %2924 = vmatpush.bf16.msra.mxu3 %v2574_v41 }
 0x2d4   : > { %v2590_v0 = vpop.f32.mrf.mxu2 }
 0x2d9   : > { %v4616_v61 = vpop.permute.xlu0 %4615 }
 0x2da   : > { %v4618_v23 = vunpack.i.h.bf16 %v4616_v61  ;;  %v4617_v39 = vunpack.i.l.bf16 %v4616_v61 }
 0x2db   : > { %v4621_v16 = vpop.permute.xlu1 %4620 }
 0x2dc   : > { %v4623_v24 = vunpack.i.h.bf16 %v4621_v16  ;;  %v4622_v29 = vunpack.i.l.bf16 %v4621_v16  ;;  %v2137_v12 = vsel %vm1438_vm4, %v1545_v56, %v4617_v39  ;;  %v2138_v2 = vsel %vm1438_vm4, %v1546_v46, %v4618_v23  ;;  %v5834_v53 = vpop.f32.mrf.mxu2 }
 0x2dd   : > { %v2214_v19 = vpack.c.bf16 %v2138_v2, %v2137_v12 }
 0x2de   : > { %v2154_v63 = vsel %vm2143_vm6, %v4617_v39, %v4622_v29  ;;  %v2155_v9 = vsel %vm2143_vm6, %v4618_v23, %v4623_v24  ;;  %v3986_v24 = vld [vmem:[%s6470_s2 + $0x110] sm:$0xf]  ;;  %v4274_v29 = vld [vmem:[%s6470_s2 + $0x114] sm:$0xf0] }
 0x2df   : > { %v2171_v54 = vsel %vm2160_vm7, %v2154_v63, %v4627_v11  ;;  %v2172_v60 = vsel %vm2160_vm7, %v2155_v9, %v4628_v37  ;;  %2609 = vmatmul.bf16.gmra.mxu2 %v2214_v19  ;;  %2805 = vmatmul.bf16.gmra.mxu0 %v2214_v19  ;;  %v3987_v13 = vor.u32 %v4274_v29, %v3986_v24 }
 0x2e0   : > { %v2215_v4 = vpack.c.bf16 %v2172_v60, %v2171_v54  ;;  %v3978_v60 = vld [vmem:[%s6470_s2 + $0x100] sm:$0xf] }
 0x2e1   : > { %2680 = vmatpush.bf16.msrb.mxu2 %v3987_v13 }
 0x2e2   : > { %2658 = vmatmul.bf16.gmra.mxu3 %v2215_v4  ;;  %2854 = vmatmul.bf16.gmra.mxu1 %v2215_v4  ;;  %v5832_v48 = vpop.permute.xlu2 %4640  ;;  %v4272_v4 = vld [vmem:[%s6470_s2 + $0x104] sm:$0xf0] }
 0x2e3   : > { %v4643_v39 = vunpack.i.h.bf16 %v5832_v48  ;;  %v4642_v16 = vunpack.i.l.bf16 %v5832_v48 }
 0x2e5   : > { %v2639_v27 = vpop.f32.mrf.mxu3 }
 0x2e6   : > { %v5818_v30 = vadd.f32 %v2639_v27, %v2590_v0  ;;  %v3979_v0 = vor.u32 %v4272_v4, %v3978_v60  ;;  %v4283_v4 = vld [vmem:[%s6470_s2 + $0x164] sm:$0xf] }
 0x2e8   : > { %2681 = vmatpush.bf16.msrb.mxu2 %v3979_v0  ;;  %v4028_v0 = vld [vmem:[%s6470_s2 + $0x168] sm:$0xf0] }
 0x2e9   : > { %v4031_v43 = vor.u32 %v4283_v4, %v4028_v0  ;;  %v4012_v4 = vld [vmem:[%s6470_s2 + $0x148] sm:$0xf0] }
 0x2ec   : > { %2870 = vmatpush.bf16.msra.mxu2 %v4039_v44 }
 0x2ed   : > { %v5840_v56 = vpop.f32.mrf.mxu3 }
 0x2f0   : > { %2871 = vmatpush.bf16.msra.mxu2 %v4031_v43 }
 0x2f9   : > { %v4631_v47 = vpop.permute.xlu0 %4630 }
 0x2fa   : > { %v4633_v28 = vunpack.i.h.bf16 %v4631_v47  ;;  %v4632_v14 = vunpack.i.l.bf16 %v4631_v47  ;;  %v1500_v47 = vld [vmem:[#allocation3 + $0xe0] ss:$2 sm:$0xff] }
 0x2fb   : > { %v4636_v52 = vpop.permute.xlu1 %4635 }
 0x2fc   : > { %v4638_v57 = vunpack.i.h.bf16 %v4636_v52  ;;  %v4637_v17 = vunpack.i.l.bf16 %v4636_v52  ;;  %v2139_v61 = vsel %vm1438_vm4, %v1547_v22, %v4632_v14  ;;  %v2140_v23 = vsel %vm1438_vm4, %v1548_v50, %v4633_v28 }
 0x2fd   : > { %v2218_v46 = vpack.c.bf16 %v2140_v23, %v2139_v61 }
 0x2fe   : > { %v2156_v12 = vsel %vm2143_vm6, %v4632_v14, %v4637_v17  ;;  %v2157_v2 = vsel %vm2143_vm6, %v4633_v28, %v4638_v57  ;;  %v1532_v28 = vld [vmem:[#allocation3 + $0xe1] ss:$2 sm:$0xff]  ;;  %v1534_v14 = vld [vmem:[#allocation3 + $0xf1] ss:$2 sm:$0xff] }
 0x2ff   : > { %2614 = vmatmul.bf16.gmra.mxu2 %v2218_v46  ;;  %2810 = vmatmul.bf16.gmra.mxu0 %v2218_v46  ;;  %v2173_v15 = vsel %vm2160_vm7, %v2156_v12, %v4642_v16  ;;  %v2174_v19 = vsel %vm2160_vm7, %v2157_v2, %v4643_v39  ;;  %v1549_v46 = vmax.f32 %v1500_v47, %v1532_v28 }
 0x300   : > { %v2219_v63 = vpack.c.bf16 %v2174_v19, %v2173_v15  ;;  %v1550_v24 = vmax.f32 %v1502_v20, %v1534_v14 }
 0x302   : > { %2663 = vmatmul.bf16.gmra.mxu3 %v2219_v63  ;;  %2859 = vmatmul.bf16.gmra.mxu1 %v2219_v63 }
 0x304   : > { %v2595_v9 = vpop.f32.mrf.mxu2 }
 0x305   : > { %v2644_v25 = vpop.f32.mrf.mxu3 }
 0x306   : > { %v5856_v54 = vadd.f32 %v2644_v25, %v2595_v9 }
 0x30c   : > { %v5864_v27 = vpop.f32.mrf.mxu2 }
 0x30d   : > { %v5866_v62 = vpop.f32.mrf.mxu3 }
 0x311   : > { %v4656_v22 = vpop.permute.xlu2 %4655 }
 0x312   : > { %v4658_v29 = vunpack.i.h.bf16 %v4656_v22  ;;  %v4657_v12 = vunpack.i.l.bf16 %v4656_v22  ;;  %v4281_v22 = vld [vmem:[%s6470_s2 + $0x154] sm:$0xf] }
 0x323   : > { %v2600_v18 = vpop.f32.mrf.mxu2 }
 0x324   : > { %v2649_v38 = vpop.f32.mrf.mxu3 }
 0x325   : > { %v5876_v45 = vadd.f32 %v2649_v38, %v2600_v18 }
 0x32a   : > { %v4651_v50 = vpop.permute.xlu1 %4650 }
 0x32b   : > { %v4646_v52 = vpop.permute.xlu0 %4645  ;;  %v4653_v57 = vunpack.i.h.bf16 %v4651_v50  ;;  %v4652_v17 = vunpack.i.l.bf16 %v4651_v50  ;;  %v5892_v38 = vpop.f32.mrf.mxu2 }
 0x32c   : > { %v4648_v61 = vunpack.i.h.bf16 %v4646_v52  ;;  %v4647_v23 = vunpack.i.l.bf16 %v4646_v52  ;;  %v5900_v20 = vpop.f32.mrf.mxu3 }
 0x32e   : > { %v2141_v2 = vsel %vm1438_vm4, %v1549_v46, %v4647_v23  ;;  %v2142_v13 = vsel %vm1438_vm4, %v1550_v24, %v4648_v61  ;;  %v2158_v15 = vsel %vm2143_vm6, %v4647_v23, %v4652_v17  ;;  %v2159_v19 = vsel %vm2143_vm6, %v4648_v61, %v4653_v57 }
 0x32f   : > { %v2222_v63 = vpack.c.bf16 %v2142_v13, %v2141_v2  ;;  %v2175_v9 = vsel %vm2160_vm7, %v2158_v15, %v4657_v12  ;;  %v2176_v25 = vsel %vm2160_vm7, %v2159_v19, %v4658_v29  ;;  %v4289_v15 = vld [vmem:[%s6470_s2 + $0x194] sm:$0xf]  ;;  %v4052_v19 = vld [vmem:[%s6470_s2 + $0x198] sm:$0xf0] }
 0x330   : > { %v2223_v60 = vpack.c.bf16 %v2176_v25, %v2175_v9 }
 0x331   : > { %2619 = vmatmul.bf16.gmra.mxu2 %v2222_v63  ;;  %2815 = vmatmul.bf16.gmra.mxu0 %v2222_v63  ;;  %v4055_v63 = vor.u32 %v4289_v15, %v4052_v19  ;;  %v4275_v15 = vld [vmem:[%s6470_s2 + $0x124] sm:$0xf]  ;;  %v3996_v19 = vld [vmem:[%s6470_s2 + $0x128] sm:$0xf0] }
 0x332   : > { %2668 = vmatmul.bf16.gmra.mxu3 %v2223_v60  ;;  %2864 = vmatmul.bf16.gmra.mxu1 %v2223_v60  ;;  %v4666_v49 = vpop.permute.xlu1 %4665  ;;  %v4279_v60 = vld [vmem:[%s6470_s2 + $0x144] sm:$0xf]  ;;  %v3999_v8 = vor.u32 %v4275_v15, %v3996_v19 }
 0x333   : > { %v4661_v10 = vpop.permute.xlu0 %4660  ;;  %v4668_v2 = vunpack.i.h.bf16 %v4666_v49  ;;  %v4667_v13 = vunpack.i.l.bf16 %v4666_v49  ;;  %2925 = vmatpush.bf16.msra.mxu3 %v4055_v63  ;;  %v4015_v51 = vor.u32 %v4279_v60, %v4012_v4 }
 0x334   : > { %v4663_v44 = vunpack.i.h.bf16 %v4661_v10  ;;  %v4662_v40 = vunpack.i.l.bf16 %v4661_v10 }
 0x335   : > { %v5943_v25 = vpack.c.bf16 %v4668_v2, %v4667_v13 }
 0x336   : > { %v2178_v41 = vsel %vm2177_vm9, %v4552_v7, %v4662_v40  ;;  %v2179_v47 = vsel %vm2177_vm9, %v4553_v35, %v4663_v44  ;;  %v5904_v14 = vpack.c.bf16 %v4663_v44, %v4662_v40  ;;  %v4020_v7 = vld [vmem:[%s6470_s2 + $0x158] sm:$0xf0] }
 0x337   : > { %v5902_v28 = vpack.c.bf16 %v2179_v47, %v2178_v41  ;;  %v4023_v35 = vor.u32 %v4281_v22, %v4020_v7  ;;  %v4277_v47 = vld [vmem:[%s6470_s2 + $0x134] sm:$0xf]  ;;  %v4004_v22 = vld [vmem:[%s6470_s2 + $0x138] sm:$0xf0] }
 0x339   : > { %2872 = vmatpush.bf16.msra.mxu2 %v4023_v35 }
 0x33a   : > { %v5890_v18 = vpop.permute.xlu1 %4680 }
 0x33b   : > { %v4676_v7 = vpop.permute.xlu0 %4675 }
 0x33d   : > { %2873 = vmatpush.bf16.msra.mxu2 %v4015_v51 }
 0x341   : > { %2682 = vmatmul.bf16.vlgmr.msrb.gmra.mxu2 %v5902_v28 }
 0x342   : > { %4056 = vmatmul.msk.bf16.vlgmr.msrb.gmra.mxu3 %vm2544_vm10, %v5904_v14  ;;  %v5915_v33 = vpop.permute.xlu1 %4695  ;;  %v2605_v57 = vpop.f32.mrf.mxu2 }
 0x343   : > { %v4698_v50 = vunpack.i.h.bf16 %v5915_v33  ;;  %v4697_v52 = vunpack.i.l.bf16 %v5915_v33 }
 0x345   : > { %v2654_v17 = vpop.f32.mrf.mxu3  ;;  %v2192_v61 = vsel %vm2177_vm9, %v4657_v12, %v4697_v52  ;;  %v2193_v23 = vsel %vm2177_vm9, %v4658_v29, %v4698_v50  ;;  %v2180_v12 = vsel %vm2177_vm9, %v4567_v59, %v4667_v13  ;;  %v2181_v29 = vsel %vm2177_vm9, %v4568_v34, %v4668_v2  ;;  %v4671_v34 = vpop.permute.xlu2 %4670 }
 0x346   : > { %v5925_v46 = vadd.f32 %v2654_v17, %v2605_v57  ;;  %v5927_v24 = vpack.c.bf16 %v2193_v23, %v2192_v61  ;;  %v5941_v9 = vpack.c.bf16 %v2181_v29, %v2180_v12  ;;  %v4673_v59 = vunpack.i.h.bf16 %v4671_v34 }
 0x347   : > { %v4672_v0 = vunpack.i.l.bf16 %v4671_v34  ;;  %v4678_v57 = vunpack.i.h.bf16 %v4676_v7  ;;  %v4677_v17 = vunpack.i.l.bf16 %v4676_v7  ;;  %v4683_v12 = vunpack.i.h.bf16 %v5890_v18 }
 0x348   : > { %v2183_v44 = vsel %vm2177_vm9, %v4583_v31, %v4673_v59  ;;  %v4682_v29 = vunpack.i.l.bf16 %v5890_v18  ;;  %v4273_v18 = vld [vmem:[%s6470_s2 + $0x114] sm:$0xf]  ;;  %v6071_v48 = vpack.c.bf16 %v4698_v50, %v4697_v52 }
 0x349   : > { %v2182_v10 = vsel %vm2177_vm9, %v4582_v5, %v4672_v0  ;;  %v5966_v41 = vpack.c.bf16 %v4673_v59, %v4672_v0  ;;  %v4007_v5 = vor.u32 %v4277_v47, %v4004_v22  ;;  %v2184_v61 = vsel %vm2177_vm9, %v4597_v55, %v4677_v17  ;;  %v4044_v55 = vld [vmem:[%s6470_s2 + $0x188] sm:$0xf0] }
 0x34a   : > { %v5954_v49 = vpop.f32.mrf.mxu2  ;;  %v5964_v40 = vpack.c.bf16 %v2183_v44, %v2182_v10  ;;  %v2185_v23 = vsel %vm2177_vm9, %v4598_v3, %v4678_v57  ;;  %v5987_v13 = vpack.c.bf16 %v4678_v57, %v4677_v17  ;;  %v4287_v3 = vld [vmem:[%s6470_s2 + $0x184] sm:$0xf]  ;;  %v2186_v4 = vsel %vm2177_vm9, %v4612_v42, %v4682_v29  ;;  %v3988_v42 = vld [vmem:[%s6470_s2 + $0x118] sm:$0xf0] }
 0x34b   : > { %2874 = vmatpush.bf16.msra.mxu2 %v4007_v5  ;;  %v5985_v2 = vpack.c.bf16 %v2185_v23, %v2184_v61  ;;  %v4047_v63 = vor.u32 %v4287_v3, %v4044_v55  ;;  %v2187_v51 = vsel %vm2177_vm9, %v4613_v32, %v4683_v12  ;;  %v6018_v0 = vpack.c.bf16 %v4683_v12, %v4682_v29  ;;  %v4271_v17 = vld [vmem:[%s6470_s2 + $0x104] sm:$0xf]  ;;  %v3980_v61 = vld [vmem:[%s6470_s2 + $0x108] sm:$0xf0] }
 0x34c   : > { %v6016_v59 = vpack.c.bf16 %v2187_v51, %v2186_v4  ;;  %v3991_v1 = vor.u32 %v4273_v18, %v3988_v42  ;;  %v3983_v36 = vor.u32 %v4271_v17, %v3980_v61  ;;  %v2637_v42 = vadd.f32 %v5808_v58, %v5796_v6 }
 0x34d   : > { %v5956_v43 = vpop.f32.mrf.mxu3  ;;  %2926 = vmatpush.bf16.msra.mxu3 %v4047_v63  ;;  %v4686_v10 = vpop.permute.xlu2 %4685  ;;  %v2642_v6 = vadd.f32 %v5840_v56, %v5834_v53  ;;  %v2647_v53 = vadd.f32 %v5866_v62, %v5864_v27  ;;  %v2652_v27 = vadd.f32 %v5900_v20, %v5892_v38 }
 0x34e   : > { %v4688_v22 = vunpack.i.h.bf16 %v4686_v10  ;;  %v2657_v38 = vadd.f32 %v5956_v43, %v5954_v49 }
 0x34f   : > { %2875 = vmatpush.bf16.msra.mxu2 %v3999_v8 }
 0x351   : > { %2687 = vmatmul.bf16.gmra.mxu2 %v5941_v9 }
 0x352   : > { %4057 = vmatmul.msk.bf16.gmra.mxu3 %vm2544_vm10, %v5943_v25 }
 0x353   : > { %2876 = vmatpush.bf16.msra.mxu2 %v3991_v1 }
 0x357   : > { %2877 = vmatpush.bf16.msra.mxu2 %v3983_v36 }
 0x361   : > { %2692 = vmatmul.bf16.gmra.mxu2 %v5964_v40 }
 0x362   : > { %4058 = vmatmul.msk.bf16.gmra.mxu3 %vm2544_vm10, %v5966_v41  ;;  %v2610_v21 = vpop.f32.mrf.mxu2 }
 0x365   : > { %v2659_v31 = vpop.f32.mrf.mxu3 }
 0x366   : > { %v5977_v35 = vadd.f32 %v2659_v31, %v2610_v21  ;;  %v4687_v21 = vunpack.i.l.bf16 %v4686_v10  ;;  %v2189_v31 = vsel %vm2177_vm9, %v4628_v37, %v4688_v22  ;;  %v4691_v37 = vpop.permute.xlu0 %4690 }
 0x367   : > { %v4692_v23 = vunpack.i.l.bf16 %v4691_v37 }
 0x368   : > { %v2188_v5 = vsel %vm2177_vm9, %v4627_v11, %v4687_v21  ;;  %v6039_v57 = vpack.c.bf16 %v4688_v22, %v4687_v21  ;;  %v4693_v11 = vunpack.i.h.bf16 %v4691_v37 }
 0x369   : > { %v6037_v7 = vpack.c.bf16 %v2189_v31, %v2188_v5  ;;  %v2190_v15 = vsel %vm2177_vm9, %v4642_v16, %v4692_v23 }
 0x36a   : > { %v6006_v60 = vpop.f32.mrf.mxu2  ;;  %v2191_v19 = vsel %vm2177_vm9, %v4643_v39, %v4693_v11  ;;  %v6058_v3 = vpack.c.bf16 %v4693_v11, %v4692_v23 }
 0x36b   : > { %v6056_v8 = vpack.c.bf16 %v2191_v19, %v2190_v15 }
 0x36d   : > { %v6014_v34 = vpop.f32.mrf.mxu3 }
 0x36e   : > { %v2662_v49 = vadd.f32 %v6014_v34, %v6006_v60  ;;  %v2781_v34 = vpop.f32.mrf.mxu0 }
 0x371   : > { %2697 = vmatmul.bf16.gmra.mxu2 %v5985_v2 }
 0x372   : > { %4059 = vmatmul.msk.bf16.gmra.mxu3 %vm2544_vm10, %v5987_v13 }
 0x381   : > { %2702 = vmatmul.bf16.gmra.mxu2 %v6016_v59 }
 0x382   : > { %4060 = vmatmul.msk.bf16.gmra.mxu3 %vm2544_vm10, %v6018_v0  ;;  %v2615_v32 = vpop.f32.mrf.mxu2 }
 0x385   : > { %v2664_v44 = vpop.f32.mrf.mxu3 }
 0x386   : > { %v6029_v47 = vadd.f32 %v2664_v44, %v2615_v32 }
 0x38a   : > { %v6063_v55 = vpop.f32.mrf.mxu2 }
 0x38d   : > { %v6065_v63 = vpop.f32.mrf.mxu3 }
 0x38e   : > { %v2667_v60 = vadd.f32 %v6065_v63, %v6063_v55  ;;  %v2783_v55 = vpop.f32.mrf.mxu0 }
 0x391   : > { %2707 = vmatmul.bf16.gmra.mxu2 %v6037_v7 }
 0x392   : > { %4061 = vmatmul.msk.bf16.gmra.mxu3 %vm2544_vm10, %v6039_v57 }
 0x3a1   : > { %2712 = vmatmul.bf16.gmra.mxu2 %v6056_v8 }
 0x3a2   : > { %4062 = vmatmul.msk.bf16.gmra.mxu3 %vm2544_vm10, %v6058_v3 }
 0x3b1   : > { %2717 = vmatmul.bf16.gmra.mxu2 %v5927_v24 }
 0x3b2   : > { %4063 = vmatmul.msk.bf16.gmra.mxu3 %vm2544_vm10, %v6071_v48 }
 0x3b4   : > { %v2620_v39 = vpop.f32.mrf.mxu2 }
 0x3b5   : > { %v2669_v16 = vpop.f32.mrf.mxu3 }
 0x3b6   : > { %v6076_v12 = vadd.f32 %v2669_v16, %v2620_v39 }
 0x3bc   : > { %v2622_v29 = vpop.f32.mrf.mxu2 }
 0x3bd   : > { %v2671_v4 = vpop.f32.mrf.mxu3 }
 0x3be   : > { %v6078_v51 = vadd.f32 %v2671_v4, %v2622_v29 }
 0x3c1   : > { %2878 = vmatmul.bf16.vlgmr.msra.gmra.mxu2 %v5902_v28 }
 0x3c2   : > { %4064 = vmatmul.msk.bf16.vlgmr.msra.gmra.mxu3 %vm2544_vm10, %v5904_v14 }
 0x3c4   : > { %v2683_v33 = vpop.f32.mrf.mxu2 }
 0x3c5   : > { %v2684_v50 = vadd.f32 %v2683_v33, %v5775_v26  ;;  %v2732_v52 = vpop.f32.mrf.mxu3 }
 0x3c7   : > { %v6084_v18 = vadd.f32 %v2732_v52, %v2684_v50 }
 0x3c9   : > { %3000 = vrot.lane.b32.xlu2 %v6084_v18, %s4777_s15 }
 0x3cc   : > { %v2685_v1 = vpop.f32.mrf.mxu2 }
 0x3cd   : > { %v2686_v32 = vadd.f32 %v2685_v1, %v2637_v42  ;;  %v2734_v10 = vpop.f32.mrf.mxu3 }
 0x3cf   : > { %v6090_v28 = vadd.f32 %v2734_v10, %v2686_v32 }
 0x3d1   : > { %2883 = vmatmul.bf16.gmra.mxu2 %v5941_v9  ;;  %3004 = vrot.lane.b32.xlu1 %v6090_v28, %s4777_s15 }
 0x3d2   : > { %4065 = vmatmul.msk.bf16.gmra.mxu3 %vm2544_vm10, %v5943_v25 }
 0x3d4   : > { %v2688_v26 = vpop.f32.mrf.mxu2 }
 0x3d5   : > { %v2689_v14 = vadd.f32 %v2688_v26, %v5818_v30  ;;  %v2737_v44 = vpop.f32.mrf.mxu3 }
 0x3d7   : > { %v6098_v22 = vadd.f32 %v2737_v44, %v2689_v14  ;;  %v2830_v14 = vpop.f32.mrf.mxu1 }
 0x3d9   : > { %3008 = vrot.lane.b32.xlu0 %v6098_v22, %s4777_s15 }
 0x3dc   : > { %v2690_v58 = vpop.f32.mrf.mxu2 }
 0x3dd   : > { %v2691_v9 = vadd.f32 %v2690_v58, %v2642_v6  ;;  %v2739_v21 = vpop.f32.mrf.mxu3 }
 0x3df   : > { %v6104_v5 = vadd.f32 %v2739_v21, %v2691_v9  ;;  %v2832_v6 = vpop.f32.mrf.mxu1 }
 0x3e1   : > { %2888 = vmatmul.bf16.gmra.mxu2 %v5964_v40  ;;  %3012 = vrot.lane.b32.xlu2 %v6104_v5, %s4777_s15 }
 0x3e2   : > { %4066 = vmatmul.msk.bf16.gmra.mxu3 %vm2544_vm10, %v5966_v41 }
 0x3e4   : > { %v2693_v30 = vpop.f32.mrf.mxu2 }
 0x3e5   : > { %v2694_v25 = vadd.f32 %v2693_v30, %v5856_v54  ;;  %v2742_v31 = vpop.f32.mrf.mxu3  ;;  %v2786_v30 = vpop.f32.mrf.mxu0 }
 0x3e7   : > { %v6112_v17 = vadd.f32 %v2742_v31, %v2694_v25  ;;  %v2835_v25 = vpop.f32.mrf.mxu1 }
 0x3e9   : > { %3016 = vrot.lane.b32.xlu1 %v6112_v17, %s4777_s15 }
 0x3ec   : > { %v2695_v56 = vpop.f32.mrf.mxu2 }
 0x3ed   : > { %v2696_v40 = vadd.f32 %v2695_v56, %v2647_v53  ;;  %v2744_v61 = vpop.f32.mrf.mxu3 }
 0x3ef   : > { %v6118_v36 = vadd.f32 %v2744_v61, %v2696_v40  ;;  %v2788_v40 = vpop.f32.mrf.mxu0  ;;  %v2833_v61 = vadd.f32 %v2832_v6, %v2783_v55 }
 0x3f1   : > { %2893 = vmatmul.bf16.gmra.mxu2 %v5985_v2  ;;  %3020 = vrot.lane.b32.xlu0 %v6118_v36, %s4777_s15 }
 0x3f2   : > { %4067 = vmatmul.msk.bf16.gmra.mxu3 %vm2544_vm10, %v5987_v13 }
 0x3f4   : > { %v2698_v54 = vpop.f32.mrf.mxu2 }
 0x3f5   : > { %v2699_v41 = vadd.f32 %v2698_v54, %v5876_v45  ;;  %v2747_v37 = vpop.f32.mrf.mxu3  ;;  %v2837_v54 = vpop.f32.mrf.mxu1 }
 0x3f7   : > { %v6126_v11 = vadd.f32 %v2747_v37, %v2699_v41 }
 0x3f9   : > { %3024 = vrot.lane.b32.xlu2 %v6126_v11, %s4777_s15 }
 0x3fc   : > { %v2700_v62 = vpop.f32.mrf.mxu2 }
 0x3fd   : > { %v2701_v2 = vadd.f32 %v2700_v62, %v2652_v27  ;;  %v2749_v23 = vpop.f32.mrf.mxu3 }
 0x3ff   : > { %v6132_v15 = vadd.f32 %v2749_v23, %v2701_v2  ;;  %v2836_v2 = vadd.f32 %v2835_v25, %v2786_v30  ;;  %v2840_v23 = vpop.f32.mrf.mxu1 }
 0x401   : > { %2898 = vmatmul.bf16.gmra.mxu2 %v6016_v59  ;;  %3028 = vrot.lane.b32.xlu1 %v6132_v15, %s4777_s15 }
 0x402   : > { %4068 = vmatmul.msk.bf16.gmra.mxu3 %vm2544_vm10, %v6018_v0 }
 0x404   : > { %v2703_v45 = vpop.f32.mrf.mxu2 }
 0x405   : > { %v2704_v13 = vadd.f32 %v2703_v45, %v5925_v46  ;;  %v2752_v19 = vpop.f32.mrf.mxu3 }
 0x407   : > { %v6140_v39 = vadd.f32 %v2752_v19, %v2704_v13 }
 0x409   : > { %3032 = vrot.lane.b32.xlu0 %v6140_v39, %s4777_s15 }
 0x40c   : > { %v2705_v20 = vpop.f32.mrf.mxu2 }
 0x40d   : > { %v2706_v59 = vadd.f32 %v2705_v20, %v2657_v38  ;;  %v2754_v16 = vpop.f32.mrf.mxu3  ;;  %v2838_v20 = vadd.f32 %v2837_v54, %v2788_v40 }
 0x40f   : > { %v6146_v29 = vadd.f32 %v2754_v16, %v2706_v59 }
 0x411   : > { %2903 = vmatmul.bf16.gmra.mxu2 %v6037_v7  ;;  %3036 = vrot.lane.b32.xlu2 %v6146_v29, %s4777_s15 }
 0x412   : > { %4069 = vmatmul.msk.bf16.gmra.mxu3 %vm2544_vm10, %v6039_v57 }
 0x414   : > { %v2708_v46 = vpop.f32.mrf.mxu2 }
 0x415   : > { %v2709_v0 = vadd.f32 %v2708_v46, %v5977_v35  ;;  %v2757_v4 = vpop.f32.mrf.mxu3 }
 0x417   : > { %v6154_v33 = vadd.f32 %v2757_v4, %v2709_v0  ;;  %v2842_v4 = vpop.f32.mrf.mxu1 }
 0x419   : > { %3040 = vrot.lane.b32.xlu1 %v6154_v33, %s4777_s15 }
 0x41c   : > { %v2710_v43 = vpop.f32.mrf.mxu2 }
 0x41d   : > { %v2711_v7 = vadd.f32 %v2710_v43, %v2662_v49  ;;  %v2759_v50 = vpop.f32.mrf.mxu3 }
 0x41f   : > { %v6160_v52 = vadd.f32 %v2759_v50, %v2711_v7 }
 0x421   : > { %2908 = vmatmul.bf16.gmra.mxu2 %v6056_v8  ;;  %3044 = vrot.lane.b32.xlu0 %v6160_v52, %s4777_s15 }
 0x422   : > { %4070 = vmatmul.msk.bf16.gmra.mxu3 %vm2544_vm10, %v6058_v3 }
 0x423   : > { %v6197_v54 = vpop.permute.xlu2 %3000 }
 0x424   : > { %v2713_v35 = vpop.f32.mrf.mxu2 }
 0x425   : > { %v2714_v57 = vadd.f32 %v2713_v35, %v6029_v47  ;;  %v2762_v42 = vpop.f32.mrf.mxu3 }
 0x427   : > { %v6168_v1 = vadd.f32 %v2762_v42, %v2714_v57  ;;  %v2845_v42 = vpop.f32.mrf.mxu1 }
 0x429   : > { %3048 = vrot.lane.b32.xlu2 %v6168_v1, %s4777_s15 }
 0x42c   : > { %v2715_v8 = vpop.f32.mrf.mxu2 }
 0x42d   : > { %v2716_v32 = vadd.f32 %v2715_v8, %v2667_v60  ;;  %v2764_v10 = vpop.f32.mrf.mxu3 }
 0x42f   : > { %v6174_v26 = vadd.f32 %v2764_v10, %v2716_v32 }
 0x431   : > { %2913 = vmatmul.bf16.gmra.mxu2 %v5927_v24  ;;  %3052 = vrot.lane.b32.xlu1 %v6174_v26, %s4777_s15 }
 0x432   : > { %4071 = vmatmul.msk.bf16.gmra.mxu3 %vm2544_vm10, %v6071_v48  ;;  %v2831_v48 = vadd.f32 %v2830_v14, %v2781_v34 }
 0x434   : > { %v2718_v47 = vpop.f32.mrf.mxu2 }
 0x435   : > { %v2719_v3 = vadd.f32 %v2718_v47, %v6076_v12  ;;  %v2767_v44 = vpop.f32.mrf.mxu3 }
 0x437   : > { %v6182_v63 = vadd.f32 %v2767_v44, %v2719_v3  ;;  %v2847_v3 = vpop.f32.mrf.mxu1 }
 0x439   : > { %3056 = vrot.lane.b32.xlu0 %v6182_v63, %s4777_s15 }
 0x43c   : > { %v2720_v58 = vpop.f32.mrf.mxu2 }
 0x43d   : > { %v2721_v24 = vadd.f32 %v2720_v58, %v6078_v51  ;;  %v2769_v9 = vpop.f32.mrf.mxu3  ;;  %v2791_v51 = vpop.f32.mrf.mxu0 }
 0x43e   : > { %v2841_v43 = vadd.f32 %v2840_v23, %v2791_v51 }
 0x43f   : > { %v6187_v21 = vadd.f32 %v2769_v9, %v2721_v24  ;;  %v2850_v30 = vpop.f32.mrf.mxu1 }
 0x444   : > { %v2879_v31 = vpop.f32.mrf.mxu2 }
 0x445   : > { %v2880_v53 = vadd.f32 %v2879_v31, %v2831_v48  ;;  %v2928_v12 = vpop.f32.mrf.mxu3  ;;  %v2793_v59 = vpop.f32.mrf.mxu0 }
 0x446   : > { %v2843_v34 = vadd.f32 %v2842_v4, %v2793_v59 }
 0x447   : > { %v2929_v56 = vadd.f32 %v2928_v12, %v2880_v53  ;;  %v2852_v40 = vpop.f32.mrf.mxu1 }
 0x449   : > { %3002 = vrot.lane.b32.xlu0 %v2929_v56, %s4777_s15 }
 0x44c   : > { %v2881_v41 = vpop.f32.mrf.mxu2 }
 0x44d   : > { %v2882_v37 = vadd.f32 %v2881_v41, %v2833_v61  ;;  %v2930_v27 = vpop.f32.mrf.mxu3  ;;  %v2796_v7 = vpop.f32.mrf.mxu0 }
 0x44e   : > { %v2846_v44 = vadd.f32 %v2845_v42, %v2796_v7 }
 0x44f   : > { %v2931_v62 = vadd.f32 %v2930_v27, %v2882_v37 }
 0x451   : > { %3006 = vrot.lane.b32.xlu2 %v2931_v62, %s4777_s15 }
 0x454   : > { %v2884_v45 = vpop.f32.mrf.mxu2 }
 0x455   : > { %v2885_v13 = vadd.f32 %v2884_v45, %v2836_v2  ;;  %v2933_v19 = vpop.f32.mrf.mxu3  ;;  %v2798_v14 = vpop.f32.mrf.mxu0 }
 0x456   : > { %v2848_v25 = vadd.f32 %v2847_v3, %v2798_v14  ;;  %v2855_v2 = vpop.f32.mrf.mxu1  ;;  %v6200_v45 = vpop.permute.xlu2 %3012 }
 0x457   : > { %v2934_v38 = vadd.f32 %v2933_v19, %v2885_v13 }
 0x459   : > { %3010 = vrot.lane.b32.xlu1 %v2934_v38, %s4777_s15 }
 0x45c   : > { %v2886_v16 = vpop.f32.mrf.mxu2 }
 0x45d   : > { %v2887_v46 = vadd.f32 %v2886_v16, %v2838_v20  ;;  %v2935_v0 = vpop.f32.mrf.mxu3  ;;  %v2801_v24 = vpop.f32.mrf.mxu0 }
 0x45e   : > { %v2851_v61 = vadd.f32 %v2850_v30, %v2801_v24  ;;  %v2857_v4 = vpop.f32.mrf.mxu1 }
 0x45f   : > { %v2936_v49 = vadd.f32 %v2935_v0, %v2887_v46  ;;  %v6203_v46 = vpop.permute.xlu0 %3008  ;;  %v6205_v0 = vpop.permute.xlu2 %3024 }
 0x461   : > { %3014 = vrot.lane.b32.xlu0 %v2936_v49, %s4777_s15 }
 0x464   : > { %v2889_v50 = vpop.f32.mrf.mxu2 }
 0x465   : > { %v2890_v35 = vadd.f32 %v2889_v50, %v2841_v43  ;;  %v2938_v57 = vpop.f32.mrf.mxu3  ;;  %v2803_v56 = vpop.f32.mrf.mxu0 }
 0x466   : > { %v2853_v23 = vadd.f32 %v2852_v40, %v2803_v56 }
 0x467   : > { %v2939_v60 = vadd.f32 %v2938_v57, %v2890_v35  ;;  %v6208_v42 = vpop.permute.xlu0 %3020 }
 0x469   : > { %3018 = vrot.lane.b32.xlu2 %v2939_v60, %s4777_s15 }
 0x46b   : > { %v6210_v60 = vpop.permute.xlu2 %3036 }
 0x46c   : > { %v2891_v8 = vpop.f32.mrf.mxu2 }
 0x46d   : > { %v2892_v32 = vadd.f32 %v2891_v8, %v2843_v34  ;;  %v2940_v10 = vpop.f32.mrf.mxu3  ;;  %v2806_v51 = vpop.f32.mrf.mxu0 }
 0x46e   : > { %v2856_v16 = vadd.f32 %v2855_v2, %v2806_v51  ;;  %v2860_v34 = vpop.f32.mrf.mxu1 }
 0x46f   : > { %v2941_v47 = vadd.f32 %v2940_v10, %v2892_v32 }
 0x471   : > { %3022 = vrot.lane.b32.xlu1 %v2941_v47, %s4777_s15  ;;  %v3005_v47 = vpop.permute.xlu1 %3004 }
 0x474   : > { %v2894_v55 = vpop.f32.mrf.mxu2 }
 0x475   : > { %v2895_v6 = vadd.f32 %v2894_v55, %v2846_v44  ;;  %v2943_v58 = vpop.f32.mrf.mxu3  ;;  %v2808_v59 = vpop.f32.mrf.mxu0 }
 0x476   : > { %v2858_v57 = vadd.f32 %v2857_v4, %v2808_v59  ;;  %v2862_v30 = vpop.f32.mrf.mxu1 }
 0x477   : > { %v2944_v9 = vadd.f32 %v2943_v58, %v2895_v6 }
 0x479   : > { %3026 = vrot.lane.b32.xlu0 %v2944_v9, %s4777_s15 }
 0x47b   : > { %v6213_v44 = vpop.permute.xlu0 %3032 }
 0x47c   : > { %v2896_v48 = vpop.f32.mrf.mxu2 }
 0x47d   : > { %v2897_v31 = vadd.f32 %v2896_v48, %v2848_v25  ;;  %v2945_v53 = vpop.f32.mrf.mxu3  ;;  %v2811_v35 = vpop.f32.mrf.mxu0 }
 0x47e   : > { %v2861_v3 = vadd.f32 %v2860_v34, %v2811_v35  ;;  %v3017_v48 = vpop.permute.xlu1 %3016  ;;  %v2865_v51 = vpop.f32.mrf.mxu1 }
 0x47f   : > { %v2946_v12 = vadd.f32 %v2945_v53, %v2897_v31 }
 0x481   : > { %3030 = vrot.lane.b32.xlu2 %v2946_v12, %s4777_s15  ;;  %v6223_v12 = vld [vmem:[%s6474_s6 + $0x1] ss:$0 sm:$0xff] }
 0x483   : > { %v6215_v55 = vpop.permute.xlu2 %3048 }
 0x484   : > { %v2899_v41 = vpop.f32.mrf.mxu2 }
 0x485   : > { %v2900_v37 = vadd.f32 %v2899_v41, %v2851_v61  ;;  %v2948_v27 = vpop.f32.mrf.mxu3  ;;  %v2813_v9 = vpop.f32.mrf.mxu0 }
 0x486   : > { %v2863_v31 = vadd.f32 %v2862_v30, %v2813_v9 }
 0x487   : > { %v2949_v62 = vadd.f32 %v2948_v27, %v2900_v37 }
 0x489   : > { %3034 = vrot.lane.b32.xlu1 %v2949_v62, %s4777_s15 }
 0x48c   : > { %v2901_v13 = vpop.f32.mrf.mxu2 }
 0x48d   : > { %v2902_v19 = vadd.f32 %v2901_v13, %v2853_v23  ;;  %v2950_v38 = vpop.f32.mrf.mxu3  ;;  %v2816_v62 = vpop.f32.mrf.mxu0 }
 0x48f   : > { %v2951_v20 = vadd.f32 %v2950_v38, %v2902_v19  ;;  %v2866_v19 = vadd.f32 %v2865_v51, %v2816_v62  ;;  %v3029_v38 = vpop.permute.xlu1 %3028 }
 0x491   : > { %3038 = vrot.lane.b32.xlu0 %v2951_v20, %s4777_s15 }
 0x493   : > { %v6218_v53 = vpop.permute.xlu0 %3044 }
 0x494   : > { %v2904_v49 = vpop.f32.mrf.mxu2 }
 0x495   : > { %v2905_v43 = vadd.f32 %v2904_v49, %v2856_v16  ;;  %v2953_v7 = vpop.f32.mrf.mxu3  ;;  %v2818_v49 = vpop.f32.mrf.mxu0 }
 0x497   : > { %v2954_v50 = vadd.f32 %v2953_v7, %v2905_v43  ;;  %v2867_v43 = vpop.f32.mrf.mxu1 }
 0x498   : > { %v2868_v7 = vadd.f32 %v2867_v43, %v2818_v49 }
 0x499   : > { %3042 = vrot.lane.b32.xlu2 %v2954_v50, %s4777_s15  ;;  %v3041_v50 = vpop.permute.xlu1 %3040 }
 0x49c   : > { %v2906_v8 = vpop.f32.mrf.mxu2 }
 0x49d   : > { %v2907_v32 = vadd.f32 %v2906_v8, %v2858_v57  ;;  %v2955_v10 = vpop.f32.mrf.mxu3 }
 0x49f   : > { %v2956_v14 = vadd.f32 %v2955_v10, %v2907_v32 }
 0x4a1   : > { %3046 = vrot.lane.b32.xlu1 %v2956_v14, %s4777_s15 }
 0x4a4   : > { %v2909_v6 = vpop.f32.mrf.mxu2 }
 0x4a5   : > { %v2910_v58 = vadd.f32 %v2909_v6, %v2861_v3  ;;  %v2958_v24 = vpop.f32.mrf.mxu3  ;;  %v3053_v6 = vpop.permute.xlu1 %3052 }
 0x4a7   : > { %v2959_v25 = vadd.f32 %v2958_v24, %v2910_v58 }
 0x4a9   : > { %3050 = vrot.lane.b32.xlu0 %v2959_v25, %s4777_s15 }
 0x4ab   : > { %v3007_v56 = vpop.permute.xlu2 %3006  ;;  %v6229_v20 = vpop.permute.xlu0 %3056 }
 0x4ac   : > { %v3066_v40 = vsel %vm3064_vm11, %v3005_v47, %v3007_v56  ;;  %v2911_v61 = vpop.f32.mrf.mxu2 }
 0x4ad   : > { %v3098_v41 = vmax.f32 %v6090_v28, %v3066_v40  ;;  %v2912_v37 = vadd.f32 %v2911_v61, %v2863_v31  ;;  %v2960_v27 = vpop.f32.mrf.mxu3 }
 0x4af   : > { %v3116_v2 = vadd.f32 %v6223_v12, %v3098_v41  ;;  %v2961_v23 = vadd.f32 %v2960_v27, %v2912_v37 }
 0x4b1   : > { %v3132_v13 = vmax.f32 %v3116_v2, 0.0  ;;  %3054 = vrot.lane.b32.xlu2 %v2961_v23, %s4777_s15 }
 0x4b3   : > { %3148 = vst.msk [vmem:[#allocation4 + $0x8] sm:$0xff] %vm2177_vm9, %v3132_v13 }
 0x4b4   : > { %v2914_v59 = vpop.f32.mrf.mxu2 }
 0x4b5   : > { %v2915_v16 = vadd.f32 %v2914_v59, %v2866_v19  ;;  %v2963_v4 = vpop.f32.mrf.mxu3 }
 0x4b7   : > { %v2964_v28 = vadd.f32 %v2963_v4, %v2915_v16 }
 0x4b9   : > { %3060 = vrot.lane.b32.xlu2 %v6187_v21, %s4777_s15  ;;  %3058 = vrot.lane.b32.xlu1 %v2964_v28, %s4777_s15 }
 0x4bb   : > { %v3003_v35 = vpop.permute.xlu0 %3002 }
 0x4bc   : > { %v3065_v57 = vsel %vm3064_vm11, %v6197_v54, %v3003_v35  ;;  %v2916_v34 = vpop.f32.mrf.mxu2 }
 0x4bd   : > { %v3097_v8 = vmax.f32 %v6084_v18, %v3065_v57  ;;  %v2917_v32 = vadd.f32 %v2916_v34, %v2868_v7  ;;  %v2965_v10 = vpop.f32.mrf.mxu3 }
 0x4bf   : > { %v3115_v14 = vadd.f32 %v6223_v12, %v3097_v8  ;;  %v2966_v47 = vadd.f32 %v2965_v10, %v2917_v32 }
 0x4c1   : > { %v3131_v3 = vmax.f32 %v3115_v14, 0.0  ;;  %3062 = vrot.lane.b32.xlu0 %v2966_v47, %s4777_s15 }
 0x4c3   : > { %3147 = vst.msk [vmem:[#allocation4] sm:$0xff] %vm2177_vm9, %v3131_v3  ;;  %v3019_v58 = vpop.permute.xlu2 %3018 }
 0x4c4   : > { %v3069_v24 = vsel %vm3064_vm11, %v3017_v48, %v3019_v58 }
 0x4c5   : > { %v3101_v9 = vmax.f32 %v6112_v17, %v3069_v24 }
 0x4c7   : > { %v3119_v54 = vadd.f32 %v6223_v12, %v3101_v9  ;;  %v4306_v9 = vld [vmem:[%s6471_s3 + $0x78] sm:$0xff] }
 0x4c8   : > { %3493 = vmatpush.bf16.msra.mxu1 %v4306_v9 }
 0x4c9   : > { %v3135_v30 = vmax.f32 %v3119_v54, 0.0 }
 0x4cb   : > { %3151 = vst.msk [vmem:[#allocation4 + $0x20] sm:$0xff] %vm2177_vm9, %v3135_v30  ;;  %v3011_v18 = vpop.permute.xlu1 %3010 }
 0x4cc   : > { %v3067_v25 = vsel %vm3064_vm11, %v6203_v46, %v3011_v18 }
 0x4cd   : > { %v3099_v31 = vmax.f32 %v6098_v22, %v3067_v25  ;;  %v4313_v25 = vld [vmem:[%s6471_s3 + $0xb0] sm:$0xff] }
 0x4cf   : > { %v3117_v56 = vadd.f32 %v6223_v12, %v3099_v31  ;;  %v4312_v31 = vld [vmem:[%s6471_s3 + $0xa8] sm:$0xff] }
 0x4d1   : > { %v3133_v40 = vmax.f32 %v3117_v56, 0.0  ;;  %v4296_v56 = vld [vmem:[%s6471_s3 + $0x28] sm:$0xff] }
 0x4d3   : > { %3149 = vst.msk [vmem:[#allocation4 + $0x10] sm:$0xff] %vm2177_vm9, %v3133_v40  ;;  %v3015_v61 = vpop.permute.xlu0 %3014  ;;  %v4304_v40 = vld [vmem:[%s6471_s3 + $0x68] sm:$0xff] }
 0x4d4   : > { %v3068_v17 = vsel %vm3064_vm11, %v6200_v45, %v3015_v61 }
 0x4d5   : > { %v3100_v48 = vmax.f32 %v6104_v5, %v3068_v17 }
 0x4d7   : > { %v3118_v41 = vadd.f32 %v6223_v12, %v3100_v48 }
 0x4d9   : > { %v3134_v37 = vmax.f32 %v3118_v41, 0.0  ;;  %v4311_v41 = vld [vmem:[%s6471_s3 + $0xa0] sm:$0xff] }
 0x4db   : > { %3150 = vst.msk [vmem:[#allocation4 + $0x18] sm:$0xff] %vm2177_vm9, %v3134_v37  ;;  %v3031_v27 = vpop.permute.xlu2 %3030  ;;  %v4295_v37 = vld [vmem:[%s6471_s3 + $0x20] sm:$0xff] }
 0x4dc   : > { %v3072_v46 = vsel %vm3064_vm11, %v3029_v38, %v3031_v27  ;;  %v4303_v27 = vld [vmem:[%s6471_s3 + $0x60] sm:$0xff] }
 0x4dd   : > { %v3104_v22 = vmax.f32 %v6132_v15, %v3072_v46 }
 0x4df   : > { %v3122_v62 = vadd.f32 %v6223_v12, %v3104_v22  ;;  %v4294_v22 = vld [vmem:[%s6471_s3 + $0x18] sm:$0xff] }
 0x4e1   : > { %v3138_v51 = vmax.f32 %v3122_v62, 0.0 }
 0x4e3   : > { %3154 = vst.msk [vmem:[#allocation4 + $0x38] sm:$0xff] %vm2177_vm9, %v3138_v51  ;;  %v3023_v2 = vpop.permute.xlu1 %3022  ;;  %v4302_v51 = vld [vmem:[%s6471_s3 + $0x58] sm:$0xff] }
 0x4e4   : > { %v3070_v45 = vsel %vm3064_vm11, %v6208_v42, %v3023_v2 }
 0x4e5   : > { %v3102_v5 = vmax.f32 %v6118_v36, %v3070_v45 }
 0x4e7   : > { %v3120_v23 = vadd.f32 %v6223_v12, %v3102_v5 }
 0x4e9   : > { %v3136_v13 = vmax.f32 %v3120_v23, 0.0 }
 0x4eb   : > { %3152 = vst.msk [vmem:[#allocation4 + $0x28] sm:$0xff] %vm2177_vm9, %v3136_v13  ;;  %v3027_v19 = vpop.permute.xlu0 %3026  ;;  %v3214_v13 = vld [vmem:[#allocation4 + $0x6] ss:$16 sm:$0x3] }
 0x4ec   : > { %v3071_v15 = vsel %vm3064_vm11, %v6205_v0, %v3027_v19  ;;  %v3222_v19 = vld [vmem:[#allocation4 + $0x7] ss:$16 sm:$0x3] }
 0x4ed   : > { %v3103_v38 = vmax.f32 %v6126_v11, %v3071_v15 }
 0x4ef   : > { %v3121_v59 = vadd.f32 %v6223_v12, %v3103_v38 }
 0x4f1   : > { %v3137_v16 = vmax.f32 %v3121_v59, 0.0 }
 0x4f3   : > { %3153 = vst.msk [vmem:[#allocation4 + $0x30] sm:$0xff] %vm2177_vm9, %v3137_v16  ;;  %v3043_v4 = vpop.permute.xlu2 %3042 }
 0x4f4   : > { %v3075_v42 = vsel %vm3064_vm11, %v3041_v50, %v3043_v4  ;;  %v3180_v4 = vld [vmem:[#allocation4 + $0x2] ss:$16 sm:$0x3] }
 0x4f5   : > { %v3107_v36 = vmax.f32 %v6154_v33, %v3075_v42  ;;  %v4309_v42 = vld [vmem:[%s6471_s3 + $0x90] sm:$0xff] }
 0x4f7   : > { %v3125_v28 = vadd.f32 %v6223_v12, %v3107_v36  ;;  %v4293_v36 = vld [vmem:[%s6471_s3 + $0x10] sm:$0xff] }
 0x4f9   : > { %v3141_v49 = vmax.f32 %v3125_v28, 0.0 }
 0x4fa   : > { %v3215_v62 = vld [vmem:[#allocation4 + $0x6] ss:$16 sm:$0xc]  ;;  %v3223_v5 = vld [vmem:[#allocation4 + $0x7] ss:$16 sm:$0xc] }
 0x4fb   : > { %3157 = vst.msk [vmem:[#allocation4 + $0x50] sm:$0xff] %vm2177_vm9, %v3141_v49  ;;  %v3035_v43 = vpop.permute.xlu1 %3034  ;;  %v3181_v15 = vld [vmem:[#allocation4 + $0x2] ss:$16 sm:$0xc] }
 0x4fc   : > { %v3073_v0 = vsel %vm3064_vm11, %v6213_v44, %v3035_v43  ;;  %v3189_v38 = vld [vmem:[#allocation4 + $0x3] ss:$16 sm:$0xc] }
 0x4fd   : > { %v3105_v11 = vmax.f32 %v6140_v39, %v3073_v0  ;;  %v3188_v49 = vld [vmem:[#allocation4 + $0x3] ss:$16 sm:$0x3]  ;;  %v3216_v0 = vor.u32 %v3215_v62, %v3214_v13 }
 0x4fe   : > { %v4301_v43 = vld [vmem:[%s6471_s3 + $0x50] sm:$0xff] }
 0x4ff   : > { %v3123_v7 = vadd.f32 %v6223_v12, %v3105_v11  ;;  %v3224_v11 = vor.u32 %v3223_v5, %v3222_v19 }
 0x501   : > { %v3139_v35 = vmax.f32 %v3123_v7, 0.0 }
 0x503   : > { %3155 = vst.msk [vmem:[#allocation4 + $0x40] sm:$0xff] %vm2177_vm9, %v3139_v35  ;;  %v3039_v57 = vpop.permute.xlu0 %3038  ;;  %v3198_v35 = vld [vmem:[#allocation4 + $0x4] ss:$16 sm:$0xc] }
 0x504   : > { %v3074_v33 = vsel %vm3064_vm11, %v6210_v60, %v3039_v57  ;;  %v3182_v57 = vor.u32 %v3181_v15, %v3180_v4 }
 0x505   : > { %v3106_v50 = vmax.f32 %v6146_v29, %v3074_v33 }
 0x507   : > { %v3124_v34 = vadd.f32 %v6223_v12, %v3106_v50  ;;  %v3206_v50 = vld [vmem:[#allocation4 + $0x5] ss:$16 sm:$0xc] }
 0x509   : > { %v3140_v8 = vmax.f32 %v3124_v34, 0.0 }
 0x50a   : > { %v3217_v16 = vld [vmem:[#allocation4 + $0x6] ss:$16 sm:$0x30]  ;;  %v3225_v28 = vld [vmem:[#allocation4 + $0x7] ss:$16 sm:$0x30] }
 0x50b   : > { %3156 = vst.msk [vmem:[#allocation4 + $0x48] sm:$0xff] %vm2177_vm9, %v3140_v8  ;;  %v3055_v32 = vpop.permute.xlu2 %3054  ;;  %v3183_v7 = vld [vmem:[#allocation4 + $0x2] ss:$16 sm:$0x30]  ;;  %v3218_v8 = vor.u32 %v3217_v16, %v3216_v0 }
 0x50c   : > { %v3078_v44 = vsel %vm3064_vm11, %v3053_v6, %v3055_v32  ;;  %v4298_v6 = vld [vmem:[%s6471_s3 + $0x38] sm:$0xff]  ;;  %v3191_v33 = vld [vmem:[#allocation4 + $0x3] ss:$16 sm:$0x30]  ;;  %v3226_v32 = vor.u32 %v3225_v28, %v3224_v11 }
 0x50d   : > { %v3110_v39 = vmax.f32 %v6174_v26, %v3078_v44  ;;  %v4314_v26 = vld [vmem:[%s6471_s3 + $0xb8] sm:$0xff]  ;;  %3480 = vmatpush.bf16.msra.mxu0 %v4298_v6  ;;  %v3190_v44 = vor.u32 %v3189_v38, %v3188_v49  ;;  %v4307_v38 = vld [vmem:[%s6471_s3 + $0x80] sm:$0xff] }
 0x50e   : > { %3506 = vmatpush.bf16.msrb.mxu2 %v4314_v26  ;;  %v3240_v26 = vld [vmem:[#allocation4 + $0x9] ss:$16 sm:$0xc]  ;;  %v4299_v16 = vld [vmem:[%s6471_s3 + $0x40] sm:$0xff] }
 0x50f   : > { %v3128_v10 = vadd.f32 %v6223_v12, %v3110_v39  ;;  %v3197_v39 = vld [vmem:[#allocation4 + $0x4] ss:$16 sm:$0x3]  ;;  %v3192_v9 = vor.u32 %v3191_v33, %v3190_v44  ;;  %v3172_v28 = vld [vmem:[#allocation4 + $0x1] ss:$16 sm:$0xc] }
 0x510   : > { %v3163_v49 = vld [vmem:[#allocation4] ss:$16 sm:$0x3]  ;;  %v3174_v0 = vld [vmem:[#allocation4 + $0x1] ss:$16 sm:$0x30] }
 0x511   : > { %v3144_v14 = vmax.f32 %v3128_v10, 0.0  ;;  %v3232_v10 = vld [vmem:[#allocation4 + $0x8] ss:$16 sm:$0xc] }
 0x512   : > { %3507 = vmatpush.bf16.msrb.mxu2 %v4313_v25  ;;  %v3199_v25 = vor.u32 %v3198_v35, %v3197_v39 }
 0x513   : > { %3160 = vst.msk [vmem:[#allocation4 + $0x68] sm:$0xff] %vm2177_vm9, %v3144_v14  ;;  %v3047_v47 = vpop.permute.xlu1 %3046  ;;  %v3061_v2 = vpop.permute.xlu2 %3060  ;;  %v4308_v14 = vld [vmem:[%s6471_s3 + $0x88] sm:$0xff] }
 0x514   : > { %v3076_v60 = vsel %vm3064_vm11, %v6218_v53, %v3047_v47  ;;  %v4315_v53 = vld [vmem:[%s6471_s3 + $0xc0] sm:$0xff]  ;;  %v4300_v47 = vld [vmem:[%s6471_s3 + $0x48] sm:$0xff] }
 0x515   : > { %v3108_v29 = vmax.f32 %v6160_v52, %v3076_v60  ;;  %3526 = vmatpush.bf16.msrb.mxu3 %v4315_v53 }
 0x516   : > { %3508 = vmatpush.bf16.msrb.mxu2 %v4312_v31 }
 0x517   : > { %v3126_v3 = vadd.f32 %v6223_v12, %v3108_v29 }
 0x519   : > { %v3142_v58 = vmax.f32 %v3126_v3, 0.0  ;;  %v3184_v3 = vor.u32 %v3183_v7, %v3182_v57 }
 0x51a   : > { %3509 = vmatpush.bf16.msrb.mxu2 %v4311_v41 }
 0x51b   : > { %3158 = vst.msk [vmem:[#allocation4 + $0x58] sm:$0xff] %vm2177_vm9, %v3142_v58  ;;  %v3051_v24 = vpop.permute.xlu0 %3050  ;;  %v3200_v58 = vld [vmem:[#allocation4 + $0x4] ss:$16 sm:$0x30] }
 0x51c   : > { %v3077_v52 = vsel %vm3064_vm11, %v6215_v55, %v3051_v24  ;;  %v4297_v55 = vld [vmem:[%s6471_s3 + $0x30] sm:$0xff] }
 0x51d   : > { %v3109_v54 = vmax.f32 %v6168_v1, %v3077_v52  ;;  %v4305_v1 = vld [vmem:[%s6471_s3 + $0x70] sm:$0xff]  ;;  %3481 = vmatpush.bf16.msra.mxu0 %v4297_v55 }
 0x51e   : > { %3494 = vmatpush.bf16.msra.mxu1 %v4305_v1  ;;  %v3205_v24 = vld [vmem:[#allocation4 + $0x5] ss:$16 sm:$0x3]  ;;  %v3239_v1 = vld [vmem:[#allocation4 + $0x9] ss:$16 sm:$0x3] }
 0x51f   : > { %v3127_v30 = vadd.f32 %v6223_v12, %v3109_v54  ;;  %v3231_v54 = vld [vmem:[#allocation4 + $0x8] ss:$16 sm:$0x3]  ;;  %v3208_v55 = vld [vmem:[#allocation4 + $0x5] ss:$16 sm:$0x30] }
 0x521   : > { %v3143_v18 = vmax.f32 %v3127_v30, 0.0  ;;  %3482 = vmatpush.bf16.msra.mxu0 %v4296_v56 }
 0x522   : > { %3495 = vmatpush.bf16.msra.mxu1 %v4304_v40  ;;  %v3207_v40 = vor.u32 %v3206_v50, %v3205_v24  ;;  %v3548_v24 = vld [vmem:[%s6472_s4 + $0x38] sm:$0xf] }
 0x523   : > { %3159 = vst.msk [vmem:[#allocation4 + $0x60] sm:$0xff] %vm2177_vm9, %v3143_v18 }
 0x525   : > { %3483 = vmatpush.bf16.msra.mxu0 %v4295_v37  ;;  %v3233_v37 = vor.u32 %v3232_v10, %v3231_v54  ;;  %v4320_v54 = vld [vmem:[%s6472_s4 + $0x20] sm:$0xff] }
 0x526   : > { %3496 = vmatpush.bf16.msra.mxu1 %v4303_v27 }
 0x529   : > { %3484 = vmatpush.bf16.msra.mxu0 %v4294_v22 }
 0x52a   : > { %3497 = vmatpush.bf16.msra.mxu1 %v4302_v51 }
 0x52b   : > { %v3059_v61 = vpop.permute.xlu1 %3058 }
 0x52c   : > { %v3079_v17 = vsel %vm3064_vm11, %v6229_v20, %v3059_v61  ;;  %v3234_v61 = vld [vmem:[#allocation4 + $0x8] ss:$16 sm:$0x30] }
 0x52d   : > { %v3111_v48 = vmax.f32 %v6182_v63, %v3079_v17  ;;  %v4310_v63 = vld [vmem:[%s6471_s3 + $0x98] sm:$0xff]  ;;  %3485 = vmatpush.bf16.msra.mxu0 %v4293_v36  ;;  %v3235_v51 = vor.u32 %v3234_v61, %v3233_v37  ;;  %v3164_v36 = vld [vmem:[#allocation4] ss:$16 sm:$0xc] }
 0x52e   : > { %3510 = vmatpush.bf16.msrb.mxu2 %v4310_v63  ;;  %3498 = vmatpush.bf16.msra.mxu1 %v4301_v43  ;;  %v3242_v17 = vld [vmem:[#allocation4 + $0x9] ss:$16 sm:$0x30]  ;;  %v3241_v63 = vor.u32 %v3240_v26, %v3239_v1  ;;  %v3171_v43 = vld [vmem:[#allocation4 + $0x1] ss:$16 sm:$0x3]  ;;  %v3165_v11 = vor.u32 %v3164_v36, %v3163_v49  ;;  %v3580_v26 = vunpack.c.l.b16 %v3548_v24 }
 0x52f   : > { %v3129_v46 = vadd.f32 %v6223_v12, %v3111_v48  ;;  %v3173_v7 = vor.u32 %v3172_v28, %v3171_v43  ;;  %v4703_v49 = vld [vmem:[%s6474_s6 + $0x4] ss:$0 sm:$0xff] }
 0x531   : > { %v3145_v20 = vmax.f32 %v3129_v46, 0.0  ;;  %v3201_v46 = vor.u32 %v3200_v58, %v3199_v25  ;;  %v3175_v50 = vor.u32 %v3174_v0, %v3173_v7  ;;  %v4317_v25 = vld [vmem:[%s6472_s4 + $0x8] sm:$0xff] }
 0x532   : > { %3511 = vmatpush.bf16.msrb.mxu2 %v4309_v42  ;;  %3499 = vmatpush.bf16.msra.mxu1 %v4300_v47 }
 0x533   : > { %3161 = vst.msk [vmem:[#allocation4 + $0x70] sm:$0xff] %vm2177_vm9, %v3145_v20  ;;  %v3063_v45 = vpop.permute.xlu0 %3062  ;;  %v3209_v20 = vor.u32 %v3208_v55, %v3207_v40  ;;  %v3629_v55 = vld [vmem:[%s6473_s5 + $0x28] sm:$0x3] }
 0x534   : > { %v3080_v23 = vsel %vm3064_vm11, %v3061_v2, %v3063_v45  ;;  %v3243_v2 = vor.u32 %v3242_v17, %v3241_v63  ;;  %v4327_v17 = vld [vmem:[%s6473_s5 + $0x20] sm:$0xff] }
 0x535   : > { %v3112_v59 = vmax.f32 %v6187_v21, %v3080_v23 }
 0x536   : > { %3512 = vmatpush.bf16.msrb.mxu2 %v4308_v14  ;;  %3500 = vmatpush.bf16.msra.mxu1 %v4299_v16 }
 0x537   : > { %v3130_v21 = vadd.f32 %v6223_v12, %v3112_v59  ;;  %v4292_v12 = vld [vmem:[%s6471_s3 + $0x8] sm:$0xff]  ;;  %v4291_v59 = vld [vmem:[%s6471_s3] sm:$0xff] }
 0x538   : > { %3486 = vmatpush.bf16.msra.mxu0 %v4292_v12 }
 0x539   : > { %v3146_v34 = vmax.f32 %v3130_v21, 0.0  ;;  %v3166_v21 = vld [vmem:[#allocation4] ss:$16 sm:$0x30] }
 0x53a   : > { %v3219_v60 = vld [vmem:[#allocation4 + $0x6] ss:$16 sm:$0xc0]  ;;  %v3227_v29 = vld [vmem:[#allocation4 + $0x7] ss:$16 sm:$0xc0]  ;;  %3513 = vmatpush.bf16.msrb.mxu2 %v4307_v38  ;;  %v3167_v33 = vor.u32 %v3166_v21, %v3165_v11 }
 0x53b   : > { %3162 = vst.msk [vmem:[#allocation4 + $0x78] sm:$0xff] %vm2177_vm9, %v3146_v34  ;;  %v3220_v6 = vor.u32 %v3219_v60, %v3218_v8  ;;  %v3228_v53 = vor.u32 %v3227_v29, %v3226_v32  ;;  %v3185_v52 = vld [vmem:[#allocation4 + $0x2] ss:$16 sm:$0xc0] }
 0x53c   : > { %v3186_v30 = vor.u32 %v3185_v52, %v3184_v3  ;;  %v3193_v18 = vld [vmem:[#allocation4 + $0x3] ss:$16 sm:$0xc0]  ;;  %v3202_v48 = vld [vmem:[#allocation4 + $0x4] ss:$16 sm:$0xc0]  ;;  %3487 = vmatpush.bf16.msra.mxu0 %v4291_v59 }
 0x53d   : > { %v3229_v31 = vmax.f32 %v3220_v6, %v3228_v53  ;;  %v3194_v56 = vor.u32 %v3193_v18, %v3192_v9  ;;  %v3210_v41 = vld [vmem:[#allocation4 + $0x5] ss:$16 sm:$0xc0]  ;;  %v3203_v22 = vor.u32 %v3202_v48, %v3201_v46  ;;  %v3168_v35 = vld [vmem:[#allocation4] ss:$16 sm:$0xc0]  ;;  %v3588_v6 = vpack.c.b16 %v3580_v26, %v3580_v26 }
 0x53e   : > { %v3211_v62 = vor.u32 %v3210_v41, %v3209_v20  ;;  %v3176_v57 = vld [vmem:[#allocation4 + $0x1] ss:$16 sm:$0xc0]  ;;  %v3169_v34 = vor.u32 %v3168_v35, %v3167_v33  ;;  %v4321_v9 = vld [vmem:[%s6472_s4 + $0x28] sm:$0xff]  ;;  %v4326_v41 = vld [vmem:[%s6473_s5 + $0x18] sm:$0xff] }
 0x53f   : > { %3256 = vrot.lane.b32.xlu1 %v3229_v31, %s4778_s8  ;;  %v3195_v27 = vmax.f32 %v3186_v30, %v3194_v56  ;;  %v3177_v8 = vor.u32 %v3176_v57, %v3175_v50  ;;  %v3602_v53 = vsel %vm3600_vm0, %v3588_v6, 0  ;;  %v4322_v52 = vld [vmem:[%s6472_s4 + $0x30] sm:$0xff]  ;;  %v4319_v30 = vld [vmem:[%s6472_s4 + $0x18] sm:$0xff]  ;;  %v3653_v31 = vunpack.c.l.b16 %v3629_v55  ;;  %v4316_v56 = vld [vmem:[%s6472_s4] sm:$0xff]  ;;  %s4224_s8 = sshll.u32 %s4842_s28, 3  ;;  %s3687_s28 = scalar_lea.sflag [#allocation6], %s270_s29 }
 0x540   : > { %v3212_v19 = vmax.f32 %v3203_v22, %v3211_v62  ;;  %3604 = vmatpush.bf16.msrb.mxu0 %v3602_v53  ;;  %v4318_v18 = vld [vmem:[%s6472_s4 + $0x10] sm:$0xff]  ;;  %v4701_v46 = vld [vmem:[%s6474_s6 + $0x2] ss:$0 sm:$0xff]  ;;  %v4702_v59 = vld [vmem:[%s6474_s6 + $0x3] ss:$0 sm:$0xff]  ;;  %s3697_s14 = scalar_lea.hbm %s6475_s7, %s4224_s8 }
 0x541   : > { %3248 = vrot.lane.b32.xlu0 %v3195_v27, %s4776_s23  ;;  %v3178_v39 = vmax.f32 %v3169_v34, %v3177_v8  ;;  %v3659_v40 = vpack.c.b16 %v3653_v31, %v3653_v31  ;;  %v4325_v27 = vld [vmem:[%s6473_s5 + $0x10] sm:$0xff]  ;;  %v4323_v38 = vld [vmem:[%s6473_s5] sm:$0xff]  ;;  %s3701_s20 = sshll.u32 %s3697_s14, 4  ;;  %s3702_s20 = int_to_ptr.hbm [resolvable:$true] %s3701_s20 }
 0x542   : > { %v3236_v45 = vld [vmem:[#allocation4 + $0x8] ss:$16 sm:$0xc0]  ;;  %v3244_v5 = vld [vmem:[#allocation4 + $0x9] ss:$16 sm:$0xc0] }
 0x543   : > { %v3237_v23 = vor.u32 %v3236_v45, %v3235_v51  ;;  %v3245_v13 = vor.u32 %v3244_v5, %v3243_v2  ;;  %v3669_v61 = vsel %vm2569_vm8, %v3659_v40, 0  ;;  %s4719_s21 = sshra.s32 %s3702_s20, 4  ;;  %s4720_s21 = int_to_ptr.hbm [resolvable:$true] %s4719_s21 }
 0x544   : > { %3605 = vmatpush.bf16.msrb.mxu0 %v4322_v52  ;;  %3673 = vmatpush.bf16.msrb.mxu1 %v3669_v61  ;;  %s4721_s17 = scalar_lea.hbm %s4720_s21, 8  ;;  %p4726_p0 = scmp.lt.s32.totalorder %s4720_s21, %s6475_s7 }
 0x545   : > { %v3246_v15 = vmax.f32 %v3237_v23, %v3245_v13  ;;  %p4722_p11 = scmp.ne.s32.totalorder %s4720_s21, %s4721_s17 }
 0x547   : > { %3252 = vrot.lane.b32.xlu1 %v3212_v19, %s4779_s18  ;;  %3260 = vrot.lane.b32.xlu2 %v3246_v15, %s4780_s9  ;;  %v4324_v15 = vld [vmem:[%s6473_s5 + $0x8] sm:$0xff]  ;;  %s3765_s18 = sshll.u32 %s270_s29, 3  ;;  %p4723_p12 = pnand %p4722_p11, %p4859_p5 }
 0x548   : > { %3606 = vmatpush.bf16.msrb.mxu0 %v4321_v9  ;;  %3674 = vmatpush.bf16.msrb.mxu1 %v4327_v17  ;;  %s272_s16 = scalar_lea.vmem [#allocation5], %s3765_s18  ;;  %s4725_s18 = scalar_lea.hbm %s6475_s7, 16 }
 0x549   : > { %s3699_s19 = sshll.u32 %s272_s16, 4  ;;  %p4724_p13 = pneg %p4723_p12  ;;  %s3700_s19 = int_to_ptr.vmem [resolvable:$true] %s3699_s19 }
 0x54a   : > { %p4727_p1 = scmp.lt.s32.totalorder %s4725_s18, %s4721_s17 }
 0x54c   : > { %3607 = vmatpush.bf16.msrb.mxu0 %v4320_v54  ;;  %3675 = vmatpush.bf16.msrb.mxu1 %v4326_v41  ;;  %p4728_p2 = por %p4727_p1, %p4726_p0 }
 0x54e   : > { %p4729_p3 = pnand %p4728_p2, %p4724_p13 }
 0x550   : > { %3608 = vmatpush.bf16.msrb.mxu0 %v4319_v30  ;;  %3676 = vmatpush.bf16.msrb.mxu1 %v4325_v27 }
 0x554   : > { %3609 = vmatpush.bf16.msrb.mxu0 %v4318_v18  ;;  %3677 = vmatpush.bf16.msrb.mxu1 %v4324_v15 }
 0x558   : > { %3610 = vmatpush.bf16.msrb.mxu0 %v4317_v25  ;;  %3678 = vmatpush.bf16.msrb.mxu1 %v4323_v38 }
 0x55c   : > { %3611 = vmatpush.bf16.msrb.mxu0 %v4316_v56 }
 0x5a1   : > { %v3261_v4 = vpop.permute.xlu2 %3260 }
 0x5a2   : > { %v3273_v42 = vpack.c.bf16 %v3261_v4, %v3261_v4 }
 0x5a4   : > { %4172 = vmatmul.msk.bf16.vlgmr.msrb.gmra.mxu3 %vm3476_vm12, %v3273_v42 }
 0x5b1   : > { %v3257_v32 = vpop.permute.xlu1 %3256 }
 0x5b2   : > { %v3269_v44 = vsel %vm3268_vm13, %v3257_v32, %v3261_v4 }
 0x5b3   : > { %v3272_v10 = vpack.c.bf16 %v3269_v44, %v3269_v44  ;;  %v3249_v14 = vpop.permute.xlu0 %3248 }
 0x5b4   : > { %v3263_v12 = vsel %vm2177_vm9, %v3178_v39, %v3249_v14 }
 0x5b5   : > { %v3270_v47 = vpack.c.bf16 %v3263_v12, %v3263_v12  ;;  %3514 = vmatmul.bf16.vlgmr.msrb.gmra.mxu2 %v3272_v10 }
 0x5b7   : > { %3488 = vmatmul.bf16.vlgmr.msra.gmra.mxu0 %v3270_v47 }
 0x5b9   : > { %v3253_v60 = vpop.permute.xlu1 %3252 }
 0x5ba   : > { %v3265_v29 = vsel %vm3264_vm14, %v3249_v14, %v3253_v60 }
 0x5bb   : > { %v3267_v3 = vsel %vm3266_vm15, %v3265_v29, %v3257_v32 }
 0x5bc   : > { %v3271_v58 = vpack.c.bf16 %v3267_v3, %v3267_v3 }
 0x5be   : > { %3501 = vmatmul.bf16.vlgmr.msra.gmra.mxu1 %v3271_v58 }
 0x627   : > { %v3528_v1 = vpop.f32.mrf.mxu3 }
 0x62f   : > { %v3530_v48 = vpop.f32.mrf.mxu3 }
 0x634   : > { %v3489_v37 = vpop.f32.mrf.mxu0 }
 0x635   : > { %v3490_v63 = vadd.f32 %v4701_v46, %v3489_v37 }
 0x638   : > { %v3515_v20 = vpop.f32.mrf.mxu2 }
 0x63b   : > { %v3502_v22 = vpop.f32.mrf.mxu1 }
 0x63c   : > { %v3491_v62 = vpop.f32.mrf.mxu0  ;;  %v3503_v51 = vadd.f32 %v3502_v22, %v3490_v63 }
 0x63e   : > { %v3516_v2 = vadd.f32 %v3515_v20, %v3503_v51 }
 0x640   : > { %v3529_v45 = vadd.f32 %v3528_v1, %v3516_v2  ;;  %v3517_v5 = vpop.f32.mrf.mxu2 }
 0x642   : > { %v3532_v23 = vmax.f32 %v3529_v45, 0.0 }
 0x643   : > { %v3504_v13 = vpop.f32.mrf.mxu1 }
 0x644   : > { %v3533_v19 = vpack.c.bf16 %v3532_v23, %v3532_v23 }
 0x646   : > { %4201 = vmatmul.msk.bf16.vlgmr.msrb.gmra.mxu0 %vm3596_vm1, %v3533_v19 }
 0x6c3   : > { %v3613_v16 = vpop.f32.mrf.mxu0 }
 0x6c4   : > { %v3614_v4 = vadd.f32 %v4702_v59, %v3613_v16 }
 0x6c6   : > { %v3617_v42 = vmax.f32 %v3614_v4, 0.0 }
 0x6c8   : > { %v3618_v36 = vpack.c.bf16 %v3617_v42, %v3617_v42 }
 0x6ca   : > { %4222 = vmatmul.msk.bf16.vlgmr.msrb.gmra.mxu1 %vm1438_vm4, %v3618_v36 }
 0x6cb   : > { %v3615_v28 = vpop.f32.mrf.mxu0 }
 0x747   : > { %v3680_v43 = vpop.f32.mrf.mxu1 }
 0x748   : > { %v3681_v21 = vadd.f32 %v4703_v49, %v3680_v43 }
 0x74a   : > { %3685 = vst.msk [vmem:[%s272_s16] sm:$0xff] %vm3684_vm2, %v3681_v21 }
 0x74b   : > { %4732 = shalt.err (!%p4729_p3)
}
 0x74c   : > { %4328 = dma.vmem_to_hbm [thread:$0]  (%p4859_p5), %s3700_s19, 128, %s3702_s20, %s3687_s28  }
 0x74f   : > { %v3682_v0 = vpop.f32.mrf.mxu1 }
 0x750 PF: > { %p4334_p4 = scmp.ge.s32.totalorder %s4767_s27, 2  ;;  %s3713_s29 = sand.u32 1, %s4755_s24  }
 0x751   : > { %s3714_s14 = scalar_lea.sflag [#allocation6], %s3713_s29 }
 0x752   : > { %p4331_p7 = pnand %p4334_p4, %p4863_p6 }
 0x754   : > { %p4332_p8 = pneg %p4331_p7 }
 0x756   : > { %4750 = dma.done.wait (%p4332_p8), %s3714_s14, 128  }
 0x757   : > { %4752 = vsyncadd (%p4332_p8), %s3714_s14, 4294967168  ;;  %p17_p9 = scmp.ge.s32.totalorder %s4846_s30, 4   ;;  %s6478_s24 = smov %s4759_s25 }
 0x758   : > { %s6479_s25 = smov %s4763_s26  ;;  %s6480_s26 = smov %s4857_s10 }
 0x759   : > { %s6481_s27 = smov %s4846_s30  ;;  %19 = sbr.rel (!%p17_p9) target bundleno = 3 (0x3), region = 251 }
 0x75e   :  { %3720 = vsyncpa [#allocation6], 1 }
 0x75f   :  { %3722 = vsyncpa [#allocation6 + $0x1], 1 }

</bundles_post_ra>
